<compile_context>
chip_gen: v6e
topology: v6e:2x2x1
jax: 0.10.0
libtpu: 0.0.40
codegen_flags: <defaults>
</compile_context>

<pallas_src>
import functools

import jax
import jax.numpy as jnp
from jax.experimental import pallas as pl
from jax.experimental.pallas import tpu as pltpu


def _poscnn_kernel(x_ref, w_ref, b_ref, o_ref, row_ref, *, D, H, W, TB):
    # x_ref:  (TB, D, H, W, C)   input block (channels-last, unpadded)
    # w_ref:  (27, W, C)         depthwise taps, sublane-replicated;
    #                            tap = (od+1)*9 + (oh+1)*3 + (ow+1)
    # b_ref:  (W, C)             conv bias, sublane-replicated, f32
    # o_ref:  (TB, D, H, W, C)   output block
    # row_ref:(H, W+2, C)        VMEM scratch with zero halo columns, used to
    #                            realize the +/-1 shift along W (sublane axis)
    f32 = jnp.float32
    C = x_ref.shape[-1]
    xdt = x_ref.dtype

    # Zero the shift buffer once per grid step.  Only its interior columns
    # [1, W] are ever overwritten, so the halo columns stay zero.
    row_ref[...] = jnp.zeros((H, W + 2, C), xdt)

    bias = b_ref[...].astype(f32)                     # (W, C) -> broadcasts over H
    zrow = jnp.zeros((1, W, C), xdt)

    def tap(od, oh, ow):
        return (od + 1) * 9 + (oh + 1) * 3 + (ow + 1)

    def shift_h(v, oh):
        # v'[h] = v[h + oh], zero-filled at the H boundary.  H is a major
        # (non-tiled) axis, so these are cheap whole-vreg moves.
        if oh == 0:
            return v
        if oh == 1:
            return jnp.concatenate([v[1:], zrow], axis=0)
        return jnp.concatenate([zrow, v[:-1]], axis=0)

    for tb in range(TB):
        def plane_body(d, carry):
            cur = x_ref[tb, d]                                     # (H, W, C)
            # D halo: clamped neighbour reads, zeroed at the volume boundary.
            prv = x_ref[tb, jnp.maximum(d - 1, 0)] * (d > 0).astype(xdt)
            nxt = x_ref[tb, jnp.minimum(d + 1, D - 1)] * (d < D - 1).astype(xdt)
            planes = (prv, cur, nxt)                               # od = -1, 0, +1

            # Residual (s == 1 path) + conv bias, accumulated in f32.
            acc = cur.astype(f32) + bias

            for ow in (-1, 0, 1):
                t_ow = None
                for oh in (-1, 0, 1):
                    # Per-channel weights commute with spatial shifts, so sum
                    # over od first (pure VALU FMAs), then shift along H.
                    u = planes[0] * w_ref[tap(-1, oh, ow)]
                    u = u + planes[1] * w_ref[tap(0, oh, ow)]
                    u = u + planes[2] * w_ref[tap(1, oh, ow)]
                    u = shift_h(u, oh)
                    t_ow = u if t_ow is None else t_ow + u
                if ow == 0:
                    acc = acc + t_ow.astype(f32)
                else:
                    # +/-1 shift along W (the sublane axis): write the interior
                    # of the zero-haloed scratch, read back offset by ow.  The
                    # shuffle lands on the ld/st path, not the binding VALU slot.
                    row_ref[:, 1:W + 1, :] = t_ow
                    acc = acc + row_ref[:, 1 + ow:1 + ow + W, :].astype(f32)

            # One lane-dense store per depth plane.
            o_ref[tb, d] = acc.astype(o_ref.dtype)
            return carry

        jax.lax.fori_loop(0, D, plane_body, 0, unroll=True)


def poscnn_forward(x, w_dw, bias, *, s=1, block_b=None):
    """PosCNN forward (s == 1 residual path).

    x:    (B, D, H, W, C) channels-last features
    w_dw: (C, 1, 3, 3, 3) depthwise Conv3d weight (PyTorch layout, groups=C)
    bias: (C,)            Conv3d bias
    """
    if s != 1:
        # TODO(synk): s > 1 (strided, no-residual) path not implemented.
        raise NotImplementedError("only the s == 1 (residual) path is implemented")

    B, D, H, W, C = x.shape
    assert w_dw.shape == (C, 1, 3, 3, 3)
    assert bias.shape == (C,)

    # Pick TB so the grid has >= 4 steps when possible (pipelining + 2-TC split).
    if block_b is None:
        cands = [tb for tb in range(1, B + 1) if B % tb == 0 and B // tb >= 4]
        block_b = max(cands) if cands else 1
    TB = block_b
    assert B % TB == 0

    # (C,1,3,3,3) -> (3,3,3,C) -> (27,C) -> sublane-replicated (27, W, C) slab
    # so per-tap multiplies need no broadcast op inside the kernel.
    w27 = jnp.transpose(w_dw[:, 0], (1, 2, 3, 0)).reshape(27, C)
    w_slab = jnp.broadcast_to(w27[:, None, :], (27, W, C)).astype(x.dtype)
    b_slab = jnp.broadcast_to(bias[None, :], (W, C)).astype(jnp.float32)

    kernel = functools.partial(_poscnn_kernel, D=D, H=H, W=W, TB=TB)

    # CostEstimate: only actual operands, FMA = 2 flops per tap + residual/bias.
    elems = B * D * H * W * C
    flops = 2 * 27 * elems + 2 * elems
    bytes_accessed = int(2 * elems * x.dtype.itemsize
                         + w_slab.size * w_slab.dtype.itemsize
                         + b_slab.size * b_slab.dtype.itemsize)
    cost = pl.CostEstimate(flops=flops, transcendentals=0,
                           bytes_accessed=bytes_accessed)

    block_bytes = TB * D * H * W * C * x.dtype.itemsize
    vmem_limit = int(min(max(4 * block_bytes + (6 << 20), 16 << 20), 100 << 20))

    # TODO(synk): for very large D*H*W stages (e.g. 56^3 D-Former blocks) add a
    # halo'd D/H grid axis so a block fits v7x's 64 MiB VMEM.
    return pl.pallas_call(
        kernel,
        out_shape=jax.ShapeDtypeStruct((B, D, H, W, C), x.dtype),
        grid_spec=pltpu.PrefetchScalarGridSpec(
            num_scalar_prefetch=0,
            grid=(B // TB,),
            in_specs=[
                pl.BlockSpec((TB, D, H, W, C), lambda i: (i, 0, 0, 0, 0)),
                pl.BlockSpec((27, W, C), lambda i: (0, 0, 0)),
                pl.BlockSpec((W, C), lambda i: (0, 0)),
            ],
            out_specs=pl.BlockSpec((TB, D, H, W, C), lambda i: (i, 0, 0, 0, 0)),
            scratch_shapes=[pltpu.VMEM((H, W + 2, C), x.dtype)],
        ),
        compiler_params=pltpu.CompilerParams(
            dimension_semantics=("parallel",),
            vmem_limit_bytes=vmem_limit),
        cost_estimate=cost,
    )(x, w_slab, b_slab)


def poscnn_reference(x, w_dw, bias, *, s=1):
    """Pure-JAX reference matching the PyTorch forward exactly."""
    B, D, H, W, C = x.shape
    lhs = jnp.transpose(x, (0, 4, 1, 2, 3))                       # b c d h w
    out = jax.lax.conv_general_dilated(
        lhs, w_dw, window_strides=(s, s, s),
        padding=((1, 1), (1, 1), (1, 1)),
        dimension_numbers=("NCDHW", "OIDHW", "NCDHW"),
        feature_group_count=C,
        precision=jax.lax.Precision.HIGHEST)
    out = out + bias.reshape(1, C, 1, 1, 1)
    if s == 1:
        out = out + lhs
    return jnp.transpose(out, (0, 2, 3, 4, 1))                    # b d h w c


if __name__ == "__main__":
    # Small PosCNN config: in_chans == embed_dim (depthwise, groups=embed_dim),
    # C = 128 so channels fill the 128-lane axis exactly; s = 1 (residual path).
    B, D, H, W = 4, 4, 8, 8
    C = 128

    key = jax.random.PRNGKey(0)
    kx, kw, kb = jax.random.split(key, 3)
    x = jax.random.normal(kx, (B, D, H, W, C), dtype=jnp.float32)
    w_dw = 0.05 * jax.random.normal(kw, (C, 1, 3, 3, 3), dtype=jnp.float32)
    bias = 0.01 * jax.random.normal(kb, (C,), dtype=jnp.float32)

    out = poscnn_forward(x, w_dw, bias, s=1)
    out = jax.block_until_ready(out)

    ref = jax.block_until_ready(poscnn_reference(x, w_dw, bias, s=1))

    assert out.shape == (B, D, H, W, C)
    err = jnp.max(jnp.abs(out - ref))
    assert jnp.allclose(out, ref, rtol=1e-5, atol=1e-4), f"max abs err = {err}"

    print("KERNEL_OK")
</pallas_src>

<mosaic_0001>
module attributes {stable_mosaic.version = 11 : i64} {
  func.func @_poscnn_kernel(%arg0: i32, %arg1: memref<1x4x8x8x128xf32, #tpu.memory_space<vmem>>, %arg2: memref<27x8x128xf32, #tpu.memory_space<vmem>>, %arg3: memref<8x128xf32, #tpu.memory_space<vmem>>, %arg4: memref<1x4x8x8x128xf32, #tpu.memory_space<vmem>>, %arg5: memref<8x10x128xf32, #tpu.memory_space<vmem>>) attributes {dimension_semantics = [#tpu.dimension_semantics<parallel>], iteration_bounds = array<i64: 4>, scalar_prefetch = 0 : i64, scratch_operands = 1 : i64, tpu.core_type = #tpu.core_type<tc>, window_params = [{transform_indices = @transform_0, window_bounds = array<i64: 1, 4, 8, 8, 128>}, {pipeline_mode = #tpu.pipeline_mode<synchronous>, transform_indices = @transform_1, window_bounds = array<i64: 27, 8, 128>}, {pipeline_mode = #tpu.pipeline_mode<synchronous>, transform_indices = @transform_2, window_bounds = array<i64: 8, 128>}, {transform_indices = @transform_3, window_bounds = array<i64: 1, 4, 8, 8, 128>}]} {
    %cst = arith.constant 0.000000e+00 : f32
    %0 = vector.broadcast %cst : f32 to vector<8x10x128xf32>
    %c0 = arith.constant 0 : index
    %c0_0 = arith.constant 0 : index
    %c0_1 = arith.constant 0 : index
    %1 = vector.load %arg5[%c0, %c0_0, %c0_1] : memref<8x10x128xf32, #tpu.memory_space<vmem>>, vector<8x10x128xf32>
    tpu.vector_store %arg5[%c0, %c0_0, %c0_1], %0 {strides = array<i32>} : memref<8x10x128xf32, #tpu.memory_space<vmem>>, vector<8x10x128xf32>,
    %c0_2 = arith.constant 0 : index
    %c0_3 = arith.constant 0 : index
    %2 = vector.load %arg3[%c0_2, %c0_3] : memref<8x128xf32, #tpu.memory_space<vmem>>, vector<8x128xf32>
    %cst_4 = arith.constant 0.000000e+00 : f32
    %3 = vector.broadcast %cst_4 : f32 to vector<1x8x128xf32>
    %c0_i32 = arith.constant 0 : i32
    %c0_5 = arith.constant 0 : index
    %4 = arith.index_cast %c0_i32 : i32 to index
    %c0_6 = arith.constant 0 : index
    %c0_7 = arith.constant 0 : index
    %c0_8 = arith.constant 0 : index
    %5 = vector.load %arg1[%c0_5, %4, %c0_6, %c0_7, %c0_8] : memref<1x4x8x8x128xf32, #tpu.memory_space<vmem>>, vector<1x1x8x8x128xf32>
    %6 = vector.shape_cast %5 : vector<1x1x8x8x128xf32> to vector<8x8x128xf32>
    %c1_i32 = arith.constant 1 : i32
    %7 = arith.subi %c0_i32, %c1_i32 : i32
    %c0_i32_9 = arith.constant 0 : i32
    %8 = arith.maxsi %7, %c0_i32_9 : i32
    %c0_10 = arith.constant 0 : index
    %9 = arith.index_cast %8 : i32 to index
    %c0_11 = arith.constant 0 : index
    %c0_12 = arith.constant 0 : index
    %c0_13 = arith.constant 0 : index
    %10 = vector.load %arg1[%c0_10, %9, %c0_11, %c0_12, %c0_13] : memref<1x4x8x8x128xf32, #tpu.memory_space<vmem>>, vector<1x1x8x8x128xf32>
    %11 = vector.shape_cast %10 : vector<1x1x8x8x128xf32> to vector<8x8x128xf32>
    %c0_i32_14 = arith.constant 0 : i32
    %12 = arith.cmpi sgt, %c0_i32, %c0_i32_14 : i32
    %13 = arith.extui %12 : i1 to i32
    %14 = arith.sitofp %13 : i32 to f32
    %15 = vector.broadcast %14 : f32 to vector<8x8x128xf32>
    %16 = arith.mulf %11, %15 : vector<8x8x128xf32>
    %c1_i32_15 = arith.constant 1 : i32
    %17 = arith.addi %c0_i32, %c1_i32_15 : i32
    %c3_i32 = arith.constant 3 : i32
    %18 = arith.minsi %17, %c3_i32 : i32
    %c0_16 = arith.constant 0 : index
    %19 = arith.index_cast %18 : i32 to index
    %c0_17 = arith.constant 0 : index
    %c0_18 = arith.constant 0 : index
    %c0_19 = arith.constant 0 : index
    %20 = vector.load %arg1[%c0_16, %19, %c0_17, %c0_18, %c0_19] : memref<1x4x8x8x128xf32, #tpu.memory_space<vmem>>, vector<1x1x8x8x128xf32>
    %21 = vector.shape_cast %20 : vector<1x1x8x8x128xf32> to vector<8x8x128xf32>
    %c3_i32_20 = arith.constant 3 : i32
    %22 = arith.cmpi slt, %c0_i32, %c3_i32_20 : i32
    %23 = arith.extui %22 : i1 to i32
    %24 = arith.sitofp %23 : i32 to f32
    %25 = vector.broadcast %24 : f32 to vector<8x8x128xf32>
    %26 = arith.mulf %21, %25 : vector<8x8x128xf32>
    %27 = vector.shape_cast %2 : vector<8x128xf32> to vector<1x8x128xf32>
    %28 = vector.broadcast %27 : vector<1x8x128xf32> to vector<8x8x128xf32>
    %29 = arith.addf %6, %28 : vector<8x8x128xf32>
    %c0_21 = arith.constant 0 : index
    %c0_22 = arith.constant 0 : index
    %c0_23 = arith.constant 0 : index
    %30 = vector.load %arg2[%c0_21, %c0_22, %c0_23] : memref<27x8x128xf32, #tpu.memory_space<vmem>>, vector<1x8x128xf32>
    %31 = vector.shape_cast %30 : vector<1x8x128xf32> to vector<8x128xf32>
    %32 = vector.shape_cast %31 : vector<8x128xf32> to vector<1x8x128xf32>
    %33 = vector.broadcast %32 : vector<1x8x128xf32> to vector<8x8x128xf32>
    %34 = arith.mulf %16, %33 : vector<8x8x128xf32>
    %c9 = arith.constant 9 : index
    %c0_24 = arith.constant 0 : index
    %c0_25 = arith.constant 0 : index
    %35 = vector.load %arg2[%c9, %c0_24, %c0_25] : memref<27x8x128xf32, #tpu.memory_space<vmem>>, vector<1x8x128xf32>
    %36 = vector.shape_cast %35 : vector<1x8x128xf32> to vector<8x128xf32>
    %37 = vector.shape_cast %36 : vector<8x128xf32> to vector<1x8x128xf32>
    %38 = vector.broadcast %37 : vector<1x8x128xf32> to vector<8x8x128xf32>
    %39 = arith.mulf %6, %38 : vector<8x8x128xf32>
    %40 = arith.addf %34, %39 : vector<8x8x128xf32>
    %c18 = arith.constant 18 : index
    %c0_26 = arith.constant 0 : index
    %c0_27 = arith.constant 0 : index
    %41 = vector.load %arg2[%c18, %c0_26, %c0_27] : memref<27x8x128xf32, #tpu.memory_space<vmem>>, vector<1x8x128xf32>
    %42 = vector.shape_cast %41 : vector<1x8x128xf32> to vector<8x128xf32>
    %43 = vector.shape_cast %42 : vector<8x128xf32> to vector<1x8x128xf32>
    %44 = vector.broadcast %43 : vector<1x8x128xf32> to vector<8x8x128xf32>
    %45 = arith.mulf %26, %44 : vector<8x8x128xf32>
    %46 = arith.addf %40, %45 : vector<8x8x128xf32>
    %47 = vector.extract_strided_slice %46 {offsets = [0, 0, 0], sizes = [7, 8, 128], strides = [1, 1, 1]} : vector<8x8x128xf32> to vector<7x8x128xf32>
    %48 = tpu.concatenate %3, %47 in 0 : vector<1x8x128xf32>, vector<7x8x128xf32> -> vector<8x8x128xf32>
    %c3 = arith.constant 3 : index
    %c0_28 = arith.constant 0 : index
    %c0_29 = arith.constant 0 : index
    %49 = vector.load %arg2[%c3, %c0_28, %c0_29] : memref<27x8x128xf32, #tpu.memory_space<vmem>>, vector<1x8x128xf32>
    %50 = vector.shape_cast %49 : vector<1x8x128xf32> to vector<8x128xf32>
    %51 = vector.shape_cast %50 : vector<8x128xf32> to vector<1x8x128xf32>
    %52 = vector.broadcast %51 : vector<1x8x128xf32> to vector<8x8x128xf32>
    %53 = arith.mulf %16, %52 : vector<8x8x128xf32>
    %c12 = arith.constant 12 : index
    %c0_30 = arith.constant 0 : index
    %c0_31 = arith.constant 0 : index
    %54 = vector.load %arg2[%c12, %c0_30, %c0_31] : memref<27x8x128xf32, #tpu.memory_space<vmem>>, vector<1x8x128xf32>
    %55 = vector.shape_cast %54 : vector<1x8x128xf32> to vector<8x128xf32>
    %56 = vector.shape_cast %55 : vector<8x128xf32> to vector<1x8x128xf32>
    %57 = vector.broadcast %56 : vector<1x8x128xf32> to vector<8x8x128xf32>
    %58 = arith.mulf %6, %57 : vector<8x8x128xf32>
    %59 = arith.addf %53, %58 : vector<8x8x128xf32>
    %c21 = arith.constant 21 : index
    %c0_32 = arith.constant 0 : index
    %c0_33 = arith.constant 0 : index
    %60 = vector.load %arg2[%c21, %c0_32, %c0_33] : memref<27x8x128xf32, #tpu.memory_space<vmem>>, vector<1x8x128xf32>
    %61 = vector.shape_cast %60 : vector<1x8x128xf32> to vector<8x128xf32>
    %62 = vector.shape_cast %61 : vector<8x128xf32> to vector<1x8x128xf32>
    %63 = vector.broadcast %62 : vector<1x8x128xf32> to vector<8x8x128xf32>
    %64 = arith.mulf %26, %63 : vector<8x8x128xf32>
    %65 = arith.addf %59, %64 : vector<8x8x128xf32>
    %66 = arith.addf %48, %65 : vector<8x8x128xf32>
    %c6 = arith.constant 6 : index
    %c0_34 = arith.constant 0 : index
    %c0_35 = arith.constant 0 : index
    %67 = vector.load %arg2[%c6, %c0_34, %c0_35] : memref<27x8x128xf32, #tpu.memory_space<vmem>>, vector<1x8x128xf32>
    %68 = vector.shape_cast %67 : vector<1x8x128xf32> to vector<8x128xf32>
    %69 = vector.shape_cast %68 : vector<8x128xf32> to vector<1x8x128xf32>
    %70 = vector.broadcast %69 : vector<1x8x128xf32> to vector<8x8x128xf32>
    %71 = arith.mulf %16, %70 : vector<8x8x128xf32>
    %c15 = arith.constant 15 : index
    %c0_36 = arith.constant 0 : index
    %c0_37 = arith.constant 0 : index
    %72 = vector.load %arg2[%c15, %c0_36, %c0_37] : memref<27x8x128xf32, #tpu.memory_space<vmem>>, vector<1x8x128xf32>
    %73 = vector.shape_cast %72 : vector<1x8x128xf32> to vector<8x128xf32>
    %74 = vector.shape_cast %73 : vector<8x128xf32> to vector<1x8x128xf32>
    %75 = vector.broadcast %74 : vector<1x8x128xf32> to vector<8x8x128xf32>
    %76 = arith.mulf %6, %75 : vector<8x8x128xf32>
    %77 = arith.addf %71, %76 : vector<8x8x128xf32>
    %c24 = arith.constant 24 : index
    %c0_38 = arith.constant 0 : index
    %c0_39 = arith.constant 0 : index
    %78 = vector.load %arg2[%c24, %c0_38, %c0_39] : memref<27x8x128xf32, #tpu.memory_space<vmem>>, vector<1x8x128xf32>
    %79 = vector.shape_cast %78 : vector<1x8x128xf32> to vector<8x128xf32>
    %80 = vector.shape_cast %79 : vector<8x128xf32> to vector<1x8x128xf32>
    %81 = vector.broadcast %80 : vector<1x8x128xf32> to vector<8x8x128xf32>
    %82 = arith.mulf %26, %81 : vector<8x8x128xf32>
    %83 = arith.addf %77, %82 : vector<8x8x128xf32>
    %84 = vector.extract_strided_slice %83 {offsets = [1, 0, 0], sizes = [7, 8, 128], strides = [1, 1, 1]} : vector<8x8x128xf32> to vector<7x8x128xf32>
    %85 = tpu.concatenate %84, %3 in 0 : vector<7x8x128xf32>, vector<1x8x128xf32> -> vector<8x8x128xf32>
    %86 = arith.addf %66, %85 : vector<8x8x128xf32>
    %c0_40 = arith.constant 0 : index
    %c1 = arith.constant 1 : index
    %c0_41 = arith.constant 0 : index
    %87 = vector.load %arg5[%c0_40, %c1, %c0_41] : memref<8x10x128xf32, #tpu.memory_space<vmem>>, vector<8x8x128xf32>
    tpu.vector_store %arg5[%c0_40, %c1, %c0_41], %86 {strides = array<i32>} : memref<8x10x128xf32, #tpu.memory_space<vmem>>, vector<8x8x128xf32>,
    %c0_42 = arith.constant 0 : index
    %c0_43 = arith.constant 0 : index
    %c0_44 = arith.constant 0 : index
    %88 = vector.load %arg5[%c0_42, %c0_43, %c0_44] : memref<8x10x128xf32, #tpu.memory_space<vmem>>, vector<8x8x128xf32>
    %89 = arith.addf %29, %88 : vector<8x8x128xf32>
    %c1_45 = arith.constant 1 : index
    %c0_46 = arith.constant 0 : index
    %c0_47 = arith.constant 0 : index
    %90 = vector.load %arg2[%c1_45, %c0_46, %c0_47] : memref<27x8x128xf32, #tpu.memory_space<vmem>>, vector<1x8x128xf32>
    %91 = vector.shape_cast %90 : vector<1x8x128xf32> to vector<8x128xf32>
    %92 = vector.shape_cast %91 : vector<8x128xf32> to vector<1x8x128xf32>
    %93 = vector.broadcast %92 : vector<1x8x128xf32> to vector<8x8x128xf32>
    %94 = arith.mulf %16, %93 : vector<8x8x128xf32>
    %c10 = arith.constant 10 : index
    %c0_48 = arith.constant 0 : index
    %c0_49 = arith.constant 0 : index
    %95 = vector.load %arg2[%c10, %c0_48, %c0_49] : memref<27x8x128xf32, #tpu.memory_space<vmem>>, vector<1x8x128xf32>
    %96 = vector.shape_cast %95 : vector<1x8x128xf32> to vector<8x128xf32>
    %97 = vector.shape_cast %96 : vector<8x128xf32> to vector<1x8x128xf32>
    %98 = vector.broadcast %97 : vector<1x8x128xf32> to vector<8x8x128xf32>
    %99 = arith.mulf %6, %98 : vector<8x8x128xf32>
    %100 = arith.addf %94, %99 : vector<8x8x128xf32>
    %c19 = arith.constant 19 : index
    %c0_50 = arith.constant 0 : index
    %c0_51 = arith.constant 0 : index
    %101 = vector.load %arg2[%c19, %c0_50, %c0_51] : memref<27x8x128xf32, #tpu.memory_space<vmem>>, vector<1x8x128xf32>
    %102 = vector.shape_cast %101 : vector<1x8x128xf32> to vector<8x128xf32>
    %103 = vector.shape_cast %102 : vector<8x128xf32> to vector<1x8x128xf32>
    %104 = vector.broadcast %103 : vector<1x8x128xf32> to vector<8x8x128xf32>
    %105 = arith.mulf %26, %104 : vector<8x8x128xf32>
    %106 = arith.addf %100, %105 : vector<8x8x128xf32>
    %107 = vector.extract_strided_slice %106 {offsets = [0, 0, 0], sizes = [7, 8, 128], strides = [1, 1, 1]} : vector<8x8x128xf32> to vector<7x8x128xf32>
    %108 = tpu.concatenate %3, %107 in 0 : vector<1x8x128xf32>, vector<7x8x128xf32> -> vector<8x8x128xf32>
    %c4 = arith.constant 4 : index
    %c0_52 = arith.constant 0 : index
    %c0_53 = arith.constant 0 : index
    %109 = vector.load %arg2[%c4, %c0_52, %c0_53] : memref<27x8x128xf32, #tpu.memory_space<vmem>>, vector<1x8x128xf32>
    %110 = vector.shape_cast %109 : vector<1x8x128xf32> to vector<8x128xf32>
    %111 = vector.shape_cast %110 : vector<8x128xf32> to vector<1x8x128xf32>
    %112 = vector.broadcast %111 : vector<1x8x128xf32> to vector<8x8x128xf32>
    %113 = arith.mulf %16, %112 : vector<8x8x128xf32>
    %c13 = arith.constant 13 : index
    %c0_54 = arith.constant 0 : index
    %c0_55 = arith.constant 0 : index
    %114 = vector.load %arg2[%c13, %c0_54, %c0_55] : memref<27x8x128xf32, #tpu.memory_space<vmem>>, vector<1x8x128xf32>
    %115 = vector.shape_cast %114 : vector<1x8x128xf32> to vector<8x128xf32>
    %116 = vector.shape_cast %115 : vector<8x128xf32> to vector<1x8x128xf32>
    %117 = vector.broadcast %116 : vector<1x8x128xf32> to vector<8x8x128xf32>
    %118 = arith.mulf %6, %117 : vector<8x8x128xf32>
    %119 = arith.addf %113, %118 : vector<8x8x128xf32>
    %c22 = arith.constant 22 : index
    %c0_56 = arith.constant 0 : index
    %c0_57 = arith.constant 0 : index
    %120 = vector.load %arg2[%c22, %c0_56, %c0_57] : memref<27x8x128xf32, #tpu.memory_space<vmem>>, vector<1x8x128xf32>
    %121 = vector.shape_cast %120 : vector<1x8x128xf32> to vector<8x128xf32>
    %122 = vector.shape_cast %121 : vector<8x128xf32> to vector<1x8x128xf32>
    %123 = vector.broadcast %122 : vector<1x8x128xf32> to vector<8x8x128xf32>
    %124 = arith.mulf %26, %123 : vector<8x8x128xf32>
    %125 = arith.addf %119, %124 : vector<8x8x128xf32>
    %126 = arith.addf %108, %125 : vector<8x8x128xf32>
    %c7 = arith.constant 7 : index
    %c0_58 = arith.constant 0 : index
    %c0_59 = arith.constant 0 : index
    %127 = vector.load %arg2[%c7, %c0_58, %c0_59] : memref<27x8x128xf32, #tpu.memory_space<vmem>>, vector<1x8x128xf32>
    %128 = vector.shape_cast %127 : vector<1x8x128xf32> to vector<8x128xf32>
    %129 = vector.shape_cast %128 : vector<8x128xf32> to vector<1x8x128xf32>
    %130 = vector.broadcast %129 : vector<1x8x128xf32> to vector<8x8x128xf32>
    %131 = arith.mulf %16, %130 : vector<8x8x128xf32>
    %c16 = arith.constant 16 : index
    %c0_60 = arith.constant 0 : index
    %c0_61 = arith.constant 0 : index
    %132 = vector.load %arg2[%c16, %c0_60, %c0_61] : memref<27x8x128xf32, #tpu.memory_space<vmem>>, vector<1x8x128xf32>
    %133 = vector.shape_cast %132 : vector<1x8x128xf32> to vector<8x128xf32>
    %134 = vector.shape_cast %133 : vector<8x128xf32> to vector<1x8x128xf32>
    %135 = vector.broadcast %134 : vector<1x8x128xf32> to vector<8x8x128xf32>
    %136 = arith.mulf %6, %135 : vector<8x8x128xf32>
    %137 = arith.addf %131, %136 : vector<8x8x128xf32>
    %c25 = arith.constant 25 : index
    %c0_62 = arith.constant 0 : index
    %c0_63 = arith.constant 0 : index
    %138 = vector.load %arg2[%c25, %c0_62, %c0_63] : memref<27x8x128xf32, #tpu.memory_space<vmem>>, vector<1x8x128xf32>
    %139 = vector.shape_cast %138 : vector<1x8x128xf32> to vector<8x128xf32>
    %140 = vector.shape_cast %139 : vector<8x128xf32> to vector<1x8x128xf32>
    %141 = vector.broadcast %140 : vector<1x8x128xf32> to vector<8x8x128xf32>
    %142 = arith.mulf %26, %141 : vector<8x8x128xf32>
    %143 = arith.addf %137, %142 : vector<8x8x128xf32>
    %144 = vector.extract_strided_slice %143 {offsets = [1, 0, 0], sizes = [7, 8, 128], strides = [1, 1, 1]} : vector<8x8x128xf32> to vector<7x8x128xf32>
    %145 = tpu.concatenate %144, %3 in 0 : vector<7x8x128xf32>, vector<1x8x128xf32> -> vector<8x8x128xf32>
    %146 = arith.addf %126, %145 : vector<8x8x128xf32>
    %147 = arith.addf %89, %146 : vector<8x8x128xf32>
    %c2 = arith.constant 2 : index
    %c0_64 = arith.constant 0 : index
    %c0_65 = arith.constant 0 : index
    %148 = vector.load %arg2[%c2, %c0_64, %c0_65] : memref<27x8x128xf32, #tpu.memory_space<vmem>>, vector<1x8x128xf32>
    %149 = vector.shape_cast %148 : vector<1x8x128xf32> to vector<8x128xf32>
    %150 = vector.shape_cast %149 : vector<8x128xf32> to vector<1x8x128xf32>
    %151 = vector.broadcast %150 : vector<1x8x128xf32> to vector<8x8x128xf32>
    %152 = arith.mulf %16, %151 : vector<8x8x128xf32>
    %c11 = arith.constant 11 : index
    %c0_66 = arith.constant 0 : index
    %c0_67 = arith.constant 0 : index
    %153 = vector.load %arg2[%c11, %c0_66, %c0_67] : memref<27x8x128xf32, #tpu.memory_space<vmem>>, vector<1x8x128xf32>
    %154 = vector.shape_cast %153 : vector<1x8x128xf32> to vector<8x128xf32>
    %155 = vector.shape_cast %154 : vector<8x128xf32> to vector<1x8x128xf32>
    %156 = vector.broadcast %155 : vector<1x8x128xf32> to vector<8x8x128xf32>
    %157 = arith.mulf %6, %156 : vector<8x8x128xf32>
    %158 = arith.addf %152, %157 : vector<8x8x128xf32>
    %c20 = arith.constant 20 : index
    %c0_68 = arith.constant 0 : index
    %c0_69 = arith.constant 0 : index
    %159 = vector.load %arg2[%c20, %c0_68, %c0_69] : memref<27x8x128xf32, #tpu.memory_space<vmem>>, vector<1x8x128xf32>
    %160 = vector.shape_cast %159 : vector<1x8x128xf32> to vector<8x128xf32>
    %161 = vector.shape_cast %160 : vector<8x128xf32> to vector<1x8x128xf32>
    %162 = vector.broadcast %161 : vector<1x8x128xf32> to vector<8x8x128xf32>
    %163 = arith.mulf %26, %162 : vector<8x8x128xf32>
    %164 = arith.addf %158, %163 : vector<8x8x128xf32>
    %165 = vector.extract_strided_slice %164 {offsets = [0, 0, 0], sizes = [7, 8, 128], strides = [1, 1, 1]} : vector<8x8x128xf32> to vector<7x8x128xf32>
    %166 = tpu.concatenate %3, %165 in 0 : vector<1x8x128xf32>, vector<7x8x128xf32> -> vector<8x8x128xf32>
    %c5 = arith.constant 5 : index
    %c0_70 = arith.constant 0 : index
    %c0_71 = arith.constant 0 : index
    %167 = vector.load %arg2[%c5, %c0_70, %c0_71] : memref<27x8x128xf32, #tpu.memory_space<vmem>>, vector<1x8x128xf32>
    %168 = vector.shape_cast %167 : vector<1x8x128xf32> to vector<8x128xf32>
    %169 = vector.shape_cast %168 : vector<8x128xf32> to vector<1x8x128xf32>
    %170 = vector.broadcast %169 : vector<1x8x128xf32> to vector<8x8x128xf32>
    %171 = arith.mulf %16, %170 : vector<8x8x128xf32>
    %c14 = arith.constant 14 : index
    %c0_72 = arith.constant 0 : index
    %c0_73 = arith.constant 0 : index
    %172 = vector.load %arg2[%c14, %c0_72, %c0_73] : memref<27x8x128xf32, #tpu.memory_space<vmem>>, vector<1x8x128xf32>
    %173 = vector.shape_cast %172 : vector<1x8x128xf32> to vector<8x128xf32>
    %174 = vector.shape_cast %173 : vector<8x128xf32> to vector<1x8x128xf32>
    %175 = vector.broadcast %174 : vector<1x8x128xf32> to vector<8x8x128xf32>
    %176 = arith.mulf %6, %175 : vector<8x8x128xf32>
    %177 = arith.addf %171, %176 : vector<8x8x128xf32>
    %c23 = arith.constant 23 : index
    %c0_74 = arith.constant 0 : index
    %c0_75 = arith.constant 0 : index
    %178 = vector.load %arg2[%c23, %c0_74, %c0_75] : memref<27x8x128xf32, #tpu.memory_space<vmem>>, vector<1x8x128xf32>
    %179 = vector.shape_cast %178 : vector<1x8x128xf32> to vector<8x128xf32>
    %180 = vector.shape_cast %179 : vector<8x128xf32> to vector<1x8x128xf32>
    %181 = vector.broadcast %180 : vector<1x8x128xf32> to vector<8x8x128xf32>
    %182 = arith.mulf %26, %181 : vector<8x8x128xf32>
    %183 = arith.addf %177, %182 : vector<8x8x128xf32>
    %184 = arith.addf %166, %183 : vector<8x8x128xf32>
    %c8 = arith.constant 8 : index
    %c0_76 = arith.constant 0 : index
    %c0_77 = arith.constant 0 : index
    %185 = vector.load %arg2[%c8, %c0_76, %c0_77] : memref<27x8x128xf32, #tpu.memory_space<vmem>>, vector<1x8x128xf32>
    %186 = vector.shape_cast %185 : vector<1x8x128xf32> to vector<8x128xf32>
    %187 = vector.shape_cast %186 : vector<8x128xf32> to vector<1x8x128xf32>
    %188 = vector.broadcast %187 : vector<1x8x128xf32> to vector<8x8x128xf32>
    %189 = arith.mulf %16, %188 : vector<8x8x128xf32>
    %c17 = arith.constant 17 : index
    %c0_78 = arith.constant 0 : index
    %c0_79 = arith.constant 0 : index
    %190 = vector.load %arg2[%c17, %c0_78, %c0_79] : memref<27x8x128xf32, #tpu.memory_space<vmem>>, vector<1x8x128xf32>
    %191 = vector.shape_cast %190 : vector<1x8x128xf32> to vector<8x128xf32>
    %192 = vector.shape_cast %191 : vector<8x128xf32> to vector<1x8x128xf32>
    %193 = vector.broadcast %192 : vector<1x8x128xf32> to vector<8x8x128xf32>
    %194 = arith.mulf %6, %193 : vector<8x8x128xf32>
    %195 = arith.addf %189, %194 : vector<8x8x128xf32>
    %c26 = arith.constant 26 : index
    %c0_80 = arith.constant 0 : index
    %c0_81 = arith.constant 0 : index
    %196 = vector.load %arg2[%c26, %c0_80, %c0_81] : memref<27x8x128xf32, #tpu.memory_space<vmem>>, vector<1x8x128xf32>
    %197 = vector.shape_cast %196 : vector<1x8x128xf32> to vector<8x128xf32>
    %198 = vector.shape_cast %197 : vector<8x128xf32> to vector<1x8x128xf32>
    %199 = vector.broadcast %198 : vector<1x8x128xf32> to vector<8x8x128xf32>
    %200 = arith.mulf %26, %199 : vector<8x8x128xf32>
    %201 = arith.addf %195, %200 : vector<8x8x128xf32>
    %202 = vector.extract_strided_slice %201 {offsets = [1, 0, 0], sizes = [7, 8, 128], strides = [1, 1, 1]} : vector<8x8x128xf32> to vector<7x8x128xf32>
    %203 = tpu.concatenate %202, %3 in 0 : vector<7x8x128xf32>, vector<1x8x128xf32> -> vector<8x8x128xf32>
    %204 = arith.addf %184, %203 : vector<8x8x128xf32>
    %c0_82 = arith.constant 0 : index
    %c1_83 = arith.constant 1 : index
    %c0_84 = arith.constant 0 : index
    %205 = vector.load %arg5[%c0_82, %c1_83, %c0_84] : memref<8x10x128xf32, #tpu.memory_space<vmem>>, vector<8x8x128xf32>
    tpu.vector_store %arg5[%c0_82, %c1_83, %c0_84], %204 {strides = array<i32>} : memref<8x10x128xf32, #tpu.memory_space<vmem>>, vector<8x8x128xf32>,
    %c0_85 = arith.constant 0 : index
    %c2_86 = arith.constant 2 : index
    %c0_87 = arith.constant 0 : index
    %206 = vector.load %arg5[%c0_85, %c2_86, %c0_87] : memref<8x10x128xf32, #tpu.memory_space<vmem>>, vector<8x8x128xf32>
    %207 = arith.addf %147, %206 : vector<8x8x128xf32>
    %c0_88 = arith.constant 0 : index
    %208 = arith.index_cast %c0_i32 : i32 to index
    %c0_89 = arith.constant 0 : index
    %c0_90 = arith.constant 0 : index
    %c0_91 = arith.constant 0 : index
    %209 = vector.load %arg4[%c0_88, %208, %c0_89, %c0_90, %c0_91] : memref<1x4x8x8x128xf32, #tpu.memory_space<vmem>>, vector<1x1x8x8x128xf32>
    %210 = vector.shape_cast %209 : vector<1x1x8x8x128xf32> to vector<8x8x128xf32>
    %211 = vector.shape_cast %207 : vector<8x8x128xf32> to vector<1x1x8x8x128xf32>
    tpu.vector_store %arg4[%c0_88, %208, %c0_89, %c0_90, %c0_91], %211 {strides = array<i32>} : memref<1x4x8x8x128xf32, #tpu.memory_space<vmem>>, vector<1x1x8x8x128xf32>,
    %c1_i32_92 = arith.constant 1 : i32
    %c0_93 = arith.constant 0 : index
    %212 = arith.index_cast %c1_i32_92 : i32 to index
    %c0_94 = arith.constant 0 : index
    %c0_95 = arith.constant 0 : index
    %c0_96 = arith.constant 0 : index
    %213 = vector.load %arg1[%c0_93, %212, %c0_94, %c0_95, %c0_96] : memref<1x4x8x8x128xf32, #tpu.memory_space<vmem>>, vector<1x1x8x8x128xf32>
    %214 = vector.shape_cast %213 : vector<1x1x8x8x128xf32> to vector<8x8x128xf32>
    %c1_i32_97 = arith.constant 1 : i32
    %215 = arith.subi %c1_i32_92, %c1_i32_97 : i32
    %c0_i32_98 = arith.constant 0 : i32
    %216 = arith.maxsi %215, %c0_i32_98 : i32
    %c0_99 = arith.constant 0 : index
    %217 = arith.index_cast %216 : i32 to index
    %c0_100 = arith.constant 0 : index
    %c0_101 = arith.constant 0 : index
    %c0_102 = arith.constant 0 : index
    %218 = vector.load %arg1[%c0_99, %217, %c0_100, %c0_101, %c0_102] : memref<1x4x8x8x128xf32, #tpu.memory_space<vmem>>, vector<1x1x8x8x128xf32>
    %219 = vector.shape_cast %218 : vector<1x1x8x8x128xf32> to vector<8x8x128xf32>
    %c0_i32_103 = arith.constant 0 : i32
    %220 = arith.cmpi sgt, %c1_i32_92, %c0_i32_103 : i32
    %221 = arith.extui %220 : i1 to i32
    %222 = arith.sitofp %221 : i32 to f32
    %223 = vector.broadcast %222 : f32 to vector<8x8x128xf32>
    %224 = arith.mulf %219, %223 : vector<8x8x128xf32>
    %c1_i32_104 = arith.constant 1 : i32
    %225 = arith.addi %c1_i32_92, %c1_i32_104 : i32
    %c3_i32_105 = arith.constant 3 : i32
    %226 = arith.minsi %225, %c3_i32_105 : i32
    %c0_106 = arith.constant 0 : index
    %227 = arith.index_cast %226 : i32 to index
    %c0_107 = arith.constant 0 : index
    %c0_108 = arith.constant 0 : index
    %c0_109 = arith.constant 0 : index
    %228 = vector.load %arg1[%c0_106, %227, %c0_107, %c0_108, %c0_109] : memref<1x4x8x8x128xf32, #tpu.memory_space<vmem>>, vector<1x1x8x8x128xf32>
    %229 = vector.shape_cast %228 : vector<1x1x8x8x128xf32> to vector<8x8x128xf32>
    %c3_i32_110 = arith.constant 3 : i32
    %230 = arith.cmpi slt, %c1_i32_92, %c3_i32_110 : i32
    %231 = arith.extui %230 : i1 to i32
    %232 = arith.sitofp %231 : i32 to f32
    %233 = vector.broadcast %232 : f32 to vector<8x8x128xf32>
    %234 = arith.mulf %229, %233 : vector<8x8x128xf32>
    %235 = vector.shape_cast %2 : vector<8x128xf32> to vector<1x8x128xf32>
    %236 = vector.broadcast %235 : vector<1x8x128xf32> to vector<8x8x128xf32>
    %237 = arith.addf %214, %236 : vector<8x8x128xf32>
    %c0_111 = arith.constant 0 : index
    %c0_112 = arith.constant 0 : index
    %c0_113 = arith.constant 0 : index
    %238 = vector.load %arg2[%c0_111, %c0_112, %c0_113] : memref<27x8x128xf32, #tpu.memory_space<vmem>>, vector<1x8x128xf32>
    %239 = vector.shape_cast %238 : vector<1x8x128xf32> to vector<8x128xf32>
    %240 = vector.shape_cast %239 : vector<8x128xf32> to vector<1x8x128xf32>
    %241 = vector.broadcast %240 : vector<1x8x128xf32> to vector<8x8x128xf32>
    %242 = arith.mulf %224, %241 : vector<8x8x128xf32>
    %c9_114 = arith.constant 9 : index
    %c0_115 = arith.constant 0 : index
    %c0_116 = arith.constant 0 : index
    %243 = vector.load %arg2[%c9_114, %c0_115, %c0_116] : memref<27x8x128xf32, #tpu.memory_space<vmem>>, vector<1x8x128xf32>
    %244 = vector.shape_cast %243 : vector<1x8x128xf32> to vector<8x128xf32>
    %245 = vector.shape_cast %244 : vector<8x128xf32> to vector<1x8x128xf32>
    %246 = vector.broadcast %245 : vector<1x8x128xf32> to vector<8x8x128xf32>
    %247 = arith.mulf %214, %246 : vector<8x8x128xf32>
    %248 = arith.addf %242, %247 : vector<8x8x128xf32>
    %c18_117 = arith.constant 18 : index
    %c0_118 = arith.constant 0 : index
    %c0_119 = arith.constant 0 : index
    %249 = vector.load %arg2[%c18_117, %c0_118, %c0_119] : memref<27x8x128xf32, #tpu.memory_space<vmem>>, vector<1x8x128xf32>
    %250 = vector.shape_cast %249 : vector<1x8x128xf32> to vector<8x128xf32>
    %251 = vector.shape_cast %250 : vector<8x128xf32> to vector<1x8x128xf32>
    %252 = vector.broadcast %251 : vector<1x8x128xf32> to vector<8x8x128xf32>
    %253 = arith.mulf %234, %252 : vector<8x8x128xf32>
    %254 = arith.addf %248, %253 : vector<8x8x128xf32>
    %255 = vector.extract_strided_slice %254 {offsets = [0, 0, 0], sizes = [7, 8, 128], strides = [1, 1, 1]} : vector<8x8x128xf32> to vector<7x8x128xf32>
    %256 = tpu.concatenate %3, %255 in 0 : vector<1x8x128xf32>, vector<7x8x128xf32> -> vector<8x8x128xf32>
    %c3_120 = arith.constant 3 : index
    %c0_121 = arith.constant 0 : index
    %c0_122 = arith.constant 0 : index
    %257 = vector.load %arg2[%c3_120, %c0_121, %c0_122] : memref<27x8x128xf32, #tpu.memory_space<vmem>>, vector<1x8x128xf32>
    %258 = vector.shape_cast %257 : vector<1x8x128xf32> to vector<8x128xf32>
    %259 = vector.shape_cast %258 : vector<8x128xf32> to vector<1x8x128xf32>
    %260 = vector.broadcast %259 : vector<1x8x128xf32> to vector<8x8x128xf32>
    %261 = arith.mulf %224, %260 : vector<8x8x128xf32>
    %c12_123 = arith.constant 12 : index
    %c0_124 = arith.constant 0 : index
    %c0_125 = arith.constant 0 : index
    %262 = vector.load %arg2[%c12_123, %c0_124, %c0_125] : memref<27x8x128xf32, #tpu.memory_space<vmem>>, vector<1x8x128xf32>
    %263 = vector.shape_cast %262 : vector<1x8x128xf32> to vector<8x128xf32>
    %264 = vector.shape_cast %263 : vector<8x128xf32> to vector<1x8x128xf32>
    %265 = vector.broadcast %264 : vector<1x8x128xf32> to vector<8x8x128xf32>
    %266 = arith.mulf %214, %265 : vector<8x8x128xf32>
    %267 = arith.addf %261, %266 : vector<8x8x128xf32>
    %c21_126 = arith.constant 21 : index
    %c0_127 = arith.constant 0 : index
    %c0_128 = arith.constant 0 : index
    %268 = vector.load %arg2[%c21_126, %c0_127, %c0_128] : memref<27x8x128xf32, #tpu.memory_space<vmem>>, vector<1x8x128xf32>
    %269 = vector.shape_cast %268 : vector<1x8x128xf32> to vector<8x128xf32>
    %270 = vector.shape_cast %269 : vector<8x128xf32> to vector<1x8x128xf32>
    %271 = vector.broadcast %270 : vector<1x8x128xf32> to vector<8x8x128xf32>
    %272 = arith.mulf %234, %271 : vector<8x8x128xf32>
    %273 = arith.addf %267, %272 : vector<8x8x128xf32>
    %274 = arith.addf %256, %273 : vector<8x8x128xf32>
    %c6_129 = arith.constant 6 : index
    %c0_130 = arith.constant 0 : index
    %c0_131 = arith.constant 0 : index
    %275 = vector.load %arg2[%c6_129, %c0_130, %c0_131] : memref<27x8x128xf32, #tpu.memory_space<vmem>>, vector<1x8x128xf32>
    %276 = vector.shape_cast %275 : vector<1x8x128xf32> to vector<8x128xf32>
    %277 = vector.shape_cast %276 : vector<8x128xf32> to vector<1x8x128xf32>
    %278 = vector.broadcast %277 : vector<1x8x128xf32> to vector<8x8x128xf32>
    %279 = arith.mulf %224, %278 : vector<8x8x128xf32>
    %c15_132 = arith.constant 15 : index
    %c0_133 = arith.constant 0 : index
    %c0_134 = arith.constant 0 : index
    %280 = vector.load %arg2[%c15_132, %c0_133, %c0_134] : memref<27x8x128xf32, #tpu.memory_space<vmem>>, vector<1x8x128xf32>
    %281 = vector.shape_cast %280 : vector<1x8x128xf32> to vector<8x128xf32>
    %282 = vector.shape_cast %281 : vector<8x128xf32> to vector<1x8x128xf32>
    %283 = vector.broadcast %282 : vector<1x8x128xf32> to vector<8x8x128xf32>
    %284 = arith.mulf %214, %283 : vector<8x8x128xf32>
    %285 = arith.addf %279, %284 : vector<8x8x128xf32>
    %c24_135 = arith.constant 24 : index
    %c0_136 = arith.constant 0 : index
    %c0_137 = arith.constant 0 : index
    %286 = vector.load %arg2[%c24_135, %c0_136, %c0_137] : memref<27x8x128xf32, #tpu.memory_space<vmem>>, vector<1x8x128xf32>
    %287 = vector.shape_cast %286 : vector<1x8x128xf32> to vector<8x128xf32>
    %288 = vector.shape_cast %287 : vector<8x128xf32> to vector<1x8x128xf32>
    %289 = vector.broadcast %288 : vector<1x8x128xf32> to vector<8x8x128xf32>
    %290 = arith.mulf %234, %289 : vector<8x8x128xf32>
    %291 = arith.addf %285, %290 : vector<8x8x128xf32>
    %292 = vector.extract_strided_slice %291 {offsets = [1, 0, 0], sizes = [7, 8, 128], strides = [1, 1, 1]} : vector<8x8x128xf32> to vector<7x8x128xf32>
    %293 = tpu.concatenate %292, %3 in 0 : vector<7x8x128xf32>, vector<1x8x128xf32> -> vector<8x8x128xf32>
    %294 = arith.addf %274, %293 : vector<8x8x128xf32>
    %c0_138 = arith.constant 0 : index
    %c1_139 = arith.constant 1 : index
    %c0_140 = arith.constant 0 : index
    %295 = vector.load %arg5[%c0_138, %c1_139, %c0_140] : memref<8x10x128xf32, #tpu.memory_space<vmem>>, vector<8x8x128xf32>
    tpu.vector_store %arg5[%c0_138, %c1_139, %c0_140], %294 {strides = array<i32>} : memref<8x10x128xf32, #tpu.memory_space<vmem>>, vector<8x8x128xf32>,
    %c0_141 = arith.constant 0 : index
    %c0_142 = arith.constant 0 : index
    %c0_143 = arith.constant 0 : index
    %296 = vector.load %arg5[%c0_141, %c0_142, %c0_143] : memref<8x10x128xf32, #tpu.memory_space<vmem>>, vector<8x8x128xf32>
    %297 = arith.addf %237, %296 : vector<8x8x128xf32>
    %c1_144 = arith.constant 1 : index
    %c0_145 = arith.constant 0 : index
    %c0_146 = arith.constant 0 : index
    %298 = vector.load %arg2[%c1_144, %c0_145, %c0_146] : memref<27x8x128xf32, #tpu.memory_space<vmem>>, vector<1x8x128xf32>
    %299 = vector.shape_cast %298 : vector<1x8x128xf32> to vector<8x128xf32>
    %300 = vector.shape_cast %299 : vector<8x128xf32> to vector<1x8x128xf32>
    %301 = vector.broadcast %300 : vector<1x8x128xf32> to vector<8x8x128xf32>
    %302 = arith.mulf %224, %301 : vector<8x8x128xf32>
    %c10_147 = arith.constant 10 : index
    %c0_148 = arith.constant 0 : index
    %c0_149 = arith.constant 0 : index
    %303 = vector.load %arg2[%c10_147, %c0_148, %c0_149] : memref<27x8x128xf32, #tpu.memory_space<vmem>>, vector<1x8x128xf32>
    %304 = vector.shape_cast %303 : vector<1x8x128xf32> to vector<8x128xf32>
    %305 = vector.shape_cast %304 : vector<8x128xf32> to vector<1x8x128xf32>
    %306 = vector.broadcast %305 : vector<1x8x128xf32> to vector<8x8x128xf32>
    %307 = arith.mulf %214, %306 : vector<8x8x128xf32>
    %308 = arith.addf %302, %307 : vector<8x8x128xf32>
    %c19_150 = arith.constant 19 : index
    %c0_151 = arith.constant 0 : index
    %c0_152 = arith.constant 0 : index
    %309 = vector.load %arg2[%c19_150, %c0_151, %c0_152] : memref<27x8x128xf32, #tpu.memory_space<vmem>>, vector<1x8x128xf32>
    %310 = vector.shape_cast %309 : vector<1x8x128xf32> to vector<8x128xf32>
    %311 = vector.shape_cast %310 : vector<8x128xf32> to vector<1x8x128xf32>
    %312 = vector.broadcast %311 : vector<1x8x128xf32> to vector<8x8x128xf32>
    %313 = arith.mulf %234, %312 : vector<8x8x128xf32>
    %314 = arith.addf %308, %313 : vector<8x8x128xf32>
    %315 = vector.extract_strided_slice %314 {offsets = [0, 0, 0], sizes = [7, 8, 128], strides = [1, 1, 1]} : vector<8x8x128xf32> to vector<7x8x128xf32>
    %316 = tpu.concatenate %3, %315 in 0 : vector<1x8x128xf32>, vector<7x8x128xf32> -> vector<8x8x128xf32>
    %c4_153 = arith.constant 4 : index
    %c0_154 = arith.constant 0 : index
    %c0_155 = arith.constant 0 : index
    %317 = vector.load %arg2[%c4_153, %c0_154, %c0_155] : memref<27x8x128xf32, #tpu.memory_space<vmem>>, vector<1x8x128xf32>
    %318 = vector.shape_cast %317 : vector<1x8x128xf32> to vector<8x128xf32>
    %319 = vector.shape_cast %318 : vector<8x128xf32> to vector<1x8x128xf32>
    %320 = vector.broadcast %319 : vector<1x8x128xf32> to vector<8x8x128xf32>
    %321 = arith.mulf %224, %320 : vector<8x8x128xf32>
    %c13_156 = arith.constant 13 : index
    %c0_157 = arith.constant 0 : index
    %c0_158 = arith.constant 0 : index
    %322 = vector.load %arg2[%c13_156, %c0_157, %c0_158] : memref<27x8x128xf32, #tpu.memory_space<vmem>>, vector<1x8x128xf32>
    %323 = vector.shape_cast %322 : vector<1x8x128xf32> to vector<8x128xf32>
    %324 = vector.shape_cast %323 : vector<8x128xf32> to vector<1x8x128xf32>
    %325 = vector.broadcast %324 : vector<1x8x128xf32> to vector<8x8x128xf32>
    %326 = arith.mulf %214, %325 : vector<8x8x128xf32>
    %327 = arith.addf %321, %326 : vector<8x8x128xf32>
    %c22_159 = arith.constant 22 : index
    %c0_160 = arith.constant 0 : index
    %c0_161 = arith.constant 0 : index
    %328 = vector.load %arg2[%c22_159, %c0_160, %c0_161] : memref<27x8x128xf32, #tpu.memory_space<vmem>>, vector<1x8x128xf32>
    %329 = vector.shape_cast %328 : vector<1x8x128xf32> to vector<8x128xf32>
    %330 = vector.shape_cast %329 : vector<8x128xf32> to vector<1x8x128xf32>
    %331 = vector.broadcast %330 : vector<1x8x128xf32> to vector<8x8x128xf32>
    %332 = arith.mulf %234, %331 : vector<8x8x128xf32>
    %333 = arith.addf %327, %332 : vector<8x8x128xf32>
    %334 = arith.addf %316, %333 : vector<8x8x128xf32>
    %c7_162 = arith.constant 7 : index
    %c0_163 = arith.constant 0 : index
    %c0_164 = arith.constant 0 : index
    %335 = vector.load %arg2[%c7_162, %c0_163, %c0_164] : memref<27x8x128xf32, #tpu.memory_space<vmem>>, vector<1x8x128xf32>
    %336 = vector.shape_cast %335 : vector<1x8x128xf32> to vector<8x128xf32>
    %337 = vector.shape_cast %336 : vector<8x128xf32> to vector<1x8x128xf32>
    %338 = vector.broadcast %337 : vector<1x8x128xf32> to vector<8x8x128xf32>
    %339 = arith.mulf %224, %338 : vector<8x8x128xf32>
    %c16_165 = arith.constant 16 : index
    %c0_166 = arith.constant 0 : index
    %c0_167 = arith.constant 0 : index
    %340 = vector.load %arg2[%c16_165, %c0_166, %c0_167] : memref<27x8x128xf32, #tpu.memory_space<vmem>>, vector<1x8x128xf32>
    %341 = vector.shape_cast %340 : vector<1x8x128xf32> to vector<8x128xf32>
    %342 = vector.shape_cast %341 : vector<8x128xf32> to vector<1x8x128xf32>
    %343 = vector.broadcast %342 : vector<1x8x128xf32> to vector<8x8x128xf32>
    %344 = arith.mulf %214, %343 : vector<8x8x128xf32>
    %345 = arith.addf %339, %344 : vector<8x8x128xf32>
    %c25_168 = arith.constant 25 : index
    %c0_169 = arith.constant 0 : index
    %c0_170 = arith.constant 0 : index
    %346 = vector.load %arg2[%c25_168, %c0_169, %c0_170] : memref<27x8x128xf32, #tpu.memory_space<vmem>>, vector<1x8x128xf32>
    %347 = vector.shape_cast %346 : vector<1x8x128xf32> to vector<8x128xf32>
    %348 = vector.shape_cast %347 : vector<8x128xf32> to vector<1x8x128xf32>
    %349 = vector.broadcast %348 : vector<1x8x128xf32> to vector<8x8x128xf32>
    %350 = arith.mulf %234, %349 : vector<8x8x128xf32>
    %351 = arith.addf %345, %350 : vector<8x8x128xf32>
    %352 = vector.extract_strided_slice %351 {offsets = [1, 0, 0], sizes = [7, 8, 128], strides = [1, 1, 1]} : vector<8x8x128xf32> to vector<7x8x128xf32>
    %353 = tpu.concatenate %352, %3 in 0 : vector<7x8x128xf32>, vector<1x8x128xf32> -> vector<8x8x128xf32>
    %354 = arith.addf %334, %353 : vector<8x8x128xf32>
    %355 = arith.addf %297, %354 : vector<8x8x128xf32>
    %c2_171 = arith.constant 2 : index
    %c0_172 = arith.constant 0 : index
    %c0_173 = arith.constant 0 : index
    %356 = vector.load %arg2[%c2_171, %c0_172, %c0_173] : memref<27x8x128xf32, #tpu.memory_space<vmem>>, vector<1x8x128xf32>
    %357 = vector.shape_cast %356 : vector<1x8x128xf32> to vector<8x128xf32>
    %358 = vector.shape_cast %357 : vector<8x128xf32> to vector<1x8x128xf32>
    %359 = vector.broadcast %358 : vector<1x8x128xf32> to vector<8x8x128xf32>
    %360 = arith.mulf %224, %359 : vector<8x8x128xf32>
    %c11_174 = arith.constant 11 : index
    %c0_175 = arith.constant 0 : index
    %c0_176 = arith.constant 0 : index
    %361 = vector.load %arg2[%c11_174, %c0_175, %c0_176] : memref<27x8x128xf32, #tpu.memory_space<vmem>>, vector<1x8x128xf32>
    %362 = vector.shape_cast %361 : vector<1x8x128xf32> to vector<8x128xf32>
    %363 = vector.shape_cast %362 : vector<8x128xf32> to vector<1x8x128xf32>
    %364 = vector.broadcast %363 : vector<1x8x128xf32> to vector<8x8x128xf32>
    %365 = arith.mulf %214, %364 : vector<8x8x128xf32>
    %366 = arith.addf %360, %365 : vector<8x8x128xf32>
    %c20_177 = arith.constant 20 : index
    %c0_178 = arith.constant 0 : index
    %c0_179 = arith.constant 0 : index
    %367 = vector.load %arg2[%c20_177, %c0_178, %c0_179] : memref<27x8x128xf32, #tpu.memory_space<vmem>>, vector<1x8x128xf32>
    %368 = vector.shape_cast %367 : vector<1x8x128xf32> to vector<8x128xf32>
    %369 = vector.shape_cast %368 : vector<8x128xf32> to vector<1x8x128xf32>
    %370 = vector.broadcast %369 : vector<1x8x128xf32> to vector<8x8x128xf32>
    %371 = arith.mulf %234, %370 : vector<8x8x128xf32>
    %372 = arith.addf %366, %371 : vector<8x8x128xf32>
    %373 = vector.extract_strided_slice %372 {offsets = [0, 0, 0], sizes = [7, 8, 128], strides = [1, 1, 1]} : vector<8x8x128xf32> to vector<7x8x128xf32>
    %374 = tpu.concatenate %3, %373 in 0 : vector<1x8x128xf32>, vector<7x8x128xf32> -> vector<8x8x128xf32>
    %c5_180 = arith.constant 5 : index
    %c0_181 = arith.constant 0 : index
    %c0_182 = arith.constant 0 : index
    %375 = vector.load %arg2[%c5_180, %c0_181, %c0_182] : memref<27x8x128xf32, #tpu.memory_space<vmem>>, vector<1x8x128xf32>
    %376 = vector.shape_cast %375 : vector<1x8x128xf32> to vector<8x128xf32>
    %377 = vector.shape_cast %376 : vector<8x128xf32> to vector<1x8x128xf32>
    %378 = vector.broadcast %377 : vector<1x8x128xf32> to vector<8x8x128xf32>
    %379 = arith.mulf %224, %378 : vector<8x8x128xf32>
    %c14_183 = arith.constant 14 : index
    %c0_184 = arith.constant 0 : index
    %c0_185 = arith.constant 0 : index
    %380 = vector.load %arg2[%c14_183, %c0_184, %c0_185] : memref<27x8x128xf32, #tpu.memory_space<vmem>>, vector<1x8x128xf32>
    %381 = vector.shape_cast %380 : vector<1x8x128xf32> to vector<8x128xf32>
    %382 = vector.shape_cast %381 : vector<8x128xf32> to vector<1x8x128xf32>
    %383 = vector.broadcast %382 : vector<1x8x128xf32> to vector<8x8x128xf32>
    %384 = arith.mulf %214, %383 : vector<8x8x128xf32>
    %385 = arith.addf %379, %384 : vector<8x8x128xf32>
    %c23_186 = arith.constant 23 : index
    %c0_187 = arith.constant 0 : index
    %c0_188 = arith.constant 0 : index
    %386 = vector.load %arg2[%c23_186, %c0_187, %c0_188] : memref<27x8x128xf32, #tpu.memory_space<vmem>>, vector<1x8x128xf32>
    %387 = vector.shape_cast %386 : vector<1x8x128xf32> to vector<8x128xf32>
    %388 = vector.shape_cast %387 : vector<8x128xf32> to vector<1x8x128xf32>
    %389 = vector.broadcast %388 : vector<1x8x128xf32> to vector<8x8x128xf32>
    %390 = arith.mulf %234, %389 : vector<8x8x128xf32>
    %391 = arith.addf %385, %390 : vector<8x8x128xf32>
    %392 = arith.addf %374, %391 : vector<8x8x128xf32>
    %c8_189 = arith.constant 8 : index
    %c0_190 = arith.constant 0 : index
    %c0_191 = arith.constant 0 : index
    %393 = vector.load %arg2[%c8_189, %c0_190, %c0_191] : memref<27x8x128xf32, #tpu.memory_space<vmem>>, vector<1x8x128xf32>
    %394 = vector.shape_cast %393 : vector<1x8x128xf32> to vector<8x128xf32>
    %395 = vector.shape_cast %394 : vector<8x128xf32> to vector<1x8x128xf32>
    %396 = vector.broadcast %395 : vector<1x8x128xf32> to vector<8x8x128xf32>
    %397 = arith.mulf %224, %396 : vector<8x8x128xf32>
    %c17_192 = arith.constant 17 : index
    %c0_193 = arith.constant 0 : index
    %c0_194 = arith.constant 0 : index
    %398 = vector.load %arg2[%c17_192, %c0_193, %c0_194] : memref<27x8x128xf32, #tpu.memory_space<vmem>>, vector<1x8x128xf32>
    %399 = vector.shape_cast %398 : vector<1x8x128xf32> to vector<8x128xf32>
    %400 = vector.shape_cast %399 : vector<8x128xf32> to vector<1x8x128xf32>
    %401 = vector.broadcast %400 : vector<1x8x128xf32> to vector<8x8x128xf32>
    %402 = arith.mulf %214, %401 : vector<8x8x128xf32>
    %403 = arith.addf %397, %402 : vector<8x8x128xf32>
    %c26_195 = arith.constant 26 : index
    %c0_196 = arith.constant 0 : index
    %c0_197 = arith.constant 0 : index
    %404 = vector.load %arg2[%c26_195, %c0_196, %c0_197] : memref<27x8x128xf32, #tpu.memory_space<vmem>>, vector<1x8x128xf32>
    %405 = vector.shape_cast %404 : vector<1x8x128xf32> to vector<8x128xf32>
    %406 = vector.shape_cast %405 : vector<8x128xf32> to vector<1x8x128xf32>
    %407 = vector.broadcast %406 : vector<1x8x128xf32> to vector<8x8x128xf32>
    %408 = arith.mulf %234, %407 : vector<8x8x128xf32>
    %409 = arith.addf %403, %408 : vector<8x8x128xf32>
    %410 = vector.extract_strided_slice %409 {offsets = [1, 0, 0], sizes = [7, 8, 128], strides = [1, 1, 1]} : vector<8x8x128xf32> to vector<7x8x128xf32>
    %411 = tpu.concatenate %410, %3 in 0 : vector<7x8x128xf32>, vector<1x8x128xf32> -> vector<8x8x128xf32>
    %412 = arith.addf %392, %411 : vector<8x8x128xf32>
    %c0_198 = arith.constant 0 : index
    %c1_199 = arith.constant 1 : index
    %c0_200 = arith.constant 0 : index
    %413 = vector.load %arg5[%c0_198, %c1_199, %c0_200] : memref<8x10x128xf32, #tpu.memory_space<vmem>>, vector<8x8x128xf32>
    tpu.vector_store %arg5[%c0_198, %c1_199, %c0_200], %412 {strides = array<i32>} : memref<8x10x128xf32, #tpu.memory_space<vmem>>, vector<8x8x128xf32>,
    %c0_201 = arith.constant 0 : index
    %c2_202 = arith.constant 2 : index
    %c0_203 = arith.constant 0 : index
    %414 = vector.load %arg5[%c0_201, %c2_202, %c0_203] : memref<8x10x128xf32, #tpu.memory_space<vmem>>, vector<8x8x128xf32>
    %415 = arith.addf %355, %414 : vector<8x8x128xf32>
    %c0_204 = arith.constant 0 : index
    %416 = arith.index_cast %c1_i32_92 : i32 to index
    %c0_205 = arith.constant 0 : index
    %c0_206 = arith.constant 0 : index
    %c0_207 = arith.constant 0 : index
    %417 = vector.load %arg4[%c0_204, %416, %c0_205, %c0_206, %c0_207] : memref<1x4x8x8x128xf32, #tpu.memory_space<vmem>>, vector<1x1x8x8x128xf32>
    %418 = vector.shape_cast %417 : vector<1x1x8x8x128xf32> to vector<8x8x128xf32>
    %419 = vector.shape_cast %415 : vector<8x8x128xf32> to vector<1x1x8x8x128xf32>
    tpu.vector_store %arg4[%c0_204, %416, %c0_205, %c0_206, %c0_207], %419 {strides = array<i32>} : memref<1x4x8x8x128xf32, #tpu.memory_space<vmem>>, vector<1x1x8x8x128xf32>,
    %c2_i32 = arith.constant 2 : i32
    %c0_208 = arith.constant 0 : index
    %420 = arith.index_cast %c2_i32 : i32 to index
    %c0_209 = arith.constant 0 : index
    %c0_210 = arith.constant 0 : index
    %c0_211 = arith.constant 0 : index
    %421 = vector.load %arg1[%c0_208, %420, %c0_209, %c0_210, %c0_211] : memref<1x4x8x8x128xf32, #tpu.memory_space<vmem>>, vector<1x1x8x8x128xf32>
    %422 = vector.shape_cast %421 : vector<1x1x8x8x128xf32> to vector<8x8x128xf32>
    %c1_i32_212 = arith.constant 1 : i32
    %423 = arith.subi %c2_i32, %c1_i32_212 : i32
    %c0_i32_213 = arith.constant 0 : i32
    %424 = arith.maxsi %423, %c0_i32_213 : i32
    %c0_214 = arith.constant 0 : index
    %425 = arith.index_cast %424 : i32 to index
    %c0_215 = arith.constant 0 : index
    %c0_216 = arith.constant 0 : index
    %c0_217 = arith.constant 0 : index
    %426 = vector.load %arg1[%c0_214, %425, %c0_215, %c0_216, %c0_217] : memref<1x4x8x8x128xf32, #tpu.memory_space<vmem>>, vector<1x1x8x8x128xf32>
    %427 = vector.shape_cast %426 : vector<1x1x8x8x128xf32> to vector<8x8x128xf32>
    %c0_i32_218 = arith.constant 0 : i32
    %428 = arith.cmpi sgt, %c2_i32, %c0_i32_218 : i32
    %429 = arith.extui %428 : i1 to i32
    %430 = arith.sitofp %429 : i32 to f32
    %431 = vector.broadcast %430 : f32 to vector<8x8x128xf32>
    %432 = arith.mulf %427, %431 : vector<8x8x128xf32>
    %c1_i32_219 = arith.constant 1 : i32
    %433 = arith.addi %c2_i32, %c1_i32_219 : i32
    %c3_i32_220 = arith.constant 3 : i32
    %434 = arith.minsi %433, %c3_i32_220 : i32
    %c0_221 = arith.constant 0 : index
    %435 = arith.index_cast %434 : i32 to index
    %c0_222 = arith.constant 0 : index
    %c0_223 = arith.constant 0 : index
    %c0_224 = arith.constant 0 : index
    %436 = vector.load %arg1[%c0_221, %435, %c0_222, %c0_223, %c0_224] : memref<1x4x8x8x128xf32, #tpu.memory_space<vmem>>, vector<1x1x8x8x128xf32>
    %437 = vector.shape_cast %436 : vector<1x1x8x8x128xf32> to vector<8x8x128xf32>
    %c3_i32_225 = arith.constant 3 : i32
    %438 = arith.cmpi slt, %c2_i32, %c3_i32_225 : i32
    %439 = arith.extui %438 : i1 to i32
    %440 = arith.sitofp %439 : i32 to f32
    %441 = vector.broadcast %440 : f32 to vector<8x8x128xf32>
    %442 = arith.mulf %437, %441 : vector<8x8x128xf32>
    %443 = vector.shape_cast %2 : vector<8x128xf32> to vector<1x8x128xf32>
    %444 = vector.broadcast %443 : vector<1x8x128xf32> to vector<8x8x128xf32>
    %445 = arith.addf %422, %444 : vector<8x8x128xf32>
    %c0_226 = arith.constant 0 : index
    %c0_227 = arith.constant 0 : index
    %c0_228 = arith.constant 0 : index
    %446 = vector.load %arg2[%c0_226, %c0_227, %c0_228] : memref<27x8x128xf32, #tpu.memory_space<vmem>>, vector<1x8x128xf32>
    %447 = vector.shape_cast %446 : vector<1x8x128xf32> to vector<8x128xf32>
    %448 = vector.shape_cast %447 : vector<8x128xf32> to vector<1x8x128xf32>
    %449 = vector.broadcast %448 : vector<1x8x128xf32> to vector<8x8x128xf32>
    %450 = arith.mulf %432, %449 : vector<8x8x128xf32>
    %c9_229 = arith.constant 9 : index
    %c0_230 = arith.constant 0 : index
    %c0_231 = arith.constant 0 : index
    %451 = vector.load %arg2[%c9_229, %c0_230, %c0_231] : memref<27x8x128xf32, #tpu.memory_space<vmem>>, vector<1x8x128xf32>
    %452 = vector.shape_cast %451 : vector<1x8x128xf32> to vector<8x128xf32>
    %453 = vector.shape_cast %452 : vector<8x128xf32> to vector<1x8x128xf32>
    %454 = vector.broadcast %453 : vector<1x8x128xf32> to vector<8x8x128xf32>
    %455 = arith.mulf %422, %454 : vector<8x8x128xf32>
    %456 = arith.addf %450, %455 : vector<8x8x128xf32>
    %c18_232 = arith.constant 18 : index
    %c0_233 = arith.constant 0 : index
    %c0_234 = arith.constant 0 : index
    %457 = vector.load %arg2[%c18_232, %c0_233, %c0_234] : memref<27x8x128xf32, #tpu.memory_space<vmem>>, vector<1x8x128xf32>
    %458 = vector.shape_cast %457 : vector<1x8x128xf32> to vector<8x128xf32>
    %459 = vector.shape_cast %458 : vector<8x128xf32> to vector<1x8x128xf32>
    %460 = vector.broadcast %459 : vector<1x8x128xf32> to vector<8x8x128xf32>
    %461 = arith.mulf %442, %460 : vector<8x8x128xf32>
    %462 = arith.addf %456, %461 : vector<8x8x128xf32>
    %463 = vector.extract_strided_slice %462 {offsets = [0, 0, 0], sizes = [7, 8, 128], strides = [1, 1, 1]} : vector<8x8x128xf32> to vector<7x8x128xf32>
    %464 = tpu.concatenate %3, %463 in 0 : vector<1x8x128xf32>, vector<7x8x128xf32> -> vector<8x8x128xf32>
    %c3_235 = arith.constant 3 : index
    %c0_236 = arith.constant 0 : index
    %c0_237 = arith.constant 0 : index
    %465 = vector.load %arg2[%c3_235, %c0_236, %c0_237] : memref<27x8x128xf32, #tpu.memory_space<vmem>>, vector<1x8x128xf32>
    %466 = vector.shape_cast %465 : vector<1x8x128xf32> to vector<8x128xf32>
    %467 = vector.shape_cast %466 : vector<8x128xf32> to vector<1x8x128xf32>
    %468 = vector.broadcast %467 : vector<1x8x128xf32> to vector<8x8x128xf32>
    %469 = arith.mulf %432, %468 : vector<8x8x128xf32>
    %c12_238 = arith.constant 12 : index
    %c0_239 = arith.constant 0 : index
    %c0_240 = arith.constant 0 : index
    %470 = vector.load %arg2[%c12_238, %c0_239, %c0_240] : memref<27x8x128xf32, #tpu.memory_space<vmem>>, vector<1x8x128xf32>
    %471 = vector.shape_cast %470 : vector<1x8x128xf32> to vector<8x128xf32>
    %472 = vector.shape_cast %471 : vector<8x128xf32> to vector<1x8x128xf32>
    %473 = vector.broadcast %472 : vector<1x8x128xf32> to vector<8x8x128xf32>
    %474 = arith.mulf %422, %473 : vector<8x8x128xf32>
    %475 = arith.addf %469, %474 : vector<8x8x128xf32>
    %c21_241 = arith.constant 21 : index
    %c0_242 = arith.constant 0 : index
    %c0_243 = arith.constant 0 : index
    %476 = vector.load %arg2[%c21_241, %c0_242, %c0_243] : memref<27x8x128xf32, #tpu.memory_space<vmem>>, vector<1x8x128xf32>
    %477 = vector.shape_cast %476 : vector<1x8x128xf32> to vector<8x128xf32>
    %478 = vector.shape_cast %477 : vector<8x128xf32> to vector<1x8x128xf32>
    %479 = vector.broadcast %478 : vector<1x8x128xf32> to vector<8x8x128xf32>
    %480 = arith.mulf %442, %479 : vector<8x8x128xf32>
    %481 = arith.addf %475, %480 : vector<8x8x128xf32>
    %482 = arith.addf %464, %481 : vector<8x8x128xf32>
    %c6_244 = arith.constant 6 : index
    %c0_245 = arith.constant 0 : index
    %c0_246 = arith.constant 0 : index
    %483 = vector.load %arg2[%c6_244, %c0_245, %c0_246] : memref<27x8x128xf32, #tpu.memory_space<vmem>>, vector<1x8x128xf32>
    %484 = vector.shape_cast %483 : vector<1x8x128xf32> to vector<8x128xf32>
    %485 = vector.shape_cast %484 : vector<8x128xf32> to vector<1x8x128xf32>
    %486 = vector.broadcast %485 : vector<1x8x128xf32> to vector<8x8x128xf32>
    %487 = arith.mulf %432, %486 : vector<8x8x128xf32>
    %c15_247 = arith.constant 15 : index
    %c0_248 = arith.constant 0 : index
    %c0_249 = arith.constant 0 : index
    %488 = vector.load %arg2[%c15_247, %c0_248, %c0_249] : memref<27x8x128xf32, #tpu.memory_space<vmem>>, vector<1x8x128xf32>
    %489 = vector.shape_cast %488 : vector<1x8x128xf32> to vector<8x128xf32>
    %490 = vector.shape_cast %489 : vector<8x128xf32> to vector<1x8x128xf32>
    %491 = vector.broadcast %490 : vector<1x8x128xf32> to vector<8x8x128xf32>
    %492 = arith.mulf %422, %491 : vector<8x8x128xf32>
    %493 = arith.addf %487, %492 : vector<8x8x128xf32>
    %c24_250 = arith.constant 24 : index
    %c0_251 = arith.constant 0 : index
    %c0_252 = arith.constant 0 : index
    %494 = vector.load %arg2[%c24_250, %c0_251, %c0_252] : memref<27x8x128xf32, #tpu.memory_space<vmem>>, vector<1x8x128xf32>
    %495 = vector.shape_cast %494 : vector<1x8x128xf32> to vector<8x128xf32>
    %496 = vector.shape_cast %495 : vector<8x128xf32> to vector<1x8x128xf32>
    %497 = vector.broadcast %496 : vector<1x8x128xf32> to vector<8x8x128xf32>
    %498 = arith.mulf %442, %497 : vector<8x8x128xf32>
    %499 = arith.addf %493, %498 : vector<8x8x128xf32>
    %500 = vector.extract_strided_slice %499 {offsets = [1, 0, 0], sizes = [7, 8, 128], strides = [1, 1, 1]} : vector<8x8x128xf32> to vector<7x8x128xf32>
    %501 = tpu.concatenate %500, %3 in 0 : vector<7x8x128xf32>, vector<1x8x128xf32> -> vector<8x8x128xf32>
    %502 = arith.addf %482, %501 : vector<8x8x128xf32>
    %c0_253 = arith.constant 0 : index
    %c1_254 = arith.constant 1 : index
    %c0_255 = arith.constant 0 : index
    %503 = vector.load %arg5[%c0_253, %c1_254, %c0_255] : memref<8x10x128xf32, #tpu.memory_space<vmem>>, vector<8x8x128xf32>
    tpu.vector_store %arg5[%c0_253, %c1_254, %c0_255], %502 {strides = array<i32>} : memref<8x10x128xf32, #tpu.memory_space<vmem>>, vector<8x8x128xf32>,
    %c0_256 = arith.constant 0 : index
    %c0_257 = arith.constant 0 : index
    %c0_258 = arith.constant 0 : index
    %504 = vector.load %arg5[%c0_256, %c0_257, %c0_258] : memref<8x10x128xf32, #tpu.memory_space<vmem>>, vector<8x8x128xf32>
    %505 = arith.addf %445, %504 : vector<8x8x128xf32>
    %c1_259 = arith.constant 1 : index
    %c0_260 = arith.constant 0 : index
    %c0_261 = arith.constant 0 : index
    %506 = vector.load %arg2[%c1_259, %c0_260, %c0_261] : memref<27x8x128xf32, #tpu.memory_space<vmem>>, vector<1x8x128xf32>
    %507 = vector.shape_cast %506 : vector<1x8x128xf32> to vector<8x128xf32>
    %508 = vector.shape_cast %507 : vector<8x128xf32> to vector<1x8x128xf32>
    %509 = vector.broadcast %508 : vector<1x8x128xf32> to vector<8x8x128xf32>
    %510 = arith.mulf %432, %509 : vector<8x8x128xf32>
    %c10_262 = arith.constant 10 : index
    %c0_263 = arith.constant 0 : index
    %c0_264 = arith.constant 0 : index
    %511 = vector.load %arg2[%c10_262, %c0_263, %c0_264] : memref<27x8x128xf32, #tpu.memory_space<vmem>>, vector<1x8x128xf32>
    %512 = vector.shape_cast %511 : vector<1x8x128xf32> to vector<8x128xf32>
    %513 = vector.shape_cast %512 : vector<8x128xf32> to vector<1x8x128xf32>
    %514 = vector.broadcast %513 : vector<1x8x128xf32> to vector<8x8x128xf32>
    %515 = arith.mulf %422, %514 : vector<8x8x128xf32>
    %516 = arith.addf %510, %515 : vector<8x8x128xf32>
    %c19_265 = arith.constant 19 : index
    %c0_266 = arith.constant 0 : index
    %c0_267 = arith.constant 0 : index
    %517 = vector.load %arg2[%c19_265, %c0_266, %c0_267] : memref<27x8x128xf32, #tpu.memory_space<vmem>>, vector<1x8x128xf32>
    %518 = vector.shape_cast %517 : vector<1x8x128xf32> to vector<8x128xf32>
    %519 = vector.shape_cast %518 : vector<8x128xf32> to vector<1x8x128xf32>
    %520 = vector.broadcast %519 : vector<1x8x128xf32> to vector<8x8x128xf32>
    %521 = arith.mulf %442, %520 : vector<8x8x128xf32>
    %522 = arith.addf %516, %521 : vector<8x8x128xf32>
    %523 = vector.extract_strided_slice %522 {offsets = [0, 0, 0], sizes = [7, 8, 128], strides = [1, 1, 1]} : vector<8x8x128xf32> to vector<7x8x128xf32>
    %524 = tpu.concatenate %3, %523 in 0 : vector<1x8x128xf32>, vector<7x8x128xf32> -> vector<8x8x128xf32>
    %c4_268 = arith.constant 4 : index
    %c0_269 = arith.constant 0 : index
    %c0_270 = arith.constant 0 : index
    %525 = vector.load %arg2[%c4_268, %c0_269, %c0_270] : memref<27x8x128xf32, #tpu.memory_space<vmem>>, vector<1x8x128xf32>
    %526 = vector.shape_cast %525 : vector<1x8x128xf32> to vector<8x128xf32>
    %527 = vector.shape_cast %526 : vector<8x128xf32> to vector<1x8x128xf32>
    %528 = vector.broadcast %527 : vector<1x8x128xf32> to vector<8x8x128xf32>
    %529 = arith.mulf %432, %528 : vector<8x8x128xf32>
    %c13_271 = arith.constant 13 : index
    %c0_272 = arith.constant 0 : index
    %c0_273 = arith.constant 0 : index
    %530 = vector.load %arg2[%c13_271, %c0_272, %c0_273] : memref<27x8x128xf32, #tpu.memory_space<vmem>>, vector<1x8x128xf32>
    %531 = vector.shape_cast %530 : vector<1x8x128xf32> to vector<8x128xf32>
    %532 = vector.shape_cast %531 : vector<8x128xf32> to vector<1x8x128xf32>
    %533 = vector.broadcast %532 : vector<1x8x128xf32> to vector<8x8x128xf32>
    %534 = arith.mulf %422, %533 : vector<8x8x128xf32>
    %535 = arith.addf %529, %534 : vector<8x8x128xf32>
    %c22_274 = arith.constant 22 : index
    %c0_275 = arith.constant 0 : index
    %c0_276 = arith.constant 0 : index
    %536 = vector.load %arg2[%c22_274, %c0_275, %c0_276] : memref<27x8x128xf32, #tpu.memory_space<vmem>>, vector<1x8x128xf32>
    %537 = vector.shape_cast %536 : vector<1x8x128xf32> to vector<8x128xf32>
    %538 = vector.shape_cast %537 : vector<8x128xf32> to vector<1x8x128xf32>
    %539 = vector.broadcast %538 : vector<1x8x128xf32> to vector<8x8x128xf32>
    %540 = arith.mulf %442, %539 : vector<8x8x128xf32>
    %541 = arith.addf %535, %540 : vector<8x8x128xf32>
    %542 = arith.addf %524, %541 : vector<8x8x128xf32>
    %c7_277 = arith.constant 7 : index
    %c0_278 = arith.constant 0 : index
    %c0_279 = arith.constant 0 : index
    %543 = vector.load %arg2[%c7_277, %c0_278, %c0_279] : memref<27x8x128xf32, #tpu.memory_space<vmem>>, vector<1x8x128xf32>
    %544 = vector.shape_cast %543 : vector<1x8x128xf32> to vector<8x128xf32>
    %545 = vector.shape_cast %544 : vector<8x128xf32> to vector<1x8x128xf32>
    %546 = vector.broadcast %545 : vector<1x8x128xf32> to vector<8x8x128xf32>
    %547 = arith.mulf %432, %546 : vector<8x8x128xf32>
    %c16_280 = arith.constant 16 : index
    %c0_281 = arith.constant 0 : index
    %c0_282 = arith.constant 0 : index
    %548 = vector.load %arg2[%c16_280, %c0_281, %c0_282] : memref<27x8x128xf32, #tpu.memory_space<vmem>>, vector<1x8x128xf32>
    %549 = vector.shape_cast %548 : vector<1x8x128xf32> to vector<8x128xf32>
    %550 = vector.shape_cast %549 : vector<8x128xf32> to vector<1x8x128xf32>
    %551 = vector.broadcast %550 : vector<1x8x128xf32> to vector<8x8x128xf32>
    %552 = arith.mulf %422, %551 : vector<8x8x128xf32>
    %553 = arith.addf %547, %552 : vector<8x8x128xf32>
    %c25_283 = arith.constant 25 : index
    %c0_284 = arith.constant 0 : index
    %c0_285 = arith.constant 0 : index
    %554 = vector.load %arg2[%c25_283, %c0_284, %c0_285] : memref<27x8x128xf32, #tpu.memory_space<vmem>>, vector<1x8x128xf32>
    %555 = vector.shape_cast %554 : vector<1x8x128xf32> to vector<8x128xf32>
    %556 = vector.shape_cast %555 : vector<8x128xf32> to vector<1x8x128xf32>
    %557 = vector.broadcast %556 : vector<1x8x128xf32> to vector<8x8x128xf32>
    %558 = arith.mulf %442, %557 : vector<8x8x128xf32>
    %559 = arith.addf %553, %558 : vector<8x8x128xf32>
    %560 = vector.extract_strided_slice %559 {offsets = [1, 0, 0], sizes = [7, 8, 128], strides = [1, 1, 1]} : vector<8x8x128xf32> to vector<7x8x128xf32>
    %561 = tpu.concatenate %560, %3 in 0 : vector<7x8x128xf32>, vector<1x8x128xf32> -> vector<8x8x128xf32>
    %562 = arith.addf %542, %561 : vector<8x8x128xf32>
    %563 = arith.addf %505, %562 : vector<8x8x128xf32>
    %c2_286 = arith.constant 2 : index
    %c0_287 = arith.constant 0 : index
    %c0_288 = arith.constant 0 : index
    %564 = vector.load %arg2[%c2_286, %c0_287, %c0_288] : memref<27x8x128xf32, #tpu.memory_space<vmem>>, vector<1x8x128xf32>
    %565 = vector.shape_cast %564 : vector<1x8x128xf32> to vector<8x128xf32>
    %566 = vector.shape_cast %565 : vector<8x128xf32> to vector<1x8x128xf32>
    %567 = vector.broadcast %566 : vector<1x8x128xf32> to vector<8x8x128xf32>
    %568 = arith.mulf %432, %567 : vector<8x8x128xf32>
    %c11_289 = arith.constant 11 : index
    %c0_290 = arith.constant 0 : index
    %c0_291 = arith.constant 0 : index
    %569 = vector.load %arg2[%c11_289, %c0_290, %c0_291] : memref<27x8x128xf32, #tpu.memory_space<vmem>>, vector<1x8x128xf32>
    %570 = vector.shape_cast %569 : vector<1x8x128xf32> to vector<8x128xf32>
    %571 = vector.shape_cast %570 : vector<8x128xf32> to vector<1x8x128xf32>
    %572 = vector.broadcast %571 : vector<1x8x128xf32> to vector<8x8x128xf32>
    %573 = arith.mulf %422, %572 : vector<8x8x128xf32>
    %574 = arith.addf %568, %573 : vector<8x8x128xf32>
    %c20_292 = arith.constant 20 : index
    %c0_293 = arith.constant 0 : index
    %c0_294 = arith.constant 0 : index
    %575 = vector.load %arg2[%c20_292, %c0_293, %c0_294] : memref<27x8x128xf32, #tpu.memory_space<vmem>>, vector<1x8x128xf32>
    %576 = vector.shape_cast %575 : vector<1x8x128xf32> to vector<8x128xf32>
    %577 = vector.shape_cast %576 : vector<8x128xf32> to vector<1x8x128xf32>
    %578 = vector.broadcast %577 : vector<1x8x128xf32> to vector<8x8x128xf32>
    %579 = arith.mulf %442, %578 : vector<8x8x128xf32>
    %580 = arith.addf %574, %579 : vector<8x8x128xf32>
    %581 = vector.extract_strided_slice %580 {offsets = [0, 0, 0], sizes = [7, 8, 128], strides = [1, 1, 1]} : vector<8x8x128xf32> to vector<7x8x128xf32>
    %582 = tpu.concatenate %3, %581 in 0 : vector<1x8x128xf32>, vector<7x8x128xf32> -> vector<8x8x128xf32>
    %c5_295 = arith.constant 5 : index
    %c0_296 = arith.constant 0 : index
    %c0_297 = arith.constant 0 : index
    %583 = vector.load %arg2[%c5_295, %c0_296, %c0_297] : memref<27x8x128xf32, #tpu.memory_space<vmem>>, vector<1x8x128xf32>
    %584 = vector.shape_cast %583 : vector<1x8x128xf32> to vector<8x128xf32>
    %585 = vector.shape_cast %584 : vector<8x128xf32> to vector<1x8x128xf32>
    %586 = vector.broadcast %585 : vector<1x8x128xf32> to vector<8x8x128xf32>
    %587 = arith.mulf %432, %586 : vector<8x8x128xf32>
    %c14_298 = arith.constant 14 : index
    %c0_299 = arith.constant 0 : index
    %c0_300 = arith.constant 0 : index
    %588 = vector.load %arg2[%c14_298, %c0_299, %c0_300] : memref<27x8x128xf32, #tpu.memory_space<vmem>>, vector<1x8x128xf32>
    %589 = vector.shape_cast %588 : vector<1x8x128xf32> to vector<8x128xf32>
    %590 = vector.shape_cast %589 : vector<8x128xf32> to vector<1x8x128xf32>
    %591 = vector.broadcast %590 : vector<1x8x128xf32> to vector<8x8x128xf32>
    %592 = arith.mulf %422, %591 : vector<8x8x128xf32>
    %593 = arith.addf %587, %592 : vector<8x8x128xf32>
    %c23_301 = arith.constant 23 : index
    %c0_302 = arith.constant 0 : index
    %c0_303 = arith.constant 0 : index
    %594 = vector.load %arg2[%c23_301, %c0_302, %c0_303] : memref<27x8x128xf32, #tpu.memory_space<vmem>>, vector<1x8x128xf32>
    %595 = vector.shape_cast %594 : vector<1x8x128xf32> to vector<8x128xf32>
    %596 = vector.shape_cast %595 : vector<8x128xf32> to vector<1x8x128xf32>
    %597 = vector.broadcast %596 : vector<1x8x128xf32> to vector<8x8x128xf32>
    %598 = arith.mulf %442, %597 : vector<8x8x128xf32>
    %599 = arith.addf %593, %598 : vector<8x8x128xf32>
    %600 = arith.addf %582, %599 : vector<8x8x128xf32>
    %c8_304 = arith.constant 8 : index
    %c0_305 = arith.constant 0 : index
    %c0_306 = arith.constant 0 : index
    %601 = vector.load %arg2[%c8_304, %c0_305, %c0_306] : memref<27x8x128xf32, #tpu.memory_space<vmem>>, vector<1x8x128xf32>
    %602 = vector.shape_cast %601 : vector<1x8x128xf32> to vector<8x128xf32>
    %603 = vector.shape_cast %602 : vector<8x128xf32> to vector<1x8x128xf32>
    %604 = vector.broadcast %603 : vector<1x8x128xf32> to vector<8x8x128xf32>
    %605 = arith.mulf %432, %604 : vector<8x8x128xf32>
    %c17_307 = arith.constant 17 : index
    %c0_308 = arith.constant 0 : index
    %c0_309 = arith.constant 0 : index
    %606 = vector.load %arg2[%c17_307, %c0_308, %c0_309] : memref<27x8x128xf32, #tpu.memory_space<vmem>>, vector<1x8x128xf32>
    %607 = vector.shape_cast %606 : vector<1x8x128xf32> to vector<8x128xf32>
    %608 = vector.shape_cast %607 : vector<8x128xf32> to vector<1x8x128xf32>
    %609 = vector.broadcast %608 : vector<1x8x128xf32> to vector<8x8x128xf32>
    %610 = arith.mulf %422, %609 : vector<8x8x128xf32>
    %611 = arith.addf %605, %610 : vector<8x8x128xf32>
    %c26_310 = arith.constant 26 : index
    %c0_311 = arith.constant 0 : index
    %c0_312 = arith.constant 0 : index
    %612 = vector.load %arg2[%c26_310, %c0_311, %c0_312] : memref<27x8x128xf32, #tpu.memory_space<vmem>>, vector<1x8x128xf32>
    %613 = vector.shape_cast %612 : vector<1x8x128xf32> to vector<8x128xf32>
    %614 = vector.shape_cast %613 : vector<8x128xf32> to vector<1x8x128xf32>
    %615 = vector.broadcast %614 : vector<1x8x128xf32> to vector<8x8x128xf32>
    %616 = arith.mulf %442, %615 : vector<8x8x128xf32>
    %617 = arith.addf %611, %616 : vector<8x8x128xf32>
    %618 = vector.extract_strided_slice %617 {offsets = [1, 0, 0], sizes = [7, 8, 128], strides = [1, 1, 1]} : vector<8x8x128xf32> to vector<7x8x128xf32>
    %619 = tpu.concatenate %618, %3 in 0 : vector<7x8x128xf32>, vector<1x8x128xf32> -> vector<8x8x128xf32>
    %620 = arith.addf %600, %619 : vector<8x8x128xf32>
    %c0_313 = arith.constant 0 : index
    %c1_314 = arith.constant 1 : index
    %c0_315 = arith.constant 0 : index
    %621 = vector.load %arg5[%c0_313, %c1_314, %c0_315] : memref<8x10x128xf32, #tpu.memory_space<vmem>>, vector<8x8x128xf32>
    tpu.vector_store %arg5[%c0_313, %c1_314, %c0_315], %620 {strides = array<i32>} : memref<8x10x128xf32, #tpu.memory_space<vmem>>, vector<8x8x128xf32>,
    %c0_316 = arith.constant 0 : index
    %c2_317 = arith.constant 2 : index
    %c0_318 = arith.constant 0 : index
    %622 = vector.load %arg5[%c0_316, %c2_317, %c0_318] : memref<8x10x128xf32, #tpu.memory_space<vmem>>, vector<8x8x128xf32>
    %623 = arith.addf %563, %622 : vector<8x8x128xf32>
    %c0_319 = arith.constant 0 : index
    %624 = arith.index_cast %c2_i32 : i32 to index
    %c0_320 = arith.constant 0 : index
    %c0_321 = arith.constant 0 : index
    %c0_322 = arith.constant 0 : index
    %625 = vector.load %arg4[%c0_319, %624, %c0_320, %c0_321, %c0_322] : memref<1x4x8x8x128xf32, #tpu.memory_space<vmem>>, vector<1x1x8x8x128xf32>
    %626 = vector.shape_cast %625 : vector<1x1x8x8x128xf32> to vector<8x8x128xf32>
    %627 = vector.shape_cast %623 : vector<8x8x128xf32> to vector<1x1x8x8x128xf32>
    tpu.vector_store %arg4[%c0_319, %624, %c0_320, %c0_321, %c0_322], %627 {strides = array<i32>} : memref<1x4x8x8x128xf32, #tpu.memory_space<vmem>>, vector<1x1x8x8x128xf32>,
    %c3_i32_323 = arith.constant 3 : i32
    %c0_324 = arith.constant 0 : index
    %628 = arith.index_cast %c3_i32_323 : i32 to index
    %c0_325 = arith.constant 0 : index
    %c0_326 = arith.constant 0 : index
    %c0_327 = arith.constant 0 : index
    %629 = vector.load %arg1[%c0_324, %628, %c0_325, %c0_326, %c0_327] : memref<1x4x8x8x128xf32, #tpu.memory_space<vmem>>, vector<1x1x8x8x128xf32>
    %630 = vector.shape_cast %629 : vector<1x1x8x8x128xf32> to vector<8x8x128xf32>
    %c1_i32_328 = arith.constant 1 : i32
    %631 = arith.subi %c3_i32_323, %c1_i32_328 : i32
    %c0_i32_329 = arith.constant 0 : i32
    %632 = arith.maxsi %631, %c0_i32_329 : i32
    %c0_330 = arith.constant 0 : index
    %633 = arith.index_cast %632 : i32 to index
    %c0_331 = arith.constant 0 : index
    %c0_332 = arith.constant 0 : index
    %c0_333 = arith.constant 0 : index
    %634 = vector.load %arg1[%c0_330, %633, %c0_331, %c0_332, %c0_333] : memref<1x4x8x8x128xf32, #tpu.memory_space<vmem>>, vector<1x1x8x8x128xf32>
    %635 = vector.shape_cast %634 : vector<1x1x8x8x128xf32> to vector<8x8x128xf32>
    %c0_i32_334 = arith.constant 0 : i32
    %636 = arith.cmpi sgt, %c3_i32_323, %c0_i32_334 : i32
    %637 = arith.extui %636 : i1 to i32
    %638 = arith.sitofp %637 : i32 to f32
    %639 = vector.broadcast %638 : f32 to vector<8x8x128xf32>
    %640 = arith.mulf %635, %639 : vector<8x8x128xf32>
    %c1_i32_335 = arith.constant 1 : i32
    %641 = arith.addi %c3_i32_323, %c1_i32_335 : i32
    %c3_i32_336 = arith.constant 3 : i32
    %642 = arith.minsi %641, %c3_i32_336 : i32
    %c0_337 = arith.constant 0 : index
    %643 = arith.index_cast %642 : i32 to index
    %c0_338 = arith.constant 0 : index
    %c0_339 = arith.constant 0 : index
    %c0_340 = arith.constant 0 : index
    %644 = vector.load %arg1[%c0_337, %643, %c0_338, %c0_339, %c0_340] : memref<1x4x8x8x128xf32, #tpu.memory_space<vmem>>, vector<1x1x8x8x128xf32>
    %645 = vector.shape_cast %644 : vector<1x1x8x8x128xf32> to vector<8x8x128xf32>
    %c3_i32_341 = arith.constant 3 : i32
    %646 = arith.cmpi slt, %c3_i32_323, %c3_i32_341 : i32
    %647 = arith.extui %646 : i1 to i32
    %648 = arith.sitofp %647 : i32 to f32
    %649 = vector.broadcast %648 : f32 to vector<8x8x128xf32>
    %650 = arith.mulf %645, %649 : vector<8x8x128xf32>
    %651 = vector.shape_cast %2 : vector<8x128xf32> to vector<1x8x128xf32>
    %652 = vector.broadcast %651 : vector<1x8x128xf32> to vector<8x8x128xf32>
    %653 = arith.addf %630, %652 : vector<8x8x128xf32>
    %c0_342 = arith.constant 0 : index
    %c0_343 = arith.constant 0 : index
    %c0_344 = arith.constant 0 : index
    %654 = vector.load %arg2[%c0_342, %c0_343, %c0_344] : memref<27x8x128xf32, #tpu.memory_space<vmem>>, vector<1x8x128xf32>
    %655 = vector.shape_cast %654 : vector<1x8x128xf32> to vector<8x128xf32>
    %656 = vector.shape_cast %655 : vector<8x128xf32> to vector<1x8x128xf32>
    %657 = vector.broadcast %656 : vector<1x8x128xf32> to vector<8x8x128xf32>
    %658 = arith.mulf %640, %657 : vector<8x8x128xf32>
    %c9_345 = arith.constant 9 : index
    %c0_346 = arith.constant 0 : index
    %c0_347 = arith.constant 0 : index
    %659 = vector.load %arg2[%c9_345, %c0_346, %c0_347] : memref<27x8x128xf32, #tpu.memory_space<vmem>>, vector<1x8x128xf32>
    %660 = vector.shape_cast %659 : vector<1x8x128xf32> to vector<8x128xf32>
    %661 = vector.shape_cast %660 : vector<8x128xf32> to vector<1x8x128xf32>
    %662 = vector.broadcast %661 : vector<1x8x128xf32> to vector<8x8x128xf32>
    %663 = arith.mulf %630, %662 : vector<8x8x128xf32>
    %664 = arith.addf %658, %663 : vector<8x8x128xf32>
    %c18_348 = arith.constant 18 : index
    %c0_349 = arith.constant 0 : index
    %c0_350 = arith.constant 0 : index
    %665 = vector.load %arg2[%c18_348, %c0_349, %c0_350] : memref<27x8x128xf32, #tpu.memory_space<vmem>>, vector<1x8x128xf32>
    %666 = vector.shape_cast %665 : vector<1x8x128xf32> to vector<8x128xf32>
    %667 = vector.shape_cast %666 : vector<8x128xf32> to vector<1x8x128xf32>
    %668 = vector.broadcast %667 : vector<1x8x128xf32> to vector<8x8x128xf32>
    %669 = arith.mulf %650, %668 : vector<8x8x128xf32>
    %670 = arith.addf %664, %669 : vector<8x8x128xf32>
    %671 = vector.extract_strided_slice %670 {offsets = [0, 0, 0], sizes = [7, 8, 128], strides = [1, 1, 1]} : vector<8x8x128xf32> to vector<7x8x128xf32>
    %672 = tpu.concatenate %3, %671 in 0 : vector<1x8x128xf32>, vector<7x8x128xf32> -> vector<8x8x128xf32>
    %c3_351 = arith.constant 3 : index
    %c0_352 = arith.constant 0 : index
    %c0_353 = arith.constant 0 : index
    %673 = vector.load %arg2[%c3_351, %c0_352, %c0_353] : memref<27x8x128xf32, #tpu.memory_space<vmem>>, vector<1x8x128xf32>
    %674 = vector.shape_cast %673 : vector<1x8x128xf32> to vector<8x128xf32>
    %675 = vector.shape_cast %674 : vector<8x128xf32> to vector<1x8x128xf32>
    %676 = vector.broadcast %675 : vector<1x8x128xf32> to vector<8x8x128xf32>
    %677 = arith.mulf %640, %676 : vector<8x8x128xf32>
    %c12_354 = arith.constant 12 : index
    %c0_355 = arith.constant 0 : index
    %c0_356 = arith.constant 0 : index
    %678 = vector.load %arg2[%c12_354, %c0_355, %c0_356] : memref<27x8x128xf32, #tpu.memory_space<vmem>>, vector<1x8x128xf32>
    %679 = vector.shape_cast %678 : vector<1x8x128xf32> to vector<8x128xf32>
    %680 = vector.shape_cast %679 : vector<8x128xf32> to vector<1x8x128xf32>
    %681 = vector.broadcast %680 : vector<1x8x128xf32> to vector<8x8x128xf32>
    %682 = arith.mulf %630, %681 : vector<8x8x128xf32>
    %683 = arith.addf %677, %682 : vector<8x8x128xf32>
    %c21_357 = arith.constant 21 : index
    %c0_358 = arith.constant 0 : index
    %c0_359 = arith.constant 0 : index
    %684 = vector.load %arg2[%c21_357, %c0_358, %c0_359] : memref<27x8x128xf32, #tpu.memory_space<vmem>>, vector<1x8x128xf32>
    %685 = vector.shape_cast %684 : vector<1x8x128xf32> to vector<8x128xf32>
    %686 = vector.shape_cast %685 : vector<8x128xf32> to vector<1x8x128xf32>
    %687 = vector.broadcast %686 : vector<1x8x128xf32> to vector<8x8x128xf32>
    %688 = arith.mulf %650, %687 : vector<8x8x128xf32>
    %689 = arith.addf %683, %688 : vector<8x8x128xf32>
    %690 = arith.addf %672, %689 : vector<8x8x128xf32>
    %c6_360 = arith.constant 6 : index
    %c0_361 = arith.constant 0 : index
    %c0_362 = arith.constant 0 : index
    %691 = vector.load %arg2[%c6_360, %c0_361, %c0_362] : memref<27x8x128xf32, #tpu.memory_space<vmem>>, vector<1x8x128xf32>
    %692 = vector.shape_cast %691 : vector<1x8x128xf32> to vector<8x128xf32>
    %693 = vector.shape_cast %692 : vector<8x128xf32> to vector<1x8x128xf32>
    %694 = vector.broadcast %693 : vector<1x8x128xf32> to vector<8x8x128xf32>
    %695 = arith.mulf %640, %694 : vector<8x8x128xf32>
    %c15_363 = arith.constant 15 : index
    %c0_364 = arith.constant 0 : index
    %c0_365 = arith.constant 0 : index
    %696 = vector.load %arg2[%c15_363, %c0_364, %c0_365] : memref<27x8x128xf32, #tpu.memory_space<vmem>>, vector<1x8x128xf32>
    %697 = vector.shape_cast %696 : vector<1x8x128xf32> to vector<8x128xf32>
    %698 = vector.shape_cast %697 : vector<8x128xf32> to vector<1x8x128xf32>
    %699 = vector.broadcast %698 : vector<1x8x128xf32> to vector<8x8x128xf32>
    %700 = arith.mulf %630, %699 : vector<8x8x128xf32>
    %701 = arith.addf %695, %700 : vector<8x8x128xf32>
    %c24_366 = arith.constant 24 : index
    %c0_367 = arith.constant 0 : index
    %c0_368 = arith.constant 0 : index
    %702 = vector.load %arg2[%c24_366, %c0_367, %c0_368] : memref<27x8x128xf32, #tpu.memory_space<vmem>>, vector<1x8x128xf32>
    %703 = vector.shape_cast %702 : vector<1x8x128xf32> to vector<8x128xf32>
    %704 = vector.shape_cast %703 : vector<8x128xf32> to vector<1x8x128xf32>
    %705 = vector.broadcast %704 : vector<1x8x128xf32> to vector<8x8x128xf32>
    %706 = arith.mulf %650, %705 : vector<8x8x128xf32>
    %707 = arith.addf %701, %706 : vector<8x8x128xf32>
    %708 = vector.extract_strided_slice %707 {offsets = [1, 0, 0], sizes = [7, 8, 128], strides = [1, 1, 1]} : vector<8x8x128xf32> to vector<7x8x128xf32>
    %709 = tpu.concatenate %708, %3 in 0 : vector<7x8x128xf32>, vector<1x8x128xf32> -> vector<8x8x128xf32>
    %710 = arith.addf %690, %709 : vector<8x8x128xf32>
    %c0_369 = arith.constant 0 : index
    %c1_370 = arith.constant 1 : index
    %c0_371 = arith.constant 0 : index
    %711 = vector.load %arg5[%c0_369, %c1_370, %c0_371] : memref<8x10x128xf32, #tpu.memory_space<vmem>>, vector<8x8x128xf32>
    tpu.vector_store %arg5[%c0_369, %c1_370, %c0_371], %710 {strides = array<i32>} : memref<8x10x128xf32, #tpu.memory_space<vmem>>, vector<8x8x128xf32>,
    %c0_372 = arith.constant 0 : index
    %c0_373 = arith.constant 0 : index
    %c0_374 = arith.constant 0 : index
    %712 = vector.load %arg5[%c0_372, %c0_373, %c0_374] : memref<8x10x128xf32, #tpu.memory_space<vmem>>, vector<8x8x128xf32>
    %713 = arith.addf %653, %712 : vector<8x8x128xf32>
    %c1_375 = arith.constant 1 : index
    %c0_376 = arith.constant 0 : index
    %c0_377 = arith.constant 0 : index
    %714 = vector.load %arg2[%c1_375, %c0_376, %c0_377] : memref<27x8x128xf32, #tpu.memory_space<vmem>>, vector<1x8x128xf32>
    %715 = vector.shape_cast %714 : vector<1x8x128xf32> to vector<8x128xf32>
    %716 = vector.shape_cast %715 : vector<8x128xf32> to vector<1x8x128xf32>
    %717 = vector.broadcast %716 : vector<1x8x128xf32> to vector<8x8x128xf32>
    %718 = arith.mulf %640, %717 : vector<8x8x128xf32>
    %c10_378 = arith.constant 10 : index
    %c0_379 = arith.constant 0 : index
    %c0_380 = arith.constant 0 : index
    %719 = vector.load %arg2[%c10_378, %c0_379, %c0_380] : memref<27x8x128xf32, #tpu.memory_space<vmem>>, vector<1x8x128xf32>
    %720 = vector.shape_cast %719 : vector<1x8x128xf32> to vector<8x128xf32>
    %721 = vector.shape_cast %720 : vector<8x128xf32> to vector<1x8x128xf32>
    %722 = vector.broadcast %721 : vector<1x8x128xf32> to vector<8x8x128xf32>
    %723 = arith.mulf %630, %722 : vector<8x8x128xf32>
    %724 = arith.addf %718, %723 : vector<8x8x128xf32>
    %c19_381 = arith.constant 19 : index
    %c0_382 = arith.constant 0 : index
    %c0_383 = arith.constant 0 : index
    %725 = vector.load %arg2[%c19_381, %c0_382, %c0_383] : memref<27x8x128xf32, #tpu.memory_space<vmem>>, vector<1x8x128xf32>
    %726 = vector.shape_cast %725 : vector<1x8x128xf32> to vector<8x128xf32>
    %727 = vector.shape_cast %726 : vector<8x128xf32> to vector<1x8x128xf32>
    %728 = vector.broadcast %727 : vector<1x8x128xf32> to vector<8x8x128xf32>
    %729 = arith.mulf %650, %728 : vector<8x8x128xf32>
    %730 = arith.addf %724, %729 : vector<8x8x128xf32>
    %731 = vector.extract_strided_slice %730 {offsets = [0, 0, 0], sizes = [7, 8, 128], strides = [1, 1, 1]} : vector<8x8x128xf32> to vector<7x8x128xf32>
    %732 = tpu.concatenate %3, %731 in 0 : vector<1x8x128xf32>, vector<7x8x128xf32> -> vector<8x8x128xf32>
    %c4_384 = arith.constant 4 : index
    %c0_385 = arith.constant 0 : index
    %c0_386 = arith.constant 0 : index
    %733 = vector.load %arg2[%c4_384, %c0_385, %c0_386] : memref<27x8x128xf32, #tpu.memory_space<vmem>>, vector<1x8x128xf32>
    %734 = vector.shape_cast %733 : vector<1x8x128xf32> to vector<8x128xf32>
    %735 = vector.shape_cast %734 : vector<8x128xf32> to vector<1x8x128xf32>
    %736 = vector.broadcast %735 : vector<1x8x128xf32> to vector<8x8x128xf32>
    %737 = arith.mulf %640, %736 : vector<8x8x128xf32>
    %c13_387 = arith.constant 13 : index
    %c0_388 = arith.constant 0 : index
    %c0_389 = arith.constant 0 : index
    %738 = vector.load %arg2[%c13_387, %c0_388, %c0_389] : memref<27x8x128xf32, #tpu.memory_space<vmem>>, vector<1x8x128xf32>
    %739 = vector.shape_cast %738 : vector<1x8x128xf32> to vector<8x128xf32>
    %740 = vector.shape_cast %739 : vector<8x128xf32> to vector<1x8x128xf32>
    %741 = vector.broadcast %740 : vector<1x8x128xf32> to vector<8x8x128xf32>
    %742 = arith.mulf %630, %741 : vector<8x8x128xf32>
    %743 = arith.addf %737, %742 : vector<8x8x128xf32>
    %c22_390 = arith.constant 22 : index
    %c0_391 = arith.constant 0 : index
    %c0_392 = arith.constant 0 : index
    %744 = vector.load %arg2[%c22_390, %c0_391, %c0_392] : memref<27x8x128xf32, #tpu.memory_space<vmem>>, vector<1x8x128xf32>
    %745 = vector.shape_cast %744 : vector<1x8x128xf32> to vector<8x128xf32>
    %746 = vector.shape_cast %745 : vector<8x128xf32> to vector<1x8x128xf32>
    %747 = vector.broadcast %746 : vector<1x8x128xf32> to vector<8x8x128xf32>
    %748 = arith.mulf %650, %747 : vector<8x8x128xf32>
    %749 = arith.addf %743, %748 : vector<8x8x128xf32>
    %750 = arith.addf %732, %749 : vector<8x8x128xf32>
    %c7_393 = arith.constant 7 : index
    %c0_394 = arith.constant 0 : index
    %c0_395 = arith.constant 0 : index
    %751 = vector.load %arg2[%c7_393, %c0_394, %c0_395] : memref<27x8x128xf32, #tpu.memory_space<vmem>>, vector<1x8x128xf32>
    %752 = vector.shape_cast %751 : vector<1x8x128xf32> to vector<8x128xf32>
    %753 = vector.shape_cast %752 : vector<8x128xf32> to vector<1x8x128xf32>
    %754 = vector.broadcast %753 : vector<1x8x128xf32> to vector<8x8x128xf32>
    %755 = arith.mulf %640, %754 : vector<8x8x128xf32>
    %c16_396 = arith.constant 16 : index
    %c0_397 = arith.constant 0 : index
    %c0_398 = arith.constant 0 : index
    %756 = vector.load %arg2[%c16_396, %c0_397, %c0_398] : memref<27x8x128xf32, #tpu.memory_space<vmem>>, vector<1x8x128xf32>
    %757 = vector.shape_cast %756 : vector<1x8x128xf32> to vector<8x128xf32>
    %758 = vector.shape_cast %757 : vector<8x128xf32> to vector<1x8x128xf32>
    %759 = vector.broadcast %758 : vector<1x8x128xf32> to vector<8x8x128xf32>
    %760 = arith.mulf %630, %759 : vector<8x8x128xf32>
    %761 = arith.addf %755, %760 : vector<8x8x128xf32>
    %c25_399 = arith.constant 25 : index
    %c0_400 = arith.constant 0 : index
    %c0_401 = arith.constant 0 : index
    %762 = vector.load %arg2[%c25_399, %c0_400, %c0_401] : memref<27x8x128xf32, #tpu.memory_space<vmem>>, vector<1x8x128xf32>
    %763 = vector.shape_cast %762 : vector<1x8x128xf32> to vector<8x128xf32>
    %764 = vector.shape_cast %763 : vector<8x128xf32> to vector<1x8x128xf32>
    %765 = vector.broadcast %764 : vector<1x8x128xf32> to vector<8x8x128xf32>
    %766 = arith.mulf %650, %765 : vector<8x8x128xf32>
    %767 = arith.addf %761, %766 : vector<8x8x128xf32>
    %768 = vector.extract_strided_slice %767 {offsets = [1, 0, 0], sizes = [7, 8, 128], strides = [1, 1, 1]} : vector<8x8x128xf32> to vector<7x8x128xf32>
    %769 = tpu.concatenate %768, %3 in 0 : vector<7x8x128xf32>, vector<1x8x128xf32> -> vector<8x8x128xf32>
    %770 = arith.addf %750, %769 : vector<8x8x128xf32>
    %771 = arith.addf %713, %770 : vector<8x8x128xf32>
    %c2_402 = arith.constant 2 : index
    %c0_403 = arith.constant 0 : index
    %c0_404 = arith.constant 0 : index
    %772 = vector.load %arg2[%c2_402, %c0_403, %c0_404] : memref<27x8x128xf32, #tpu.memory_space<vmem>>, vector<1x8x128xf32>
    %773 = vector.shape_cast %772 : vector<1x8x128xf32> to vector<8x128xf32>
    %774 = vector.shape_cast %773 : vector<8x128xf32> to vector<1x8x128xf32>
    %775 = vector.broadcast %774 : vector<1x8x128xf32> to vector<8x8x128xf32>
    %776 = arith.mulf %640, %775 : vector<8x8x128xf32>
    %c11_405 = arith.constant 11 : index
    %c0_406 = arith.constant 0 : index
    %c0_407 = arith.constant 0 : index
    %777 = vector.load %arg2[%c11_405, %c0_406, %c0_407] : memref<27x8x128xf32, #tpu.memory_space<vmem>>, vector<1x8x128xf32>
    %778 = vector.shape_cast %777 : vector<1x8x128xf32> to vector<8x128xf32>
    %779 = vector.shape_cast %778 : vector<8x128xf32> to vector<1x8x128xf32>
    %780 = vector.broadcast %779 : vector<1x8x128xf32> to vector<8x8x128xf32>
    %781 = arith.mulf %630, %780 : vector<8x8x128xf32>
    %782 = arith.addf %776, %781 : vector<8x8x128xf32>
    %c20_408 = arith.constant 20 : index
    %c0_409 = arith.constant 0 : index
    %c0_410 = arith.constant 0 : index
    %783 = vector.load %arg2[%c20_408, %c0_409, %c0_410] : memref<27x8x128xf32, #tpu.memory_space<vmem>>, vector<1x8x128xf32>
    %784 = vector.shape_cast %783 : vector<1x8x128xf32> to vector<8x128xf32>
    %785 = vector.shape_cast %784 : vector<8x128xf32> to vector<1x8x128xf32>
    %786 = vector.broadcast %785 : vector<1x8x128xf32> to vector<8x8x128xf32>
    %787 = arith.mulf %650, %786 : vector<8x8x128xf32>
    %788 = arith.addf %782, %787 : vector<8x8x128xf32>
    %789 = vector.extract_strided_slice %788 {offsets = [0, 0, 0], sizes = [7, 8, 128], strides = [1, 1, 1]} : vector<8x8x128xf32> to vector<7x8x128xf32>
    %790 = tpu.concatenate %3, %789 in 0 : vector<1x8x128xf32>, vector<7x8x128xf32> -> vector<8x8x128xf32>
    %c5_411 = arith.constant 5 : index
    %c0_412 = arith.constant 0 : index
    %c0_413 = arith.constant 0 : index
    %791 = vector.load %arg2[%c5_411, %c0_412, %c0_413] : memref<27x8x128xf32, #tpu.memory_space<vmem>>, vector<1x8x128xf32>
    %792 = vector.shape_cast %791 : vector<1x8x128xf32> to vector<8x128xf32>
    %793 = vector.shape_cast %792 : vector<8x128xf32> to vector<1x8x128xf32>
    %794 = vector.broadcast %793 : vector<1x8x128xf32> to vector<8x8x128xf32>
    %795 = arith.mulf %640, %794 : vector<8x8x128xf32>
    %c14_414 = arith.constant 14 : index
    %c0_415 = arith.constant 0 : index
    %c0_416 = arith.constant 0 : index
    %796 = vector.load %arg2[%c14_414, %c0_415, %c0_416] : memref<27x8x128xf32, #tpu.memory_space<vmem>>, vector<1x8x128xf32>
    %797 = vector.shape_cast %796 : vector<1x8x128xf32> to vector<8x128xf32>
    %798 = vector.shape_cast %797 : vector<8x128xf32> to vector<1x8x128xf32>
    %799 = vector.broadcast %798 : vector<1x8x128xf32> to vector<8x8x128xf32>
    %800 = arith.mulf %630, %799 : vector<8x8x128xf32>
    %801 = arith.addf %795, %800 : vector<8x8x128xf32>
    %c23_417 = arith.constant 23 : index
    %c0_418 = arith.constant 0 : index
    %c0_419 = arith.constant 0 : index
    %802 = vector.load %arg2[%c23_417, %c0_418, %c0_419] : memref<27x8x128xf32, #tpu.memory_space<vmem>>, vector<1x8x128xf32>
    %803 = vector.shape_cast %802 : vector<1x8x128xf32> to vector<8x128xf32>
    %804 = vector.shape_cast %803 : vector<8x128xf32> to vector<1x8x128xf32>
    %805 = vector.broadcast %804 : vector<1x8x128xf32> to vector<8x8x128xf32>
    %806 = arith.mulf %650, %805 : vector<8x8x128xf32>
    %807 = arith.addf %801, %806 : vector<8x8x128xf32>
    %808 = arith.addf %790, %807 : vector<8x8x128xf32>
    %c8_420 = arith.constant 8 : index
    %c0_421 = arith.constant 0 : index
    %c0_422 = arith.constant 0 : index
    %809 = vector.load %arg2[%c8_420, %c0_421, %c0_422] : memref<27x8x128xf32, #tpu.memory_space<vmem>>, vector<1x8x128xf32>
    %810 = vector.shape_cast %809 : vector<1x8x128xf32> to vector<8x128xf32>
    %811 = vector.shape_cast %810 : vector<8x128xf32> to vector<1x8x128xf32>
    %812 = vector.broadcast %811 : vector<1x8x128xf32> to vector<8x8x128xf32>
    %813 = arith.mulf %640, %812 : vector<8x8x128xf32>
    %c17_423 = arith.constant 17 : index
    %c0_424 = arith.constant 0 : index
    %c0_425 = arith.constant 0 : index
    %814 = vector.load %arg2[%c17_423, %c0_424, %c0_425] : memref<27x8x128xf32, #tpu.memory_space<vmem>>, vector<1x8x128xf32>
    %815 = vector.shape_cast %814 : vector<1x8x128xf32> to vector<8x128xf32>
    %816 = vector.shape_cast %815 : vector<8x128xf32> to vector<1x8x128xf32>
    %817 = vector.broadcast %816 : vector<1x8x128xf32> to vector<8x8x128xf32>
    %818 = arith.mulf %630, %817 : vector<8x8x128xf32>
    %819 = arith.addf %813, %818 : vector<8x8x128xf32>
    %c26_426 = arith.constant 26 : index
    %c0_427 = arith.constant 0 : index
    %c0_428 = arith.constant 0 : index
    %820 = vector.load %arg2[%c26_426, %c0_427, %c0_428] : memref<27x8x128xf32, #tpu.memory_space<vmem>>, vector<1x8x128xf32>
    %821 = vector.shape_cast %820 : vector<1x8x128xf32> to vector<8x128xf32>
    %822 = vector.shape_cast %821 : vector<8x128xf32> to vector<1x8x128xf32>
    %823 = vector.broadcast %822 : vector<1x8x128xf32> to vector<8x8x128xf32>
    %824 = arith.mulf %650, %823 : vector<8x8x128xf32>
    %825 = arith.addf %819, %824 : vector<8x8x128xf32>
    %826 = vector.extract_strided_slice %825 {offsets = [1, 0, 0], sizes = [7, 8, 128], strides = [1, 1, 1]} : vector<8x8x128xf32> to vector<7x8x128xf32>
    %827 = tpu.concatenate %826, %3 in 0 : vector<7x8x128xf32>, vector<1x8x128xf32> -> vector<8x8x128xf32>
    %828 = arith.addf %808, %827 : vector<8x8x128xf32>
    %c0_429 = arith.constant 0 : index
    %c1_430 = arith.constant 1 : index
    %c0_431 = arith.constant 0 : index
    %829 = vector.load %arg5[%c0_429, %c1_430, %c0_431] : memref<8x10x128xf32, #tpu.memory_space<vmem>>, vector<8x8x128xf32>
    tpu.vector_store %arg5[%c0_429, %c1_430, %c0_431], %828 {strides = array<i32>} : memref<8x10x128xf32, #tpu.memory_space<vmem>>, vector<8x8x128xf32>,
    %c0_432 = arith.constant 0 : index
    %c2_433 = arith.constant 2 : index
    %c0_434 = arith.constant 0 : index
    %830 = vector.load %arg5[%c0_432, %c2_433, %c0_434] : memref<8x10x128xf32, #tpu.memory_space<vmem>>, vector<8x8x128xf32>
    %831 = arith.addf %771, %830 : vector<8x8x128xf32>
    %c0_435 = arith.constant 0 : index
    %832 = arith.index_cast %c3_i32_323 : i32 to index
    %c0_436 = arith.constant 0 : index
    %c0_437 = arith.constant 0 : index
    %c0_438 = arith.constant 0 : index
    %833 = vector.load %arg4[%c0_435, %832, %c0_436, %c0_437, %c0_438] : memref<1x4x8x8x128xf32, #tpu.memory_space<vmem>>, vector<1x1x8x8x128xf32>
    %834 = vector.shape_cast %833 : vector<1x1x8x8x128xf32> to vector<8x8x128xf32>
    %835 = vector.shape_cast %831 : vector<8x8x128xf32> to vector<1x1x8x8x128xf32>
    tpu.vector_store %arg4[%c0_435, %832, %c0_436, %c0_437, %c0_438], %835 {strides = array<i32>} : memref<1x4x8x8x128xf32, #tpu.memory_space<vmem>>, vector<1x1x8x8x128xf32>,
    %c4_i32 = arith.constant 4 : i32
    return
  }
  func.func @transform_0(%arg0: i32) -> (i32, i32, i32, i32, i32) {
    %c0_i32 = arith.constant 0 : i32
    %c0_i32_0 = arith.constant 0 : i32
    %c0_i32_1 = arith.constant 0 : i32
    %c0_i32_2 = arith.constant 0 : i32
    %c0_i32_3 = arith.constant 0 : i32
    return %arg0, %c0_i32, %c0_i32_0, %c0_i32_1, %c0_i32_2 : i32, i32, i32, i32, i32
  }
  func.func @transform_1(%arg0: i32) -> (i32, i32, i32) {
    %c0_i32 = arith.constant 0 : i32
    %c0_i32_0 = arith.constant 0 : i32
    %c0_i32_1 = arith.constant 0 : i32
    %c0_i32_2 = arith.constant 0 : i32
    return %c0_i32, %c0_i32_0, %c0_i32_1 : i32, i32, i32
  }
  func.func @transform_2(%arg0: i32) -> (i32, i32) {
    %c0_i32 = arith.constant 0 : i32
    %c0_i32_0 = arith.constant 0 : i32
    %c0_i32_1 = arith.constant 0 : i32
    return %c0_i32, %c0_i32_0 : i32, i32
  }
  func.func @transform_3(%arg0: i32) -> (i32, i32, i32, i32, i32) {
    %c0_i32 = arith.constant 0 : i32
    %c0_i32_0 = arith.constant 0 : i32
    %c0_i32_1 = arith.constant 0 : i32
    %c0_i32_2 = arith.constant 0 : i32
    %c0_i32_3 = arith.constant 0 : i32
    return %arg0, %c0_i32, %c0_i32_0, %c0_i32_1, %c0_i32_2 : i32, i32, i32, i32, i32
  }
}

</mosaic_0001>

<bundles_post_ra>
// kernel: tpu_custom_call.1
= control target key start
LH: loop header
LB: loop body
LE: loop exit
PB: predicated region body
PF: predicated region fallthrough
CT: control target
= control target key end

     0   :  { %8 = vsyncpa [#allocation4], 0  ;;  %s5335_s0 = inlined_call_operand.hbm [shape: f32[4,4,8,8,128], index: 0, kind: input, shape index: {}]   ;;  %s5336_s1 = inlined_call_operand.hbm [shape: f32[27,8,128], index: 1, kind: input, shape index: {}]   ;;  %s5337_s2 = inlined_call_operand.hbm [shape: f32[8,128], index: 2, kind: input, shape index: {}]   ;;  %s5338_s3 = inlined_call_operand.hbm [shape: f32[4,4,8,8,128], index: 3, kind: output, shape index: {}]  }
   0x1   :  { %10 = vsyncpa [#allocation4 + $0x1], 0 }
   0x2   :  { %11 = vsyncpa [#allocation7], 0 }
   0x3   :  { %12 = vsyncpa [#allocation5], 0 }
   0x4   :  { %14 = vsyncpa [#allocation5 + $0x1], 0  ;;  %s2830_s12 = smov 0   ;;  %s2832_s13 = smov 0  }
   0x5   :  { %s2834_s14 = smov 0   ;;  %s2836_s15 = smov 0  }
   0x6 LB: > { %s2851_s16 = sadd.s32 4294967295, %s2799_s15   ;;  %s2375_s17 = sadd.s32 4294967294, %s2799_s15   ;;  %s2799_s15 = sphi %s2836_s15, %s5637_s15   ;;  %s2795_s14 = sphi %s2834_s14, %s5636_s14   ;;  %s2791_s13 = sphi %s2832_s13, %s5635_s13   ;;  %s2787_s12 = sphi %s2830_s12, %s5634_s12  }
   0x7   : > { %p40_p0 = scmp.ne.s32.totalorder %s2791_s13, %s2787_s12  ;;  %p5339_p1 = scmp.eq.s32.totalorder %s2851_s16, 0 }
   0x8   : > { %p106_p2 = scmp.eq.s32.totalorder %s2851_s16, 3  ;;  %p112_p3 = scmp.eq.s32.totalorder %s2375_s17, 3 }
   0x9   : > { %p2860_p4 = por %p5339_p1, %p40_p0  ;;  %p2376_p5 = scmp.ge.s32.totalorder %s2799_s15, 1 }
   0xa   : > { %p2865_p6 = por %p112_p3, %p40_p0  ;;  %p119_p7 = scmp.lt.s32.totalorder %s2799_s15, 5 }
   0xb   : > { %s5454_s18 = scalar_select %p2860_p4, 1, 0 }
   0xc   : > { %s5455_s19 = scalar_select %p2865_p6, 1, 0 }
   0xd   : > { %p2870_p8 = pnand %p2376_p5, %p119_p7  ;;  %s2801_s21 = smov [#allocation6]  }
   0xe   : > { %s131_s22 = sshll.u32 %s2801_s21, 4  ;;  %s2802_s24 = smov [#allocation8]   ;;  %s132_s22 = int_to_ptr.vmem [resolvable:$true] %s131_s22 }
   0xf   : > { %s5456_s20 = scalar_select %p2870_p8, 1, 0 }
  0x10   : > { %p2495_p9 = pneg %p2870_p8  ;;  %s145_s25 = sshll.u32 %s2802_s24, 4  ;;  %s146_s25 = int_to_ptr.vmem [resolvable:$true] %s145_s25 }
  0x11   : > { %s2662_s26 = scalar_lea.vmem %s132_s22, 3456  ;;  %p2670_p3 = scmp.lt.s32.totalorder %s132_s22, %s132_s22 }
  0x12   : > { %p2878_p10 = pnand %p2495_p9, %p5339_p1  ;;  %p2663_p12 = scmp.ne.s32.totalorder %s132_s22, %s2662_s26 }
  0x13   : > { %p2671_p5 = scmp.lt.s32.totalorder %s2662_s26, %s2662_s26 }
  0x14   : > { %p2653_p11 = pneg %p2878_p10 }
  0x15   : > { %p2672_p7 = por %p2671_p5, %p2670_p3 }
  0x16   : > { %p2665_p13 = pnand %p2663_p12, %p2653_p11 }
  0x18   : > { %p2666_p0 = pneg %p2665_p13 }
  0x1a   : > { %p2673_p9 = pnand %p2672_p7, %p2666_p0 }
  0x1c   : > { %2676 = shalt.err (!%p2673_p9)
}
  0x1d   : > { %s2803_s27 = smov 128   ;;  %s2804_s28 = smov 8  }
  0x1e   : > { %2498 = dma.hbm_to_vmem [thread:$0]  (!%p2878_p10), %s5336_s1, 3456, %s132_s22, [#allocation7], %s2803_s27, %s2803_s27, %s2804_s28  }
  0x1f   : > { %s2688_s4 = scalar_lea.vmem %s146_s25, 128  ;;  %p2696_p0 = scmp.lt.s32.totalorder %s146_s25, %s146_s25 }
  0x20   : > { %p2689_p12 = scmp.ne.s32.totalorder %s146_s25, %s2688_s4  ;;  %p2697_p5 = scmp.lt.s32.totalorder %s2688_s4, %s2688_s4 }
  0x22   : > { %p2691_p13 = pnand %p2689_p12, %p2653_p11  ;;  %p2698_p7 = por %p2697_p5, %p2696_p0 }
  0x24   : > { %p2692_p3 = pneg %p2691_p13 }
  0x26   : > { %p2699_p9 = pnand %p2698_p7, %p2692_p3 }
  0x28   : > { %2702 = shalt.err (!%p2699_p9)
}
  0x29   : > { %2501 = dma.hbm_to_vmem [thread:$0]  (!%p2878_p10), %s5337_s2, 128, %s146_s25, [#allocation7]  }
  0x2a   : > { %s2904_s7 = sadd.s32 1, %s2799_s15   ;;  %s27_s8 = sadd.s32 1, %s2795_s14 }
  0x2b   : > { %s24_s9 = ssub.s32 %s2799_s15, %s2904_s7  ;;  %p34_p11 = scmp.ne.s32.totalorder %s2795_s14, %s2791_s13 }
  0x2c   : > { %p25_p12 = scmp.eq.s32.totalorder %s24_s9, 0  ;;  %p35_p13 = scmp.eq.s32.totalorder %s2799_s15, 0 }
  0x2d   : > { %p2914_p3 = por %p106_p2, %p34_p11  ;;  %p2512_p0 = scmp.lt.s32.totalorder %s2799_s15, 4 }
  0x2e   : > { %s2920_s11 = scalar_select %p25_p12, %s2795_s14, %s27_s8  }
  0x2f   : > { %s5458_s10 = scalar_select %p2914_p3, 1, 0 }
  0x30   : > { %p36_p5 = por %p35_p13, %p34_p11  ;;  %s156_s17 = sand.u32 1, %s2795_s14  }
  0x31   : > { %s2380_s21 = sshll.u32 %s156_s17, 8  ;;  %s2481_s22 = sshll.u32 %s2799_s15, 12 }
  0x32   : > { %s2927_s25 = scalar_lea.hbm %s5335_s0, %s2481_s22  ;;  %s160_s26 = scalar_lea.vmem [#allocation3], %s2380_s21 }
  0x33   : > { %s167_s29 = sshll.u32 %s160_s26, 4  ;;  %p2931_p2 = pnand %p2512_p0, %p36_p5  ;;  %s2929_s29 = int_to_ptr.vmem [resolvable:$true] %s167_s29 }
  0x34   : > { %s2935_s4 = scalar_lea.sflag [#allocation4], %s156_s17  ;;  %s2703_s5 = scalar_lea.hbm %s2927_s25, 4096 }
  0x35   : > { %p2704_p10 = scmp.ne.s32.totalorder %s2927_s25, %s2703_s5  ;;  %p2705_p7 = pneg %p2931_p2 }
  0x36   : > { %s2708_s9 = scalar_lea.hbm %s5335_s0, 16384  ;;  %p2709_p12 = scmp.lt.s32.totalorder %s2927_s25, %s5335_s0 }
  0x37   : > { %p2706_p9 = pnand %p2705_p7, %p2704_p10  ;;  %p2710_p13 = scmp.lt.s32.totalorder %s2708_s9, %s2703_s5 }
  0x39   : > { %p2707_p11 = pneg %p2706_p9  ;;  %p2711_p0 = por %p2710_p13, %p2709_p12 }
  0x3b   : > { %p2712_p5 = pnand %p2711_p0, %p2707_p11 }
  0x3d   : > { %2715 = shalt.err (!%p2712_p5)
}
  0x3e   : > { %s2716_s17 = scalar_lea.vmem %s2929_s29, 4096  ;;  %s2805_s23 = smov [#allocation3]  }
  0x3f   : > { %p2717_p1 = scmp.ne.s32.totalorder %s2929_s29, %s2716_s17  ;;  %s2721_s24 = sshll.u32 %s2805_s23, 4  ;;  %s2722_s24 = int_to_ptr.vmem [resolvable:$false] %s2721_s24 }
  0x40   : > { %s2723_s26 = scalar_lea.vmem %s2722_s24, 8192  ;;  %p2724_p9 = scmp.lt.s32.totalorder %s2929_s29, %s2722_s24 }
  0x41   : > { %p2719_p6 = pnand %p2717_p1, %p2705_p7  ;;  %p2725_p3 = scmp.lt.s32.totalorder %s2723_s26, %s2716_s17 }
  0x43   : > { %p2720_p10 = pneg %p2719_p6  ;;  %p2726_p4 = por %p2725_p3, %p2724_p9 }
  0x45   : > { %p2727_p8 = pnand %p2726_p4, %p2720_p10 }
  0x47   : > { %2730 = shalt.err (!%p2727_p8)
}
  0x48   : > { %2505 = dma.hbm_to_vmem [thread:$0]  (!%p2931_p2), %s2927_s25, 4096, %s2929_s29, %s2935_s4, %s2803_s27, %s2803_s27, %s2804_s28  }
  0x49   : > { %p5460_p1 = scmp.ne.s32.totalorder %s5456_s20, 0 }
  0x4b   : > { %179 = sbr.rel (%p5460_p1) target bundleno = 524 (0x20c), region = 32 }
  0x50   : > { %s2962_s5 = sand.u32 1, %s2791_s13   ;;  %p5461_p4 = scmp.ne.s32.totalorder %s5454_s18, 0 }
  0x51   : > { %s2384_s6 = sshll.u32 %s2962_s5, 8  ;;  %s182_s8 = scalar_lea.sflag [#allocation4], %s2962_s5 }
  0x52   : > { %s2968_s30 = scalar_lea.vmem [#allocation3], %s2384_s6 }
  0x53   : > { %2774 = dma.done.wait (%p5461_p4), %s182_s8, 4096  }
  0x54   : > { %2776 = vsyncadd (%p5461_p4), %s182_s8, 4294963200  ;;  %p5462_p6 = scmp.eq.s32.totalorder %s2851_s16, 0 }
  0x56   : > { %2778 = dma.done.wait (%p5462_p6), [#allocation7], 3584   ;;  %p5463_p8 = pmov %p5462_p6 }
  0x57   : > { %v2806_v0 = vmov 0.0   ;;  %v2979_v1 = vld [vmem:[%s2968_s30] sm:$0xff]  ;;  %v2982_v2 = vld [vmem:[%s2968_s30 + $0x8] sm:$0xff]  ;;  %v2996_v7 = vld [vmem:[#allocation6 + $0x18] sm:$0xff]  ;;  %s3493_s18 = scalar_lea.vmem [#allocation9], %s2384_s6  ;;  %s2482_s20 = sshll.u32 %s2851_s16, 12 }
  0x58   : > { %2780 = vsyncadd (%p5463_p8), [#allocation7], 4294963712  ;;  %216 = vst [vmem:[#allocation2] sm:$0xff] %v2806_v0  ;;  %v2985_v3 = vld [vmem:[%s2968_s30 + $0x40] sm:$0xff]  ;;  %v2988_v4 = vmul.f32 0.0, %v2979_v1  ;;  %v2991_v5 = vmul.f32 0.0, %v2982_v2  ;;  %v3012_v14 = vmul.f32 %v2996_v7, %v2979_v1  ;;  %s5290_s29 = scalar_lea.hbm %s5338_s3, %s2482_s20 }
  0x59   : > { %217 = vst [vmem:[#allocation2 + $0x8] sm:$0x3] %v2806_v0  ;;  %218 = vst [vmem:[#allocation2 + $0x10] sm:$0xff] %v2806_v0  ;;  %v2994_v6 = vld [vmem:[%s2968_s30 + $0x48] sm:$0xff]  ;;  %v2998_v8 = vld [vmem:[#allocation6 + $0x60] sm:$0xff]  ;;  %s2283_s27 = sshll.u32 %s3493_s18, 4  ;;  %s5292_s27 = int_to_ptr.vmem [resolvable:$true] %s2283_s27 }
  0x5a   : > { %219 = vst [vmem:[#allocation2 + $0x18] sm:$0x3] %v2806_v0  ;;  %220 = vst [vmem:[#allocation2 + $0x20] sm:$0xff] %v2806_v0  ;;  %v318_v9 = vmul.f32 %v2998_v8, %v2979_v1  ;;  %v3002_v10 = vld [vmem:[#allocation6 + $0xa8] sm:$0xff]  ;;  %v3004_v11 = vld [vmem:[#allocation6 + $0x30] sm:$0xff]  ;;  %v319_v13 = vmul.f32 %v2998_v8, %v2982_v2  ;;  %v3016_v15 = vmul.f32 %v2985_v3, %v2998_v8  ;;  %s2270_s4 = scalar_lea.sflag [#allocation5], %s2962_s5 }
  0x5b   : > { %221 = vst [vmem:[#allocation2 + $0x28] sm:$0x3] %v2806_v0  ;;  %222 = vst [vmem:[#allocation2 + $0x30] sm:$0xff] %v2806_v0  ;;  %v3006_v12 = vld [vmem:[#allocation6 + $0x78] sm:$0xff]  ;;  %v308_v16 = vmul.f32 %v2996_v7, %v2988_v4  ;;  %v336_v17 = vmul.f32 %v2985_v3, %v3002_v10  ;;  %v362_v18 = vmul.f32 %v3004_v11, %v2991_v5  ;;  %v3026_v20 = vld [vmem:[#allocation6 + $0xc0] sm:$0xff]  ;;  %s2731_s9 = scalar_lea.vmem %s5292_s27, 4096 }
  0x5c   : > { %223 = vst [vmem:[#allocation2 + $0x38] sm:$0x3] %v2806_v0  ;;  %224 = vst [vmem:[#allocation2 + $0x40] sm:$0xff] %v2806_v0  ;;  %v371_v19 = vmul.f32 %v3006_v12, %v2982_v2  ;;  %v3029_v21 = vld [vmem:[%s2968_s30 + $0x30] sm:$0xff]  ;;  %v3032_v22 = vld [vmem:[%s2968_s30 + $0x38] sm:$0xff]  ;;  %v387_v23 = vmul.f32 %v2994_v6, %v3026_v20  ;;  %v309_v48 = vmul.f32 %v2996_v7, %v2991_v5  ;;  %p2732_p3 = scmp.ne.s32.totalorder %s5292_s27, %s2731_s9  ;;  %p5632_p2 = scmp.ne.s32.totalorder %s5458_s10, 0 }
  0x5d   : > { %225 = vst [vmem:[#allocation2 + $0x48] sm:$0x3] %v2806_v0  ;;  %226 = vst [vmem:[#allocation2 + $0x50] sm:$0xff] %v2806_v0  ;;  %v3037_v24 = vmul.f32 0.0, %v3029_v21  ;;  %v3040_v25 = vmul.f32 0.0, %v3032_v22  ;;  %v3043_v26 = vld [vmem:[%s2968_s30 + $0x70] sm:$0xff]  ;;  %v325_v29 = vmul.f32 %v2998_v8, %v3032_v22  ;;  %v326_v30 = vadd.f32 %v318_v9, %v308_v16 }
  0x5e   : > { %227 = vst [vmem:[#allocation2 + $0x58] sm:$0x3] %v2806_v0  ;;  %228 = vst [vmem:[#allocation2 + $0x60] sm:$0xff] %v2806_v0  ;;  %v3046_v27 = vld [vmem:[%s2968_s30 + $0x78] sm:$0xff]  ;;  %v3048_v28 = vld [vmem:[#allocation6] sm:$0xff]  ;;  %v378_v31 = vadd.f32 %v371_v19, %v362_v18  ;;  %v337_v52 = vmul.f32 %v2994_v6, %v3002_v10  ;;  %v327_v57 = vadd.f32 %v319_v13, %v309_v48  ;;  %p2733_p7 = pnand %p2732_p3, %p5632_p2  ;;  %s2807_s16 = smov [#allocation9]  }
  0x5f   : > { %229 = vst [vmem:[#allocation2 + $0x68] sm:$0x3] %v2806_v0  ;;  %230 = vst [vmem:[#allocation2 + $0x70] sm:$0xff] %v2806_v0  ;;  %v3052_v32 = vld [vmem:[#allocation6 + $0x48] sm:$0xff]  ;;  %v3054_v33 = vld [vmem:[#allocation6 + $0x90] sm:$0xff]  ;;  %v343_v34 = vmul.f32 %v3046_v27, %v3002_v10  ;;  %v267_v36 = vmul.f32 %v3048_v28, %v2988_v4  ;;  %v273_v37 = vmul.f32 %v3048_v28, %v3037_v24  ;;  %s2735_s21 = sshll.u32 %s2807_s16, 4  ;;  %s2736_s21 = int_to_ptr.vmem [resolvable:$false] %s2735_s21 }
  0x60   : > { %231 = vst [vmem:[#allocation2 + $0x78] sm:$0x3] %v2806_v0  ;;  %5464 = vst [vmem:[#allocation13_spill] sm:$0xff] %v2985_v3  ;;  %v3059_v35 = vld [vmem:[%s2968_s30 + $0x10] sm:$0xff]  ;;  %v282_v38 = vmul.f32 %v3052_v32, %v3029_v21  ;;  %v298_v39 = vmul.f32 %v3043_v26, %v3054_v33  ;;  %v315_v40 = vmul.f32 %v2996_v7, %v3040_v25  ;;  %v3081_v49 = vld [vmem:[%s2968_s30 + $0x18] sm:$0xff]  ;;  %p2734_p11 = pneg %p2733_p7  ;;  %s2737_s22 = scalar_lea.vmem %s2736_s21, 8192 }
  0x61   : > { %5465 = vst [vmem:[#allocation14_spill] sm:$0xff] %v2988_v4  ;;  %5466 = vst [vmem:[#allocation15_spill] sm:$0xff] %v2998_v8  ;;  %v344_v41 = vadd.f32 %v336_v17, %v326_v30  ;;  %v394_v42 = vadd.f32 %v387_v23, %v378_v31  ;;  %v3072_v43 = vmul.f32 0.0, %v3059_v35  ;;  %v276_v44 = vmul.f32 %v3052_v32, %v2979_v1  ;;  %v3088_v56 = vld [vmem:[%s2968_s30 + $0x50] sm:$0xff]  ;;  %v3102_v16 = vld [vmem:[%s2968_s30 + $0x20] sm:$0xff]  ;;  %p2738_p12 = scmp.lt.s32.totalorder %s5292_s27, %s2736_s21  ;;  %p2739_p13 = scmp.lt.s32.totalorder %s2737_s22, %s2731_s9 }
  0x62   : > { %5467 = vst [vmem:[#allocation16_spill] sm:$0xff] %v3037_v24  ;;  %5468 = vst [vmem:[#allocation17_spill] sm:$0xff] %v3040_v25  ;;  %v289_v45 = vadd.f32 %v282_v38, %v273_v37  ;;  %v333_v46 = vadd.f32 %v325_v29, %v315_v40  ;;  %v292_v47 = vmul.f32 %v2985_v3, %v3054_v33  ;;  %v3095_v61 = vmul.f32 0.0, %v3081_v49  ;;  %v3113_v31 = vld [vmem:[%s2968_s30 + $0x58] sm:$0xff] }
  0x63   : > { %5469 = vst [vmem:[#allocation18_spill] sm:$0xff] %v3072_v43  ;;  %v401_v50 = vadd.f32 %v394_v42, %v344_v41  ;;  %v283_v51 = vadd.f32 %v276_v44, %v267_v36  ;;  %v363_v53 = vmul.f32 %v3004_v11, %v3072_v43  ;;  %v372_v58 = vmul.f32 %v3006_v12, %v3059_v35  ;;  %p2740_p0 = por %p2739_p13, %p2738_p12 }
  0x64   : > { %v305_v54 = vadd.f32 %v298_v39, %v289_v45  ;;  %v351_v55 = vadd.f32 %v343_v34, %v333_v46  ;;  %v388_v60 = vmul.f32 %v3088_v56, %v3026_v20  ;;  %5470 = vst [vmem:[#allocation19_spill] sm:$0xff] %v3095_v61  ;;  %v268_v62 = vmul.f32 %v3048_v28, %v2991_v5 }
  0x65   : > { %409 = vst [vmem:[#allocation2 + $0x1] sm:$0xff] %v401_v50  ;;  %v299_v59 = vadd.f32 %v292_v47, %v283_v51  ;;  %v345_v0 = vadd.f32 %v337_v52, %v327_v57  ;;  %v379_v9 = vadd.f32 %v372_v58, %v363_v53  ;;  %v277_v13 = vmul.f32 %v3052_v32, %v2982_v2  ;;  %v3133_v51 = vld [vmem:[%s2968_s30 + $0x28] sm:$0xff]  ;;  %v3136_v52 = vld [vmem:[%s2968_s30 + $0x60] sm:$0xff]  ;;  %p2741_p5 = pnand %p2740_p0, %p2734_p11 }
  0x66   : > { %v359_v63 = vadd.f32 %v351_v55, %v305_v54  ;;  %v293_v17 = vmul.f32 %v2994_v6, %v3054_v33  ;;  %v310_v18 = vmul.f32 %v2996_v7, %v3072_v43  ;;  %v320_v19 = vmul.f32 %v2998_v8, %v3059_v35 }
  0x67   : > { %v338_v23 = vmul.f32 %v3088_v56, %v3002_v10  ;;  %v353_v29 = vadd.f32 %v345_v0, %v299_v59  ;;  %v395_v30 = vadd.f32 %v388_v60, %v379_v9  ;;  %v284_v34 = vadd.f32 %v277_v13, %v268_v62 }
  0x68   : > { %416 = vst [vmem:[#allocation2 + $0x71] sm:$0xff] %v359_v63  ;;  %v364_v36 = vmul.f32 %v3004_v11, %v3095_v61  ;;  %v328_v37 = vadd.f32 %v320_v19, %v310_v18  ;;  %v373_v38 = vmul.f32 %v3006_v12, %v3081_v49  ;;  %v389_v39 = vmul.f32 %v3113_v31, %v3026_v20 }
  0x69   : > { %v3122_v40 = vmul.f32 0.0, %v3102_v16  ;;  %v402_v41 = vadd.f32 %v395_v30, %v353_v29  ;;  %v300_v42 = vadd.f32 %v293_v17, %v284_v34  ;;  %v269_v44 = vmul.f32 %v3048_v28, %v3072_v43 }
  0x6a   : > { %v278_v45 = vmul.f32 %v3052_v32, %v3059_v35  ;;  %v346_v46 = vadd.f32 %v338_v23, %v328_v37  ;;  %v380_v47 = vadd.f32 %v373_v38, %v364_v36  ;;  %v294_v48 = vmul.f32 %v3088_v56, %v3054_v33  ;;  %v3164_v38 = vld [vmem:[%s2968_s30 + $0x68] sm:$0xff] }
  0x6b   : > { %5471 = vst [vmem:[#allocation20_spill] sm:$0xff] %v3122_v40  ;;  %v311_v50 = vmul.f32 %v2996_v7, %v3095_v61  ;;  %410 = vst [vmem:[#allocation2 + $0x11] sm:$0xff] %v402_v41  ;;  %v321_v54 = vmul.f32 %v2998_v8, %v3081_v49  ;;  %v339_v55 = vmul.f32 %v3113_v31, %v3002_v10  ;;  %v3149_v9 = vmul.f32 0.0, %v3133_v51 }
  0x6c   : > { %v285_v53 = vadd.f32 %v278_v45, %v269_v44  ;;  %v365_v57 = vmul.f32 %v3004_v11, %v3122_v40  ;;  %v354_v58 = vadd.f32 %v346_v46, %v300_v42  ;;  %v396_v59 = vadd.f32 %v389_v39, %v380_v47 }
  0x6d   : > { %v374_v60 = vmul.f32 %v3006_v12, %v3102_v16  ;;  %v390_v62 = vmul.f32 %v3136_v52, %v3026_v20  ;;  %v329_v0 = vadd.f32 %v321_v54, %v311_v50  ;;  %5472 = vst [vmem:[#allocation21_spill] sm:$0xff] %v3149_v9  ;;  %v270_v13 = vmul.f32 %v3048_v28, %v3095_v61 }
  0x6e   : > { %v301_v63 = vadd.f32 %v294_v48, %v285_v53  ;;  %v403_v17 = vadd.f32 %v396_v59, %v354_v58  ;;  %v279_v19 = vmul.f32 %v3052_v32, %v3081_v49  ;;  %v295_v23 = vmul.f32 %v3113_v31, %v3054_v33 }
  0x6f   : > { %v381_v18 = vadd.f32 %v374_v60, %v365_v57  ;;  %v347_v29 = vadd.f32 %v339_v55, %v329_v0  ;;  %v312_v30 = vmul.f32 %v2996_v7, %v3122_v40  ;;  %v322_v34 = vmul.f32 %v2998_v8, %v3102_v16 }
  0x70   : > { %v340_v36 = vmul.f32 %v3136_v52, %v3002_v10  ;;  %411 = vst [vmem:[#allocation2 + $0x21] sm:$0xff] %v403_v17  ;;  %v286_v39 = vadd.f32 %v279_v19, %v270_v13  ;;  %v366_v41 = vmul.f32 %v3004_v11, %v3149_v9  ;;  %v375_v42 = vmul.f32 %v3006_v12, %v3133_v51 }
  0x71   : > { %v397_v37 = vadd.f32 %v390_v62, %v381_v18  ;;  %v355_v44 = vadd.f32 %v347_v29, %v301_v63  ;;  %v330_v45 = vadd.f32 %v322_v34, %v312_v30  ;;  %v391_v46 = vmul.f32 %v3164_v38, %v3026_v20 }
  0x72   : > { %v271_v47 = vmul.f32 %v3048_v28, %v3122_v40  ;;  %v302_v48 = vadd.f32 %v295_v23, %v286_v39  ;;  %v382_v50 = vadd.f32 %v375_v42, %v366_v41  ;;  %v280_v53 = vmul.f32 %v3052_v32, %v3102_v16  ;;  %v3198_v42 = vld [vmem:[#allocation6 + $0x28] sm:$0xff] }
  0x73   : > { %v296_v54 = vmul.f32 %v3136_v52, %v3054_v33  ;;  %v404_v55 = vadd.f32 %v397_v37, %v355_v44  ;;  %v348_v57 = vadd.f32 %v340_v36, %v330_v45  ;;  %v313_v58 = vmul.f32 %v2996_v7, %v3149_v9  ;;  %5473 = vst [vmem:[#allocation22_spill] sm:$0xff] %v3198_v42  ;;  %v3200_v44 = vld [vmem:[#allocation6 + $0x70] sm:$0xff] }
  0x74   : > { %v323_v59 = vmul.f32 %v2998_v8, %v3133_v51  ;;  %v398_v60 = vadd.f32 %v391_v46, %v382_v50  ;;  %v287_v62 = vadd.f32 %v280_v53, %v271_v47  ;;  %v341_v63 = vmul.f32 %v3164_v38, %v3002_v10  ;;  %5474 = vst [vmem:[#allocation23_spill] sm:$0xff] %v3200_v44  ;;  %v3208_v50 = vld [vmem:[#allocation6 + $0xb8] sm:$0xff]  ;;  %v3210_v53 = vld [vmem:[#allocation6 + $0x40] sm:$0xff] }
  0x75   : > { %v367_v0 = vmul.f32 %v3004_v11, %v3037_v24  ;;  %412 = vst [vmem:[#allocation2 + $0x31] sm:$0xff] %v404_v55  ;;  %v356_v13 = vadd.f32 %v348_v57, %v302_v48  ;;  %v376_v18 = vmul.f32 %v3006_v12, %v3029_v21  ;;  %v392_v19 = vmul.f32 %v3043_v26, %v3026_v20 }
  0x76   : > { %v331_v17 = vadd.f32 %v323_v59, %v313_v58  ;;  %v303_v23 = vadd.f32 %v296_v54, %v287_v62  ;;  %v272_v29 = vmul.f32 %v3048_v28, %v3149_v9  ;;  %v281_v30 = vmul.f32 %v3052_v32, %v3133_v51  ;;  %5475 = vst [vmem:[#allocation24_spill] sm:$0xff] %v3208_v50  ;;  %v3216_v59 = vld [vmem:[#allocation6 + $0x88] sm:$0xff] }
  0x77   : > { %v297_v34 = vmul.f32 %v3164_v38, %v3054_v33  ;;  %v405_v36 = vadd.f32 %v398_v60, %v356_v13  ;;  %v383_v39 = vadd.f32 %v376_v18, %v367_v0  ;;  %v314_v41 = vmul.f32 %v2996_v7, %v3037_v24  ;;  %5476 = vst [vmem:[#allocation25_spill] sm:$0xff] %v3210_v53  ;;  %v3218_v60 = vld [vmem:[#allocation6 + $0xd0] sm:$0xff]  ;;  %v3226_v18 = vld [vmem:[#allocation6 + $0x58] sm:$0xff] }
  0x78   : > { %v349_v37 = vadd.f32 %v341_v63, %v331_v17  ;;  %v288_v45 = vadd.f32 %v281_v30, %v272_v29  ;;  %v324_v46 = vmul.f32 %v2998_v8, %v3029_v21  ;;  %v342_v47 = vmul.f32 %v3043_v26, %v3002_v10  ;;  %5477 = vst [vmem:[#allocation26_spill] sm:$0xff] %v3216_v59  ;;  %v3224_v17 = vld [vmem:[#allocation6 + $0x10] sm:$0xff] }
  0x79   : > { %v368_v48 = vmul.f32 %v3004_v11, %v3040_v25  ;;  %413 = vst [vmem:[#allocation2 + $0x41] sm:$0xff] %v405_v36  ;;  %v399_v55 = vadd.f32 %v392_v19, %v383_v39  ;;  %v377_v57 = vmul.f32 %v3006_v12, %v3032_v22  ;;  %v393_v58 = vmul.f32 %v3046_v27, %v3026_v20  ;;  %v3228_v19 = vld [vmem:[#allocation6 + $0xa0] sm:$0xff] }
  0x7a   : > { %v357_v54 = vadd.f32 %v349_v37, %v303_v23  ;;  %5478 = vst [vmem:[#allocation27_spill] sm:$0xff] %v3218_v60  ;;  %v304_v62 = vadd.f32 %v297_v34, %v288_v45  ;;  %v332_v63 = vadd.f32 %v324_v46, %v314_v41  ;;  %v628_v0 = vmul.f32 %v3198_v42, %v2988_v4 }
  0x7b   : > { %v638_v13 = vmul.f32 %v3200_v44, %v2979_v1  ;;  %5479 = vst [vmem:[#allocation28_spill] sm:$0xff] %v3224_v17  ;;  %5480 = vst [vmem:[#allocation29_spill] sm:$0xff] %v3226_v18  ;;  %v384_v29 = vadd.f32 %v377_v57, %v368_v48  ;;  %v656_v30 = vmul.f32 %v2985_v3, %v3208_v50 }
  0x7c   : > { %5481 = vst [vmem:[#allocation30_spill] sm:$0xff] %v3228_v19  ;;  %v406_v23 = vadd.f32 %v399_v55, %v357_v54  ;;  %v682_v34 = vmul.f32 %v3210_v53, %v2991_v5  ;;  %v350_v36 = vadd.f32 %v342_v47, %v332_v63  ;;  %v691_v39 = vmul.f32 %v3216_v59, %v2982_v2 }
  0x7d   : > { %v646_v37 = vadd.f32 %v638_v13, %v628_v0  ;;  %v707_v41 = vmul.f32 %v2994_v6, %v3218_v60  ;;  %v400_v45 = vadd.f32 %v393_v58, %v384_v29  ;;  %v593_v46 = vmul.f32 %v3224_v17, %v3037_v24 }
  0x7e   : > { %414 = vst [vmem:[#allocation2 + $0x51] sm:$0xff] %v406_v23  ;;  %v602_v48 = vmul.f32 %v3226_v18, %v3029_v21  ;;  %v618_v54 = vmul.f32 %v3043_v26, %v3228_v19  ;;  %v358_v55 = vadd.f32 %v350_v36, %v304_v62  ;;  %v698_v57 = vadd.f32 %v691_v39, %v682_v34  ;;  %v3256_v34 = vld [vmem:[#allocation2] sm:$0xff] }
  0x7f   : > { %v664_v47 = vadd.f32 %v656_v30, %v646_v37  ;;  %v635_v63 = vmul.f32 %v3198_v42, %v3040_v25  ;;  %v645_v13 = vmul.f32 %v3200_v44, %v3032_v22  ;;  %v663_v58 = vmul.f32 %v3046_v27, %v3208_v50 }
  0x80   : > { %v609_v0 = vadd.f32 %v602_v48, %v593_v46  ;;  %v587_v23 = vmul.f32 %v3224_v17, %v2988_v4  ;;  %v407_v29 = vadd.f32 %v400_v45, %v358_v55  ;;  %v714_v8 = vadd.f32 %v707_v41, %v698_v57 }
  0x81   : > { %v596_v62 = vmul.f32 %v3226_v18, %v2979_v1  ;;  %v612_v30 = vmul.f32 %v2985_v3, %v3228_v19  ;;  %v653_v37 = vadd.f32 %v645_v13, %v635_v63  ;;  %v629_v39 = vmul.f32 %v3198_v42, %v2991_v5 }
  0x82   : > { %v625_v36 = vadd.f32 %v618_v54, %v609_v0  ;;  %v639_v46 = vmul.f32 %v3200_v44, %v2982_v2  ;;  %415 = vst [vmem:[#allocation2 + $0x61] sm:$0xff] %v407_v29  ;;  %v721_v48 = vadd.f32 %v714_v8, %v664_v47  ;;  %v657_v41 = vmul.f32 %v2994_v6, %v3208_v50  ;;  %v3270_v0 = vld [vmem:[#allocation2 + $0x70] sm:$0xff] }
  0x83   : > { %v603_v45 = vadd.f32 %v596_v62, %v587_v23  ;;  %v683_v55 = vmul.f32 %v3210_v53, %v3072_v43  ;;  %v671_v57 = vadd.f32 %v663_v58, %v653_v37  ;;  %v692_v54 = vmul.f32 %v3216_v59, %v3059_v35  ;;  %5482 = vst [vmem:[#allocation31_spill] sm:$0xff] %v3270_v0 }
  0x84   : > { %v647_v3 = vadd.f32 %v639_v46, %v629_v39  ;;  %v708_v63 = vmul.f32 %v3088_v56, %v3218_v60  ;;  %729 = vst [vmem:[#allocation2 + $0x1] sm:$0xff] %v721_v48  ;;  %v588_v8 = vmul.f32 %v3224_v17, %v2991_v5  ;;  %v597_v47 = vmul.f32 %v3226_v18, %v2982_v2 }
  0x85   : > { %v619_v13 = vadd.f32 %v612_v30, %v603_v45  ;;  %v613_v58 = vmul.f32 %v2994_v6, %v3228_v19  ;;  %v679_v23 = vadd.f32 %v671_v57, %v625_v36  ;;  %v699_v62 = vadd.f32 %v692_v54, %v683_v55 }
  0x86   : > { %v665_v29 = vadd.f32 %v657_v41, %v647_v3  ;;  %v630_v37 = vmul.f32 %v3198_v42, %v3072_v43  ;;  %v604_v39 = vadd.f32 %v597_v47, %v588_v8  ;;  %v640_v46 = vmul.f32 %v3200_v44, %v3059_v35  ;;  %v3290_v41 = vld [vmem:[#allocation2 + $0x10] sm:$0xff] }
  0x87   : > { %v658_v30 = vmul.f32 %v3088_v56, %v3208_v50  ;;  %v684_v48 = vmul.f32 %v3210_v53, %v3095_v61  ;;  %736 = vst [vmem:[#allocation2 + $0x71] sm:$0xff] %v679_v23  ;;  %v715_v0 = vadd.f32 %v708_v63, %v699_v62  ;;  %v693_v3 = vmul.f32 %v3216_v59, %v3081_v49 }
  0x88   : > { %v673_v45 = vadd.f32 %v665_v29, %v619_v13  ;;  %v709_v36 = vmul.f32 %v3113_v31, %v3218_v60  ;;  %5483 = vst [vmem:[#allocation32_spill] sm:$0xff] %v3290_v41  ;;  %v620_v55 = vadd.f32 %v613_v58, %v604_v39  ;;  %v648_v57 = vadd.f32 %v640_v46, %v630_v37 }
  0x89   : > { %v589_v54 = vmul.f32 %v3224_v17, %v3072_v43  ;;  %v598_v8 = vmul.f32 %v3226_v18, %v3059_v35  ;;  %v700_v23 = vadd.f32 %v693_v3, %v684_v48  ;;  %v614_v63 = vmul.f32 %v3088_v56, %v3228_v19 }
  0x8a   : > { %v722_v47 = vadd.f32 %v715_v0, %v673_v45  ;;  %v631_v13 = vmul.f32 %v3198_v42, %v3095_v61  ;;  %v666_v29 = vadd.f32 %v658_v30, %v648_v57  ;;  %v641_v58 = vmul.f32 %v3200_v44, %v3081_v49 }
  0x8b   : > { %v605_v62 = vadd.f32 %v598_v8, %v589_v54  ;;  %v659_v37 = vmul.f32 %v3113_v31, %v3208_v50  ;;  %v716_v39 = vadd.f32 %v709_v36, %v700_v23  ;;  %v685_v0 = vmul.f32 %v3210_v53, %v3122_v40  ;;  %v3312_v54 = vld [vmem:[#allocation2 + $0x20] sm:$0xff] }
  0x8c   : > { %730 = vst [vmem:[#allocation2 + $0x11] sm:$0xff] %v722_v47  ;;  %v694_v46 = vmul.f32 %v3216_v59, %v3102_v16  ;;  %v710_v48 = vmul.f32 %v3136_v52, %v3218_v60  ;;  %v674_v45 = vadd.f32 %v666_v29, %v620_v55  ;;  %v649_v3 = vadd.f32 %v641_v58, %v631_v13 }
  0x8d   : > { %v621_v30 = vadd.f32 %v614_v63, %v605_v62  ;;  %v590_v57 = vmul.f32 %v3224_v17, %v3095_v61  ;;  %5484 = vst [vmem:[#allocation33_spill] sm:$0xff] %v3312_v54  ;;  %v599_v36 = vmul.f32 %v3226_v18, %v3081_v49  ;;  %v615_v47 = vmul.f32 %v3113_v31, %v3228_v19 }
  0x8e   : > { %v701_v8 = vadd.f32 %v694_v46, %v685_v0  ;;  %v632_v23 = vmul.f32 %v3198_v42, %v3122_v40  ;;  %v723_v43 = vadd.f32 %v716_v39, %v674_v45  ;;  %v667_v41 = vadd.f32 %v659_v37, %v649_v3  ;;  %v3332_v45 = vld [vmem:[#allocation2 + $0x30] sm:$0xff] }
  0x8f   : > { %v642_v55 = vmul.f32 %v3200_v44, %v3102_v16  ;;  %v660_v63 = vmul.f32 %v3136_v52, %v3208_v50  ;;  %v606_v29 = vadd.f32 %v599_v36, %v590_v57  ;;  %v686_v62 = vmul.f32 %v3210_v53, %v3149_v9  ;;  %5485 = vst [vmem:[#allocation34_spill] sm:$0xff] %v3332_v45 }
  0x90   : > { %v717_v13 = vadd.f32 %v710_v48, %v701_v8  ;;  %v695_v58 = vmul.f32 %v3216_v59, %v3133_v51  ;;  %731 = vst [vmem:[#allocation2 + $0x21] sm:$0xff] %v723_v43  ;;  %v675_v0 = vadd.f32 %v667_v41, %v621_v30  ;;  %v711_v37 = vmul.f32 %v3164_v38, %v3218_v60 }
  0x91   : > { %v650_v46 = vadd.f32 %v642_v55, %v632_v23  ;;  %v591_v39 = vmul.f32 %v3224_v17, %v3122_v40  ;;  %v622_v3 = vadd.f32 %v615_v47, %v606_v29  ;;  %v600_v57 = vmul.f32 %v3226_v18, %v3102_v16 }
  0x92   : > { %v702_v48 = vadd.f32 %v695_v58, %v686_v62  ;;  %v616_v8 = vmul.f32 %v3136_v52, %v3228_v19  ;;  %v724_v36 = vadd.f32 %v717_v13, %v675_v0  ;;  %v633_v41 = vmul.f32 %v3198_v42, %v3149_v9  ;;  %v3350_v0 = vld [vmem:[#allocation2 + $0x40] sm:$0xff] }
  0x93   : > { %v668_v43 = vadd.f32 %v660_v63, %v650_v46  ;;  %v643_v30 = vmul.f32 %v3200_v44, %v3133_v51  ;;  %v607_v55 = vadd.f32 %v600_v57, %v591_v39  ;;  %v661_v47 = vmul.f32 %v3164_v38, %v3208_v50  ;;  %5486 = vst [vmem:[#allocation35_spill] sm:$0xff] %v3350_v0 }
  0x94   : > { %v718_v23 = vadd.f32 %v711_v37, %v702_v48  ;;  %v687_v29 = vmul.f32 %v3210_v53, %v3037_v24  ;;  %732 = vst [vmem:[#allocation2 + $0x31] sm:$0xff] %v724_v36  ;;  %v696_v63 = vmul.f32 %v3216_v59, %v3029_v21  ;;  %v712_v13 = vmul.f32 %v3043_v26, %v3218_v60 }
  0x95   : > { %v676_v62 = vadd.f32 %v668_v43, %v622_v3  ;;  %v651_v58 = vadd.f32 %v643_v30, %v633_v41  ;;  %v623_v46 = vadd.f32 %v616_v8, %v607_v55  ;;  %v592_v37 = vmul.f32 %v3224_v17, %v3149_v9  ;;  %v3361_v41 = vld [vmem:[%s2968_s30 + $0x80] sm:$0xff] }
  0x96   : > { %v601_v39 = vmul.f32 %v3226_v18, %v3133_v51  ;;  %v617_v3 = vmul.f32 %v3164_v38, %v3228_v19  ;;  %v703_v36 = vadd.f32 %v696_v63, %v687_v29  ;;  %v634_v43 = vmul.f32 %v3198_v42, %v3037_v24  ;;  %5487 = vst [vmem:[#allocation36_spill] sm:$0xff] %v3361_v41  ;;  %v3376_v63 = vld [vmem:[#allocation2 + $0x50] sm:$0xff]  ;;  %v3426_v42 = vld [vmem:[#allocation6 + $0x8] sm:$0xff] }
  0x97   : > { %v725_v48 = vadd.f32 %v718_v23, %v676_v62  ;;  %v669_v57 = vadd.f32 %v661_v47, %v651_v58  ;;  %v644_v30 = vmul.f32 %v3200_v44, %v3029_v21  ;;  %v662_v55 = vmul.f32 %v3043_v26, %v3208_v50  ;;  %v3374_v58 = vld [vmem:[%s2968_s30 + $0x88] sm:$0xff]  ;;  %5488 = vst [vmem:[#allocation37_spill] sm:$0xff] %v3376_v63 }
  0x98   : > { %v608_v8 = vadd.f32 %v601_v39, %v592_v37  ;;  %v688_v18 = vmul.f32 %v3210_v53, %v3040_v25  ;;  %v719_v47 = vadd.f32 %v712_v13, %v703_v36  ;;  %v697_v29 = vmul.f32 %v3216_v59, %v3032_v22  ;;  %v5489_v59 = vld [vmem:[#allocation15_spill] sm:$0xff]  ;;  %v3424_v44 = vld [vmem:[#allocation6 + $0xc8] sm:$0xff] }
  0x99   : > { %733 = vst [vmem:[#allocation2 + $0x41] sm:$0xff] %v725_v48  ;;  %v677_v23 = vadd.f32 %v669_v57, %v623_v46  ;;  %v713_v62 = vmul.f32 %v3046_v27, %v3218_v60  ;;  %v652_v39 = vadd.f32 %v644_v30, %v634_v43  ;;  %v850_v19 = vadd.f32 %v3016_v15, %v3012_v14  ;;  %v3383_v46 = vld [vmem:[%s2968_s30 + $0xb0] sm:$0xff]  ;;  %v3390_v60 = vld [vmem:[%s2968_s30 + $0xb8] sm:$0xff]  ;;  %v3398_v30 = vld [vmem:[#allocation6 + $0x20] sm:$0xff] }
  0x9a   : > { %v624_v37 = vadd.f32 %v617_v3, %v608_v8  ;;  %v859_v48 = vmul.f32 %v3361_v41, %v3002_v10  ;;  %v704_v57 = vadd.f32 %v697_v29, %v688_v18  ;;  %v884_v36 = vmul.f32 %v3004_v11, %v2982_v2  ;;  %v3396_v8 = vld [vmem:[#allocation8] sm:$0xff]  ;;  %v3406_v29 = vld [vmem:[#allocation6 + $0xb0] sm:$0xff]  ;;  %5492 = vst [vmem:[#allocation39_spill] sm:$0xff] %v3424_v44  ;;  %v737_v9 = vld [vmem:[#allocation2 + $0x2] sm:$0xff] }
  0x9b   : > { %v726_v13 = vadd.f32 %v719_v47, %v677_v23  ;;  %v892_v17 = vmul.f32 %v2994_v6, %v3006_v12  ;;  %v670_v3 = vadd.f32 %v662_v55, %v652_v39  ;;  %v907_v14 = vmul.f32 %v3374_v58, %v3026_v20 }
  0x9c   : > { %v867_v43 = vadd.f32 %v859_v48, %v850_v19  ;;  %v801_v15 = vmul.f32 %v3048_v28, %v3029_v21  ;;  %v720_v18 = vadd.f32 %v713_v62, %v704_v57  ;;  %v809_v47 = vmul.f32 %v3043_v26, %v3052_v32  ;;  %v3404_v19 = vld [vmem:[#allocation6 + $0x68] sm:$0xff]  ;;  %v3414_v62 = vld [vmem:[#allocation6 + $0x38] sm:$0xff]  ;;  %v3418_v57 = vld [vmem:[#allocation2 + $0x60] sm:$0xff] }
  0x9d   : > { %734 = vst [vmem:[#allocation2 + $0x51] sm:$0xff] %v726_v13  ;;  %v899_v23 = vadd.f32 %v892_v17, %v884_v36  ;;  %v824_v55 = vmul.f32 %v3383_v46, %v3054_v33  ;;  %v678_v39 = vadd.f32 %v670_v3, %v624_v37  ;;  %v840_v48 = vmul.f32 %v2996_v7, %v3032_v22  ;;  %v3416_v13 = vld [vmem:[#allocation6 + $0x80] sm:$0xff] }
  0x9e   : > { %v849_v53 = vmul.f32 %v3046_v27, %v5489_v59  ;;  %v866_v17 = vmul.f32 %v3390_v60, %v3002_v10  ;;  %5490 = vst [vmem:[#allocation15_spill] sm:$0xff] %v3416_v13  ;;  %5491 = vst [vmem:[#allocation38_spill] sm:$0xff] %v3418_v57  ;;  %v816_v50 = vadd.f32 %v809_v47, %v801_v15  ;;  %v5493_v57 = vld [vmem:[#allocation13_spill] sm:$0xff]  ;;  %v3432_v15 = vld [vmem:[#allocation6 + $0x50] sm:$0xff] }
  0x9f   : > { %v914_v36 = vadd.f32 %v907_v14, %v899_v23  ;;  %v258_v37 = vadd.f32 %v2979_v1, %v3396_v8  ;;  %v476_v3 = vmul.f32 %v3398_v30, %v2988_v4  ;;  %v727_v63 = vadd.f32 %v720_v18, %v678_v39  ;;  %v3434_v23 = vld [vmem:[#allocation6 + $0x98] sm:$0xff] }
  0xa0   : > { %v857_v0 = vadd.f32 %v849_v53, %v840_v48  ;;  %v486_v40 = vmul.f32 %v3404_v19, %v2979_v1  ;;  %v504_v14 = vmul.f32 %v5493_v57, %v3406_v29  ;;  %v831_v45 = vadd.f32 %v824_v55, %v816_v50  ;;  %v744_v4 = vld [vmem:[#allocation2 + $0x72] sm:$0xff] }
  0xa1   : > { %v921_v47 = vadd.f32 %v914_v36, %v867_v43  ;;  %v425_v61 = vadd.f32 %v3256_v34, %v258_v37  ;;  %v530_v54 = vmul.f32 %v3414_v62, %v2991_v5  ;;  %735 = vst [vmem:[#allocation2 + $0x61] sm:$0xff] %v727_v63  ;;  %v539_v39 = vmul.f32 %v3416_v13, %v2982_v2  ;;  %v5494_v36 = vld [vmem:[#allocation31_spill] sm:$0xff] }
  0xa2   : > { %v874_v18 = vadd.f32 %v866_v17, %v857_v0  ;;  %v494_v53 = vadd.f32 %v486_v40, %v476_v3  ;;  %v555_v48 = vmul.f32 %v2994_v6, %v3424_v44  ;;  %v265_v43 = vadd.f32 %v3032_v22, %v3396_v8 }
  0xa3   : > { %929 = vst [vmem:[#allocation2 + $0x1] sm:$0xff] %v921_v47  ;;  %v441_v50 = vmul.f32 %v3426_v42, %v3037_v24  ;;  %v450_v34 = vmul.f32 %v3432_v15, %v3029_v21  ;;  %v466_v40 = vmul.f32 %v3043_v26, %v3434_v23  ;;  %v546_v55 = vadd.f32 %v539_v39, %v530_v54 }
  0xa4   : > { %v882_v0 = vadd.f32 %v874_v18, %v831_v45  ;;  %v512_v63 = vadd.f32 %v504_v14, %v494_v53  ;;  %v483_v17 = vmul.f32 %v3398_v30, %v3040_v25  ;;  %v432_v37 = vadd.f32 %v5494_v36, %v265_v43 }
  0xa5   : > { %v457_v3 = vadd.f32 %v450_v34, %v441_v50  ;;  %v493_v47 = vmul.f32 %v3404_v19, %v3032_v22  ;;  %v511_v24 = vmul.f32 %v3046_v27, %v3406_v29  ;;  %v562_v44 = vadd.f32 %v555_v48, %v546_v55  ;;  %v3469_v34 = vld [vmem:[%s2968_s30 + $0x90] sm:$0xff] }
  0xa6   : > { %936 = vst [vmem:[#allocation2 + $0x71] sm:$0xff] %v882_v0  ;;  %v795_v45 = vmul.f32 %v3048_v28, %v2979_v1  ;;  %v803_v54 = vmul.f32 %v5493_v57, %v3052_v32  ;;  %v818_v14 = vmul.f32 %v3361_v41, %v3054_v33  ;;  %v834_v39 = vmul.f32 %v2996_v7, %v2982_v2 }
  0xa7   : > { %v473_v18 = vadd.f32 %v466_v40, %v457_v3  ;;  %v501_v53 = vadd.f32 %v493_v47, %v483_v17  ;;  %v843_v43 = vmul.f32 %v2994_v6, %v5489_v59  ;;  %v569_v50 = vadd.f32 %v562_v44, %v512_v63 }
  0xa8   : > { %v810_v48 = vadd.f32 %v803_v54, %v795_v45  ;;  %v860_v0 = vmul.f32 %v3374_v58, %v3002_v10  ;;  %v885_v55 = vmul.f32 %v3004_v11, %v3059_v35  ;;  %v893_v40 = vmul.f32 %v3088_v56, %v3006_v12 }
  0xa9   : > { %v519_v36 = vadd.f32 %v511_v24, %v501_v53  ;;  %v851_v41 = vadd.f32 %v843_v43, %v834_v39  ;;  %v908_v17 = vmul.f32 %v3469_v34, %v3026_v20  ;;  %v577_v3 = vadd.f32 %v569_v50, %v425_v61 }
  0xaa   : > { %v825_v44 = vadd.f32 %v818_v14, %v810_v48  ;;  %v796_v63 = vmul.f32 %v3048_v28, %v2982_v2  ;;  %v804_v47 = vmul.f32 %v2994_v6, %v3052_v32  ;;  %v900_v24 = vadd.f32 %v893_v40, %v885_v55 }
  0xab   : > { %v527_v45 = vadd.f32 %v519_v36, %v473_v18  ;;  %v868_v54 = vadd.f32 %v860_v0, %v851_v41  ;;  %v819_v53 = vmul.f32 %v3374_v58, %v3054_v33  ;;  %v745_v39 = vadd.f32 %v737_v9, %v577_v3  ;;  %v3496_v9 = vld [vmem:[#allocation2 + $0x12] sm:$0xff] }
  0xac   : > { %v811_v43 = vadd.f32 %v804_v47, %v796_v63  ;;  %v835_v61 = vmul.f32 %v2996_v7, %v3059_v35  ;;  %v844_v14 = vmul.f32 %v3088_v56, %v5489_v59  ;;  %v915_v25 = vadd.f32 %v908_v17, %v900_v24  ;;  %v3499_v41 = vld [vmem:[%s2968_s30 + $0x98] sm:$0xff] }
  0xad   : > { %v584_v50 = vadd.f32 %v527_v45, %v432_v37  ;;  %v876_v48 = vadd.f32 %v868_v54, %v825_v44  ;;  %v861_v13 = vmul.f32 %v3469_v34, %v3002_v10  ;;  %753 = vst [vmem:[%s3493_s18] sm:$0xff] %v745_v39  ;;  %v886_v37 = vmul.f32 %v3004_v11, %v3081_v49  ;;  %v3523_v39 = vld [vmem:[%s2968_s30 + $0xa0] sm:$0xff] }
  0xae   : > { %v826_v18 = vadd.f32 %v819_v53, %v811_v43  ;;  %v852_v0 = vadd.f32 %v844_v14, %v835_v61  ;;  %v894_v55 = vmul.f32 %v3113_v31, %v3006_v12  ;;  %v909_v17 = vmul.f32 %v3499_v41, %v3026_v20  ;;  %v3527_v14 = vld [vmem:[#allocation2 + $0x22] sm:$0xff] }
  0xaf   : > { %v752_v36 = vadd.f32 %v744_v4, %v584_v50  ;;  %v922_v40 = vadd.f32 %v915_v25, %v876_v48  ;;  %v797_v3 = vmul.f32 %v3048_v28, %v3059_v35  ;;  %v805_v47 = vmul.f32 %v3088_v56, %v3052_v32 }
  0xb0   : > { %v869_v44 = vadd.f32 %v861_v13, %v852_v0  ;;  %v901_v63 = vadd.f32 %v894_v55, %v886_v37  ;;  %v820_v45 = vmul.f32 %v3469_v34, %v3054_v33  ;;  %v836_v4 = vmul.f32 %v2996_v7, %v3081_v49 }
  0xb1   : > { %760 = vst [vmem:[%s3493_s18 + $0x38] sm:$0xff] %v752_v36  ;;  %930 = vst [vmem:[#allocation2 + $0x11] sm:$0xff] %v922_v40  ;;  %v845_v25 = vmul.f32 %v3113_v31, %v5489_v59  ;;  %v862_v54 = vmul.f32 %v3499_v41, %v3002_v10  ;;  %v887_v13 = vmul.f32 %v3004_v11, %v3102_v16 }
  0xb2   : > { %v877_v24 = vadd.f32 %v869_v44, %v826_v18  ;;  %v916_v53 = vadd.f32 %v909_v17, %v901_v63  ;;  %v812_v43 = vadd.f32 %v805_v47, %v797_v3  ;;  %v895_v61 = vmul.f32 %v3136_v52, %v3006_v12 }
  0xb3   : > { %v853_v50 = vadd.f32 %v845_v25, %v836_v4  ;;  %v910_v48 = vmul.f32 %v3523_v39, %v3026_v20  ;;  %v798_v0 = vmul.f32 %v3048_v28, %v3081_v49  ;;  %v806_v18 = vmul.f32 %v3113_v31, %v3052_v32  ;;  %v3542_v4 = vld [vmem:[%s2968_s30 + $0xa8] sm:$0xff] }
  0xb4   : > { %v923_v37 = vadd.f32 %v916_v53, %v877_v24  ;;  %v827_v55 = vadd.f32 %v820_v45, %v812_v43  ;;  %v902_v36 = vadd.f32 %v895_v61, %v887_v13  ;;  %v821_v40 = vmul.f32 %v3499_v41, %v3054_v33  ;;  %v3552_v61 = vld [vmem:[#allocation2 + $0x32] sm:$0xff] }
  0xb5   : > { %v870_v17 = vadd.f32 %v862_v54, %v853_v50  ;;  %v813_v3 = vadd.f32 %v806_v18, %v798_v0  ;;  %v837_v44 = vmul.f32 %v2996_v7, %v3102_v16  ;;  %v846_v63 = vmul.f32 %v3136_v52, %v5489_v59 }
  0xb6   : > { %931 = vst [vmem:[#allocation2 + $0x21] sm:$0xff] %v923_v37  ;;  %v917_v47 = vadd.f32 %v910_v48, %v902_v36  ;;  %v863_v25 = vmul.f32 %v3523_v39, %v3002_v10  ;;  %v888_v45 = vmul.f32 %v3004_v11, %v3133_v51  ;;  %v896_v54 = vmul.f32 %v3164_v38, %v3006_v12 }
  0xb7   : > { %v878_v13 = vadd.f32 %v870_v17, %v827_v55  ;;  %v828_v24 = vadd.f32 %v821_v40, %v813_v3  ;;  %v854_v53 = vadd.f32 %v846_v63, %v837_v44  ;;  %v911_v43 = vmul.f32 %v3542_v4, %v3026_v20 }
  0xb8   : > { %v903_v50 = vadd.f32 %v896_v54, %v888_v45  ;;  %v799_v48 = vmul.f32 %v3048_v28, %v3102_v16  ;;  %v807_v0 = vmul.f32 %v3136_v52, %v3052_v32  ;;  %v822_v18 = vmul.f32 %v3523_v39, %v3054_v33 }
  0xb9   : > { %v924_v37 = vadd.f32 %v917_v47, %v878_v13  ;;  %v871_v36 = vadd.f32 %v863_v25, %v854_v53  ;;  %v838_v55 = vmul.f32 %v2996_v7, %v3133_v51  ;;  %v847_v40 = vmul.f32 %v3164_v38, %v5489_v59  ;;  %v3572_v13 = vld [vmem:[#allocation2 + $0x42] sm:$0xff] }
  0xba   : > { %v918_v17 = vadd.f32 %v911_v43, %v903_v50  ;;  %v814_v3 = vadd.f32 %v807_v0, %v799_v48  ;;  %v864_v44 = vmul.f32 %v3542_v4, %v3002_v10  ;;  %v889_v63 = vmul.f32 %v3004_v11, %v3029_v21 }
  0xbb   : > { %932 = vst [vmem:[#allocation2 + $0x31] sm:$0xff] %v924_v37  ;;  %v879_v45 = vadd.f32 %v871_v36, %v828_v24  ;;  %v855_v54 = vadd.f32 %v847_v40, %v838_v55  ;;  %v897_v47 = vmul.f32 %v3043_v26, %v3006_v12  ;;  %v912_v25 = vmul.f32 %v3383_v46, %v3026_v20 }
  0xbc   : > { %v829_v53 = vadd.f32 %v822_v18, %v814_v3  ;;  %v800_v43 = vmul.f32 %v3048_v28, %v3133_v51  ;;  %v808_v50 = vmul.f32 %v3164_v38, %v3052_v32  ;;  %v823_v48 = vmul.f32 %v3542_v4, %v3054_v33 }
  0xbd   : > { %v925_v24 = vadd.f32 %v918_v17, %v879_v45  ;;  %v872_v0 = vadd.f32 %v864_v44, %v855_v54  ;;  %v904_v37 = vadd.f32 %v897_v47, %v889_v63  ;;  %v839_v36 = vmul.f32 %v2996_v7, %v3029_v21  ;;  %v3592_v7 = vld [vmem:[#allocation2 + $0x52] sm:$0xff] }
  0xbe   : > { %v815_v55 = vadd.f32 %v808_v50, %v800_v43  ;;  %v848_v40 = vmul.f32 %v3043_v26, %v5489_v59  ;;  %v865_v18 = vmul.f32 %v3383_v46, %v3002_v10  ;;  %v890_v28 = vmul.f32 %v3004_v11, %v3032_v22  ;;  %v5495_v10 = vld [vmem:[#allocation14_spill] sm:$0xff] }
  0xbf   : > { %933 = vst [vmem:[#allocation2 + $0x41] sm:$0xff] %v925_v24  ;;  %v880_v32 = vadd.f32 %v872_v0, %v829_v53  ;;  %v919_v3 = vadd.f32 %v912_v25, %v904_v37  ;;  %v898_v33 = vmul.f32 %v3046_v27, %v3006_v12  ;;  %v913_v17 = vmul.f32 %v3390_v60, %v3026_v20  ;;  %v5496_v20 = vld [vmem:[#allocation32_spill] sm:$0xff]  ;;  %v5497_v43 = vld [vmem:[#allocation18_spill] sm:$0xff]  ;;  %v5498_v24 = vld [vmem:[#allocation15_spill] sm:$0xff] }
  0xc0   : > { %v830_v21 = vadd.f32 %v823_v48, %v815_v55  ;;  %v856_v44 = vadd.f32 %v848_v40, %v839_v36  ;;  %v259_v26 = vadd.f32 %v2982_v2, %v3396_v8  ;;  %v435_v59 = vmul.f32 %v3426_v42, %v5495_v10  ;;  %v5499_v37 = vld [vmem:[#allocation39_spill] sm:$0xff]  ;;  %v3615_v55 = vld [vmem:[#allocation2 + $0x62] sm:$0xff] }
  0xc1   : > { %v926_v11 = vadd.f32 %v919_v3, %v880_v32  ;;  %v905_v22 = vadd.f32 %v898_v33, %v890_v28  ;;  %v444_v63 = vmul.f32 %v3432_v15, %v2979_v1  ;;  %v460_v12 = vmul.f32 %v5493_v57, %v3434_v23 }
  0xc2   : > { %v873_v27 = vadd.f32 %v865_v18, %v856_v44  ;;  %v426_v45 = vadd.f32 %v5496_v20, %v259_v26  ;;  %v477_v54 = vmul.f32 %v3398_v30, %v2991_v5  ;;  %v487_v47 = vmul.f32 %v3404_v19, %v2982_v2  ;;  %v3622_v18 = vld [vmem:[%s2968_s30 + $0x8] sm:$0xff]  ;;  %v5500_v44 = vld [vmem:[#allocation33_spill] sm:$0xff] }
  0xc3   : > { %934 = vst [vmem:[#allocation2 + $0x51] sm:$0xff] %v926_v11  ;;  %v920_v25 = vadd.f32 %v913_v17, %v905_v22  ;;  %v451_v53 = vadd.f32 %v444_v63, %v435_v59  ;;  %v505_v1 = vmul.f32 %v2994_v6, %v3406_v29  ;;  %v531_v57 = vmul.f32 %v3414_v62, %v5497_v43  ;;  %v3627_v17 = vld [vmem:[%s2968_s30 + $0x48] sm:$0xff] }
  0xc4   : > { %v881_v50 = vadd.f32 %v873_v27, %v830_v21  ;;  %v495_v48 = vadd.f32 %v487_v47, %v477_v54  ;;  %v540_v0 = vmul.f32 %v5498_v24, %v3059_v35  ;;  %v556_v36 = vmul.f32 %v3088_v56, %v5499_v37 }
  0xc5   : > { %v467_v2 = vadd.f32 %v460_v12, %v451_v53  ;;  %v260_v40 = vadd.f32 %v3059_v35, %v3396_v8  ;;  %v436_v6 = vmul.f32 %v3426_v42, %v2991_v5  ;;  %v445_v28 = vmul.f32 %v3622_v18, %v3432_v15  ;;  %v5501_v12 = vld [vmem:[#allocation19_spill] sm:$0xff] }
  0xc6   : > { %v927_v32 = vadd.f32 %v920_v25, %v881_v50  ;;  %v513_v3 = vadd.f32 %v505_v1, %v495_v48  ;;  %v547_v33 = vadd.f32 %v540_v0, %v531_v57  ;;  %v461_v21 = vmul.f32 %v3627_v17, %v3434_v23 }
  0xc7   : > { %v427_v26 = vadd.f32 %v5500_v44, %v260_v40  ;;  %v452_v10 = vadd.f32 %v445_v28, %v436_v6  ;;  %v478_v59 = vmul.f32 %v3398_v30, %v5497_v43  ;;  %v488_v5 = vmul.f32 %v3404_v19, %v3059_v35  ;;  %v5502_v6 = vld [vmem:[#allocation34_spill] sm:$0xff] }
  0xc8   : > { %935 = vst [vmem:[#allocation2 + $0x61] sm:$0xff] %v927_v32  ;;  %v521_v11 = vadd.f32 %v513_v3, %v467_v2  ;;  %v563_v22 = vadd.f32 %v556_v36, %v547_v33  ;;  %v506_v63 = vmul.f32 %v3088_v56, %v3406_v29  ;;  %v532_v27 = vmul.f32 %v3414_v62, %v5501_v12 }
  0xc9   : > { %v468_v20 = vadd.f32 %v461_v21, %v452_v10  ;;  %v496_v54 = vadd.f32 %v488_v5, %v478_v59  ;;  %v541_v47 = vmul.f32 %v5498_v24, %v3081_v49  ;;  %v557_v25 = vmul.f32 %v3113_v31, %v5499_v37  ;;  %v5503_v21 = vld [vmem:[#allocation20_spill] sm:$0xff] }
  0xca   : > { %v570_v53 = vadd.f32 %v563_v22, %v521_v11  ;;  %v261_v1 = vadd.f32 %v3081_v49, %v3396_v8  ;;  %v437_v57 = vmul.f32 %v3426_v42, %v5497_v43  ;;  %v446_v50 = vmul.f32 %v3432_v15, %v3059_v35 }
  0xcb   : > { %v514_v48 = vadd.f32 %v506_v63, %v496_v54  ;;  %v548_v0 = vadd.f32 %v541_v47, %v532_v27  ;;  %v462_v36 = vmul.f32 %v3088_v56, %v3434_v23  ;;  %v479_v2 = vmul.f32 %v3398_v30, %v5501_v12 }
  0xcc   : > { %v578_v40 = vadd.f32 %v570_v53, %v426_v45  ;;  %v428_v28 = vadd.f32 %v5502_v6, %v261_v1  ;;  %v453_v32 = vadd.f32 %v446_v50, %v437_v57  ;;  %v489_v3 = vmul.f32 %v3404_v19, %v3081_v49 }
  0xcd   : > { %v522_v43 = vadd.f32 %v514_v48, %v468_v20  ;;  %v564_v33 = vadd.f32 %v557_v25, %v548_v0  ;;  %v507_v35 = vmul.f32 %v3113_v31, %v3406_v29  ;;  %v533_v56 = vmul.f32 %v3414_v62, %v5503_v21  ;;  %v3672_v20 = vld [vmem:[%s2968_s30 + $0x18] sm:$0xff]  ;;  %v5505_v25 = vld [vmem:[#allocation35_spill] sm:$0xff] }
  0xce   : > { %v746_v44 = vadd.f32 %v3496_v9, %v578_v40  ;;  %v469_v10 = vadd.f32 %v462_v36, %v453_v32  ;;  %v497_v45 = vadd.f32 %v489_v3, %v479_v2  ;;  %v542_v59 = vmul.f32 %v5498_v24, %v3102_v16  ;;  %5504 = vst [vmem:[#allocation13_spill] sm:$0xff] %v3672_v20 }
  0xcf   : > { %v571_v5 = vadd.f32 %v564_v33, %v522_v43  ;;  %v558_v49 = vmul.f32 %v3136_v52, %v5499_v37  ;;  %v262_v11 = vadd.f32 %v3102_v16, %v3396_v8  ;;  %v438_v22 = vmul.f32 %v3426_v42, %v5501_v12 }
  0xd0   : > { %754 = vst [vmem:[%s3493_s18 + $0x8] sm:$0xff] %v746_v44  ;;  %v515_v63 = vadd.f32 %v507_v35, %v497_v45  ;;  %v549_v27 = vadd.f32 %v542_v59, %v533_v56  ;;  %v447_v9 = vmul.f32 %v3672_v20, %v3432_v15  ;;  %v463_v54 = vmul.f32 %v3113_v31, %v3434_v23  ;;  %v3698_v35 = vld [vmem:[%s2968_s30 + $0x20] sm:$0xff] }
  0xd1   : > { %v579_v47 = vadd.f32 %v571_v5, %v427_v26  ;;  %v429_v53 = vadd.f32 %v5505_v25, %v262_v11  ;;  %v480_v1 = vmul.f32 %v3398_v30, %v5503_v21  ;;  %v490_v12 = vmul.f32 %v3404_v19, %v3102_v16  ;;  %v5506_v26 = vld [vmem:[#allocation21_spill] sm:$0xff]  ;;  %5507 = vst [vmem:[#allocation31_spill] sm:$0xff] %v3698_v35 }
  0xd2   : > { %v523_v57 = vadd.f32 %v515_v63, %v469_v10  ;;  %v565_v50 = vadd.f32 %v558_v49, %v549_v27  ;;  %v454_v48 = vadd.f32 %v447_v9, %v438_v22  ;;  %v508_v0 = vmul.f32 %v3136_v52, %v3406_v29  ;;  %v5508_v10 = vld [vmem:[#allocation37_spill] sm:$0xff]  ;;  %v5509_v27 = vld [vmem:[#allocation16_spill] sm:$0xff] }
  0xd3   : > { %v747_v36 = vadd.f32 %v3527_v14, %v579_v47  ;;  %v498_v31 = vadd.f32 %v490_v12, %v480_v1  ;;  %v534_v2 = vmul.f32 %v3414_v62, %v5506_v26  ;;  %v543_v40 = vmul.f32 %v5498_v24, %v3133_v51  ;;  %v3720_v12 = vld [vmem:[%s2968_s30 + $0x70] sm:$0xff] }
  0xd4   : > { %v572_v6 = vadd.f32 %v565_v50, %v523_v57  ;;  %v470_v32 = vadd.f32 %v463_v54, %v454_v48  ;;  %v559_v16 = vmul.f32 %v3164_v38, %v5499_v37  ;;  %v263_v3 = vadd.f32 %v3133_v51, %v3396_v8  ;;  %v3730_v48 = vld [vmem:[%s2968_s30 + $0x28] sm:$0xff] }
  0xd5   : > { %755 = vst [vmem:[%s3493_s18 + $0x10] sm:$0xff] %v747_v36  ;;  %v516_v43 = vadd.f32 %v508_v0, %v498_v31  ;;  %v550_v33 = vadd.f32 %v543_v40, %v534_v2  ;;  %v439_v14 = vmul.f32 %v3426_v42, %v5503_v21  ;;  %v448_v56 = vmul.f32 %v3698_v35, %v3432_v15 }
  0xd6   : > { %v580_v44 = vadd.f32 %v572_v6, %v428_v28  ;;  %v430_v45 = vadd.f32 %v5508_v10, %v263_v3  ;;  %v464_v59 = vmul.f32 %v3136_v52, %v3434_v23  ;;  %v481_v5 = vmul.f32 %v3398_v30, %v5506_v26  ;;  %v3715_v52 = vld [vmem:[%s2968_s30 + $0x30] sm:$0xff]  ;;  %5510 = vst [vmem:[#allocation14_spill] sm:$0xff] %v3730_v48  ;;  %v3747_v10 = vld [vmem:[%s2968_s30 + $0x38] sm:$0xff] }
  0xd7   : > { %v524_v49 = vadd.f32 %v516_v43, %v470_v32  ;;  %v566_v11 = vadd.f32 %v559_v16, %v550_v33  ;;  %v455_v22 = vadd.f32 %v448_v56, %v439_v14  ;;  %v491_v21 = vmul.f32 %v3404_v19, %v3133_v51  ;;  %v5511_v32 = vld [vmem:[#allocation38_spill] sm:$0xff] }
  0xd8   : > { %v748_v63 = vadd.f32 %v3552_v61, %v580_v44  ;;  %v509_v28 = vmul.f32 %v3164_v38, %v3406_v29  ;;  %v535_v9 = vmul.f32 %v3414_v62, %v5509_v27  ;;  %v544_v54 = vmul.f32 %v3715_v52, %v5498_v24 }
  0xd9   : > { %v573_v47 = vadd.f32 %v566_v11, %v524_v49  ;;  %v471_v25 = vadd.f32 %v464_v59, %v455_v22  ;;  %v499_v1 = vadd.f32 %v491_v21, %v481_v5  ;;  %v560_v51 = vmul.f32 %v3720_v12, %v5499_v37  ;;  %v3752_v5 = vld [vmem:[%s2968_s30 + $0x78] sm:$0xff]  ;;  %v3758_v11 = vld [vmem:[%s2968_s30] sm:$0xff]  ;;  %v5513_v22 = vld [vmem:[#allocation22_spill] sm:$0xff] }
  0xda   : > { %756 = vst [vmem:[%s3493_s18 + $0x18] sm:$0xff] %v748_v63  ;;  %v551_v61 = vadd.f32 %v544_v54, %v535_v9  ;;  %v264_v57 = vadd.f32 %v3715_v52, %v3396_v8  ;;  %v440_v50 = vmul.f32 %v3426_v42, %v5506_v26  ;;  %v449_v0 = vmul.f32 %v3730_v48, %v3432_v15  ;;  %v3763_v63 = vld [vmem:[%s2968_s30 + $0x40] sm:$0xff]  ;;  %v5515_v9 = vld [vmem:[#allocation24_spill] sm:$0xff] }
  0xdb   : > { %v581_v36 = vadd.f32 %v573_v47, %v429_v53  ;;  %v517_v31 = vadd.f32 %v509_v28, %v499_v1  ;;  %v465_v2 = vmul.f32 %v3164_v38, %v3434_v23  ;;  %v482_v40 = vmul.f32 %v3398_v30, %v5509_v27  ;;  %v5512_v38 = vld [vmem:[#allocation17_spill] sm:$0xff]  ;;  %v5514_v28 = vld [vmem:[#allocation23_spill] sm:$0xff]  ;;  %v5516_v54 = vld [vmem:[#allocation36_spill] sm:$0xff] }
  0xdc   : > { %v567_v6 = vadd.f32 %v560_v51, %v551_v61  ;;  %v431_v26 = vadd.f32 %v5511_v32, %v264_v57  ;;  %v456_v16 = vadd.f32 %v449_v0, %v440_v50  ;;  %v492_v3 = vmul.f32 %v3715_v52, %v3404_v19  ;;  %v5517_v51 = vld [vmem:[#allocation25_spill] sm:$0xff]  ;;  %v5518_v57 = vld [vmem:[#allocation26_spill] sm:$0xff] }
  0xdd   : > { %v749_v53 = vadd.f32 %v3572_v13, %v581_v36  ;;  %v525_v43 = vadd.f32 %v517_v31, %v471_v25  ;;  %v510_v33 = vmul.f32 %v3720_v12, %v3406_v29  ;;  %v536_v14 = vmul.f32 %v3414_v62, %v5512_v38  ;;  %v5519_v31 = vld [vmem:[#allocation27_spill] sm:$0xff] }
  0xde   : > { %v472_v56 = vadd.f32 %v465_v2, %v456_v16  ;;  %v500_v44 = vadd.f32 %v492_v3, %v482_v40  ;;  %v545_v59 = vmul.f32 %v3747_v10, %v5498_v24  ;;  %v561_v49 = vmul.f32 %v3752_v5, %v5499_v37  ;;  %v5520_v40 = vld [vmem:[#allocation28_spill] sm:$0xff] }
  0xdf   : > { %757 = vst [vmem:[%s3493_s18 + $0x20] sm:$0xff] %v749_v53  ;;  %v574_v13 = vadd.f32 %v567_v6, %v525_v43  ;;  %v1135_v21 = vmul.f32 %v3758_v11, %v5513_v22  ;;  %v1144_v27 = vmul.f32 %v3763_v63, %v5514_v28  ;;  %v1161_v47 = vmul.f32 %v5516_v54, %v5515_v9  ;;  %v5521_v53 = vld [vmem:[#allocation29_spill] sm:$0xff] }
  0xe0   : > { %v518_v25 = vadd.f32 %v510_v33, %v500_v44  ;;  %v552_v1 = vadd.f32 %v545_v59, %v536_v14  ;;  %v1186_v61 = vmul.f32 %v3622_v18, %v5517_v51  ;;  %v1194_v50 = vmul.f32 %v3627_v17, %v5518_v57  ;;  %v5522_v14 = vld [vmem:[#allocation30_spill] sm:$0xff] }
  0xe1   : > { %v582_v0 = vadd.f32 %v574_v13, %v430_v45  ;;  %v1152_v36 = vadd.f32 %v1144_v27, %v1135_v21  ;;  %v1209_v2 = vmul.f32 %v3374_v58, %v5519_v31  ;;  %v1103_v6 = vmul.f32 %v3715_v52, %v5520_v40 }
  0xe2   : > { %v526_v32 = vadd.f32 %v518_v25, %v472_v56  ;;  %v568_v16 = vadd.f32 %v561_v49, %v552_v1  ;;  %v1201_v3 = vadd.f32 %v1194_v50, %v1186_v61  ;;  %v1111_v43 = vmul.f32 %v3720_v12, %v5521_v53  ;;  %v3787_v49 = vld [vmem:[#allocation2] sm:$0xff] }
  0xe3   : > { %v750_v33 = vadd.f32 %v3592_v7, %v582_v0  ;;  %v1169_v38 = vadd.f32 %v1161_v47, %v1152_v36  ;;  %v1126_v45 = vmul.f32 %v3383_v46, %v5522_v14  ;;  %v1142_v44 = vmul.f32 %v3747_v10, %v5513_v22  ;;  %v3797_v0 = vld [vmem:[#allocation6 + $0x28] sm:$0xff] }
  0xe4   : > { %v575_v59 = vadd.f32 %v568_v16, %v526_v32  ;;  %v1216_v13 = vadd.f32 %v1209_v2, %v1201_v3  ;;  %v1118_v21 = vadd.f32 %v1111_v43, %v1103_v6  ;;  %v1151_v56 = vmul.f32 %v3752_v5, %v5514_v28  ;;  %v3801_v2 = vld [vmem:[#allocation6 + $0x70] sm:$0xff] }
  0xe5   : > { %758 = vst [vmem:[%s3493_s18 + $0x28] sm:$0xff] %v750_v33  ;;  %v1168_v27 = vmul.f32 %v3390_v60, %v5515_v9  ;;  %v1097_v7 = vmul.f32 %v3758_v11, %v5520_v40  ;;  %v1105_v47 = vmul.f32 %v3763_v63, %v5521_v53  ;;  %v1120_v22 = vmul.f32 %v5516_v54, %v5522_v14  ;;  %v3809_v3 = vld [vmem:[%s2968_s30 + $0x10] sm:$0xff] }
  0xe6   : > { %v583_v25 = vadd.f32 %v575_v59, %v431_v26  ;;  %v1223_v1 = vadd.f32 %v1216_v13, %v1169_v38  ;;  %v1133_v28 = vadd.f32 %v1126_v45, %v1118_v21  ;;  %v1159_v61 = vadd.f32 %v1151_v56, %v1142_v44  ;;  %v3814_v33 = vld [vmem:[%s2968_s30 + $0x50] sm:$0xff] }
  0xe7   : > { %v1112_v50 = vadd.f32 %v1105_v47, %v1097_v7  ;;  %v1136_v36 = vmul.f32 %v3797_v0, %v3622_v18  ;;  %v1145_v6 = vmul.f32 %v3801_v2, %v3627_v17  ;;  %v1162_v32 = vmul.f32 %v3374_v58, %v5515_v9  ;;  %5523 = vst [vmem:[#allocation32_spill] sm:$0xff] %v3814_v33  ;;  %v3818_v45 = vld [vmem:[#allocation2 + $0x70] sm:$0xff]  ;;  %v3833_v7 = vld [vmem:[#allocation6 + $0xb8] sm:$0xff] }
  0xe8   : > { %v751_v26 = vadd.f32 %v3615_v55, %v583_v25  ;;  %1231 = vst [vmem:[#allocation2 + $0x1] sm:$0xff] %v1223_v1  ;;  %v1176_v16 = vadd.f32 %v1168_v27, %v1159_v61  ;;  %v1187_v43 = vmul.f32 %v3809_v3, %v5517_v51  ;;  %v1195_v38 = vmul.f32 %v3814_v33, %v5518_v57  ;;  %v3837_v25 = vld [vmem:[#allocation6 + $0x40] sm:$0xff]  ;;  %v3844_v1 = vld [vmem:[#allocation6 + $0x88] sm:$0xff] }
  0xe9   : > { %v1127_v44 = vadd.f32 %v1120_v22, %v1112_v50  ;;  %v1153_v59 = vadd.f32 %v1145_v6, %v1136_v36  ;;  %v1210_v9 = vmul.f32 %v3469_v34, %v5519_v31  ;;  %v1098_v55 = vmul.f32 %v3622_v18, %v5520_v40  ;;  %v3848_v36 = vld [vmem:[#allocation6 + $0xd0] sm:$0xff] }
  0xea   : > { %759 = vst [vmem:[%s3493_s18 + $0x30] sm:$0xff] %v751_v26  ;;  %v1184_v13 = vadd.f32 %v1176_v16, %v1133_v28  ;;  %v1202_v21 = vadd.f32 %v1195_v38, %v1187_v43  ;;  %v1106_v51 = vmul.f32 %v3627_v17, %v5521_v53  ;;  %v1121_v57 = vmul.f32 %v3374_v58, %v5522_v14  ;;  %v3842_v14 = vld [vmem:[%s2968_s30 + $0x58] sm:$0xff]  ;;  %v3856_v16 = vld [vmem:[#allocation2 + $0x10] sm:$0xff] }
  0xeb   : > { %v1170_v56 = vadd.f32 %v1162_v32, %v1153_v59  ;;  %v1137_v27 = vmul.f32 %v3809_v3, %v3797_v0  ;;  %v1146_v31 = vmul.f32 %v3814_v33, %v3801_v2  ;;  %v1163_v40 = vmul.f32 %v3833_v7, %v3469_v34  ;;  %5524 = vst [vmem:[#allocation18_spill] sm:$0xff] %v3842_v14  ;;  %v3852_v32 = vld [vmem:[#allocation6 + $0x10] sm:$0xff]  ;;  %v2576_v59 = vld [vmem:[#allocation6 + $0x58] sm:$0xff] }
  0xec   : > { %1238 = vst [vmem:[#allocation2 + $0x71] sm:$0xff] %v1184_v13  ;;  %v1217_v47 = vadd.f32 %v1210_v9, %v1202_v21  ;;  %v1113_v22 = vadd.f32 %v1106_v51, %v1098_v55  ;;  %v1188_v53 = vmul.f32 %v3837_v25, %v3672_v20  ;;  %v1196_v28 = vmul.f32 %v3844_v1, %v3842_v14 }
  0xed   : > { %v1178_v61 = vadd.f32 %v1170_v56, %v1127_v44  ;;  %v1154_v50 = vadd.f32 %v1146_v31, %v1137_v27  ;;  %v1211_v6 = vmul.f32 %v3848_v36, %v3499_v41  ;;  %v1099_v26 = vmul.f32 %v3852_v32, %v3809_v3  ;;  %v2577_v44 = vld [vmem:[#allocation6 + $0xa0] sm:$0xff] }
  0xee   : > { %v1128_v43 = vadd.f32 %v1121_v57, %v1113_v22  ;;  %v1203_v38 = vadd.f32 %v1196_v28, %v1188_v53  ;;  %v1107_v9 = vmul.f32 %v2576_v59, %v3814_v33  ;;  %v1122_v55 = vmul.f32 %v2577_v44, %v3469_v34  ;;  %v3869_v33 = vld [vmem:[%s2968_s30 + $0x60] sm:$0xff] }
  0xef   : > { %v1224_v13 = vadd.f32 %v1217_v47, %v1178_v61  ;;  %v1171_v21 = vadd.f32 %v1163_v40, %v1154_v50  ;;  %v1138_v51 = vmul.f32 %v3797_v0, %v3672_v20  ;;  %v1147_v56 = vmul.f32 %v3842_v14, %v3801_v2  ;;  %5525 = vst [vmem:[#allocation15_spill] sm:$0xff] %v3869_v33  ;;  %v3875_v61 = vld [vmem:[#allocation2 + $0x20] sm:$0xff] }
  0xf0   : > { %v1218_v27 = vadd.f32 %v1211_v6, %v1203_v38  ;;  %v1114_v31 = vadd.f32 %v1107_v9, %v1099_v26  ;;  %v1164_v57 = vmul.f32 %v3833_v7, %v3499_v41  ;;  %v1189_v22 = vmul.f32 %v3837_v25, %v3698_v35  ;;  %5526 = vst [vmem:[#allocation39_spill] sm:$0xff] %v3875_v61  ;;  %v3890_v61 = vld [vmem:[%s2968_s30 + $0x68] sm:$0xff] }
  0xf1   : > { %1232 = vst [vmem:[#allocation2 + $0x11] sm:$0xff] %v1224_v13  ;;  %v1179_v53 = vadd.f32 %v1171_v21, %v1128_v43  ;;  %v1155_v28 = vadd.f32 %v1147_v56, %v1138_v51  ;;  %v1197_v40 = vmul.f32 %v3869_v33, %v3844_v1  ;;  %v1212_v47 = vmul.f32 %v3848_v36, %v3523_v39 }
  0xf2   : > { %v1129_v50 = vadd.f32 %v1122_v55, %v1114_v31  ;;  %v1100_v6 = vmul.f32 %v3852_v32, %v3672_v20  ;;  %v1108_v26 = vmul.f32 %v2576_v59, %v3842_v14  ;;  %v1123_v43 = vmul.f32 %v2577_v44, %v3499_v41  ;;  %5527 = vst [vmem:[#allocation33_spill] sm:$0xff] %v3890_v61 }
  0xf3   : > { %v1225_v38 = vadd.f32 %v1218_v27, %v1179_v53  ;;  %v1172_v9 = vadd.f32 %v1164_v57, %v1155_v28  ;;  %v1204_v13 = vadd.f32 %v1197_v40, %v1189_v22  ;;  %v1139_v21 = vmul.f32 %v3797_v0, %v3698_v35  ;;  %v3896_v22 = vld [vmem:[#allocation2 + $0x30] sm:$0xff] }
  0xf4   : > { %v1115_v51 = vadd.f32 %v1108_v26, %v1100_v6  ;;  %v1148_v56 = vmul.f32 %v3869_v33, %v3801_v2  ;;  %v1165_v55 = vmul.f32 %v3833_v7, %v3523_v39  ;;  %v1190_v31 = vmul.f32 %v3837_v25, %v3730_v48  ;;  %5528 = vst [vmem:[#allocation19_spill] sm:$0xff] %v3896_v22 }
  0xf5   : > { %1233 = vst [vmem:[#allocation2 + $0x21] sm:$0xff] %v1225_v38  ;;  %v1180_v14 = vadd.f32 %v1172_v9, %v1129_v50  ;;  %v1219_v20 = vadd.f32 %v1212_v47, %v1204_v13  ;;  %v1198_v27 = vmul.f32 %v3890_v61, %v3844_v1  ;;  %v1213_v57 = vmul.f32 %v3848_v36, %v3542_v4 }
  0xf6   : > { %v1130_v53 = vadd.f32 %v1123_v43, %v1115_v51  ;;  %v1156_v28 = vadd.f32 %v1148_v56, %v1139_v21  ;;  %v1101_v40 = vmul.f32 %v3852_v32, %v3698_v35  ;;  %v1109_v6 = vmul.f32 %v3869_v33, %v2576_v59 }
  0xf7   : > { %v1226_v26 = vadd.f32 %v1219_v20, %v1180_v14  ;;  %v1205_v50 = vadd.f32 %v1198_v27, %v1190_v31  ;;  %v1124_v47 = vmul.f32 %v2577_v44, %v3523_v39  ;;  %v1140_v38 = vmul.f32 %v3797_v0, %v3730_v48 }
  0xf8   : > { %v1173_v9 = vadd.f32 %v1165_v55, %v1156_v28  ;;  %v1116_v13 = vadd.f32 %v1109_v6, %v1101_v40  ;;  %v1149_v22 = vmul.f32 %v3890_v61, %v3801_v2  ;;  %v1166_v43 = vmul.f32 %v3833_v7, %v3542_v4  ;;  %v3917_v28 = vld [vmem:[%s2968_s30 + $0x40] sm:$0xff] }
  0xf9   : > { %1234 = vst [vmem:[#allocation2 + $0x31] sm:$0xff] %v1226_v26  ;;  %v1220_v21 = vadd.f32 %v1213_v57, %v1205_v50  ;;  %v1191_v20 = vmul.f32 %v3837_v25, %v3715_v52  ;;  %v1199_v14 = vmul.f32 %v3844_v1, %v3720_v12  ;;  %v1214_v51 = vmul.f32 %v3848_v36, %v3383_v46  ;;  %v3919_v40 = vld [vmem:[#allocation2 + $0x40] sm:$0xff] }
  0xfa   : > { %v1181_v56 = vadd.f32 %v1173_v9, %v1130_v53  ;;  %v1131_v55 = vadd.f32 %v1124_v47, %v1116_v13  ;;  %v1157_v31 = vadd.f32 %v1149_v22, %v1140_v38  ;;  %v1102_v27 = vmul.f32 %v3852_v32, %v3730_v48  ;;  %5529 = vst [vmem:[#allocation34_spill] sm:$0xff] %v3919_v40  ;;  %v3926_v53 = vld [vmem:[%s2968_s30 + $0x48] sm:$0xff]  ;;  %v3928_v47 = vld [vmem:[#allocation6 + $0x18] sm:$0xff]  ;;  %v3930_v22 = vld [vmem:[#allocation6 + $0x60] sm:$0xff] }
  0xfb   : > { %v1206_v57 = vadd.f32 %v1199_v14, %v1191_v20  ;;  %v1110_v6 = vmul.f32 %v3890_v61, %v2576_v59  ;;  %v1125_v26 = vmul.f32 %v2577_v44, %v3542_v4  ;;  %v1141_v50 = vmul.f32 %v3797_v0, %v3715_v52  ;;  %5530 = vst [vmem:[#allocation20_spill] sm:$0xff] %v3928_v47  ;;  %v3937_v44 = vld [vmem:[%s2968_s30 + $0xc0] sm:$0xff]  ;;  %v3939_v13 = vld [vmem:[#allocation6 + $0xa8] sm:$0xff]  ;;  %v3941_v0 = vld [vmem:[#allocation6 + $0x30] sm:$0xff] }
  0xfc   : > { %5531 = vst [vmem:[#allocation35_spill] sm:$0xff] %v3930_v22  ;;  %v1227_v32 = vadd.f32 %v1220_v21, %v1181_v56  ;;  %v1174_v38 = vadd.f32 %v1166_v43, %v1157_v31  ;;  %v1150_v9 = vmul.f32 %v3801_v2, %v3720_v12  ;;  %v1167_v59 = vmul.f32 %v3833_v7, %v3383_v46  ;;  %v3948_v2 = vld [vmem:[%s2968_s30 + $0xc8] sm:$0xff]  ;;  %v3950_v56 = vld [vmem:[#allocation6 + $0x78] sm:$0xff]  ;;  %v3952_v7 = vld [vmem:[#allocation6 + $0xc0] sm:$0xff] }
  0xfd   : > { %5532 = vst [vmem:[#allocation21_spill] sm:$0xff] %v3939_v13  ;;  %5533 = vst [vmem:[#allocation37_spill] sm:$0xff] %v3941_v0  ;;  %v1221_v20 = vadd.f32 %v1214_v51, %v1206_v57  ;;  %v1117_v14 = vadd.f32 %v1110_v6, %v1102_v27  ;;  %v1192_v21 = vmul.f32 %v3837_v25, %v3747_v10  ;;  %v3959_v25 = vld [vmem:[%s2968_s30 + $0x70] sm:$0xff]  ;;  %v3964_v27 = vld [vmem:[#allocation6] sm:$0xff] }
  0xfe   : > { %v1200_v43 = vmul.f32 %v3844_v1, %v3752_v5  ;;  %5534 = vst [vmem:[#allocation16_spill] sm:$0xff] %v3950_v56  ;;  %5535 = vst [vmem:[#allocation38_spill] sm:$0xff] %v3952_v7  ;;  %v1182_v31 = vadd.f32 %v1174_v38, %v1131_v55  ;;  %v1158_v61 = vadd.f32 %v1150_v9, %v1141_v50  ;;  %v3962_v1 = vld [vmem:[%s2968_s30 + $0xf0] sm:$0xff]  ;;  %v3972_v50 = vld [vmem:[#allocation6 + $0x48] sm:$0xff] }
  0xff   : > { %1235 = vst [vmem:[#allocation2 + $0x41] sm:$0xff] %v1227_v32  ;;  %v1215_v48 = vmul.f32 %v3848_v36, %v3390_v60  ;;  %v1336_v51 = vmul.f32 %v3917_v28, %v3928_v47  ;;  %5536 = vst [vmem:[#allocation17_spill] sm:$0xff] %v3964_v27  ;;  %v3966_v57 = vld [vmem:[#allocation2 + $0x50] sm:$0xff]  ;;  %v1132_v6 = vadd.f32 %v1125_v26, %v1117_v14  ;;  %v3981_v26 = vld [vmem:[%s2968_s30 + $0x78] sm:$0xff] }
 0x100   : > { %5537 = vst [vmem:[#allocation22_spill] sm:$0xff] %v3966_v57  ;;  %v1207_v32 = vadd.f32 %v1200_v43, %v1192_v21  ;;  %v1345_v55 = vmul.f32 %v5516_v54, %v3930_v22  ;;  %v1362_v36 = vmul.f32 %v3937_v44, %v3939_v13  ;;  %5538 = vst [vmem:[#allocation23_spill] sm:$0xff] %v3972_v50  ;;  %v3974_v38 = vld [vmem:[#allocation6 + $0x90] sm:$0xff]  ;;  %v3984_v14 = vld [vmem:[%s2968_s30 + $0xf8] sm:$0xff] }
 0x101   : > { %5539 = vst [vmem:[#allocation24_spill] sm:$0xff] %v3974_v38  ;;  %v1228_v9 = vadd.f32 %v1221_v20, %v1182_v31  ;;  %v1175_v40 = vadd.f32 %v1167_v59, %v1158_v61  ;;  %v1387_v33 = vmul.f32 %v3926_v53, %v3941_v0  ;;  %v1395_v57 = vmul.f32 %v3374_v58, %v3950_v56  ;;  %v3994_v31 = vld [vmem:[#allocation2 + $0x60] sm:$0xff] }
 0x102   : > { %v1222_v54 = vadd.f32 %v1215_v48, %v1207_v32  ;;  %v1353_v21 = vadd.f32 %v1345_v55, %v1336_v51  ;;  %v1410_v43 = vmul.f32 %v3948_v2, %v3952_v7  ;;  %v1304_v35 = vmul.f32 %v3959_v25, %v3964_v27  ;;  %5540 = vst [vmem:[#allocation36_spill] sm:$0xff] %v3994_v31  ;;  %v1239_v55 = vld [vmem:[#allocation2 + $0x2] sm:$0xff] }
 0x103   : > { %1236 = vst [vmem:[#allocation2 + $0x51] sm:$0xff] %v1228_v9  ;;  %v1183_v61 = vadd.f32 %v1175_v40, %v1132_v6  ;;  %v1402_v59 = vadd.f32 %v1395_v57, %v1387_v33  ;;  %v1312_v20 = vmul.f32 %v3383_v46, %v3972_v50  ;;  %v1327_v58 = vmul.f32 %v3962_v1, %v3974_v38  ;;  %v4009_v31 = vld [vmem:[%s2968_s30 + $0x80] sm:$0xff] }
 0x104   : > { %v1370_v48 = vadd.f32 %v1362_v36, %v1353_v21  ;;  %v1343_v51 = vmul.f32 %v3981_v26, %v3928_v47  ;;  %v1352_v32 = vmul.f32 %v3390_v60, %v3930_v22  ;;  %v1369_v40 = vmul.f32 %v3984_v14, %v3939_v13 }
 0x105   : > { %v1229_v33 = vadd.f32 %v1222_v54, %v1183_v61  ;;  %v1417_v57 = vadd.f32 %v1410_v43, %v1402_v59  ;;  %v1319_v6 = vadd.f32 %v1312_v20, %v1304_v35  ;;  %v786_v46 = vadd.f32 %v3763_v63, %v3396_v8 }
 0x106   : > { %v1360_v9 = vadd.f32 %v1352_v32, %v1343_v51  ;;  %v992_v36 = vmul.f32 %v3758_v11, %v3398_v30  ;;  %v1001_v21 = vmul.f32 %v3763_v63, %v3404_v19  ;;  %v1018_v60 = vmul.f32 %v4009_v31, %v3406_v29  ;;  %v4019_v51 = vld [vmem:[%s2968_s30 + $0x88] sm:$0xff] }
 0x107   : > { %1237 = vst [vmem:[#allocation2 + $0x61] sm:$0xff] %v1229_v33  ;;  %v1424_v35 = vadd.f32 %v1417_v57, %v1370_v48  ;;  %v1334_v54 = vadd.f32 %v1327_v58, %v1319_v6  ;;  %v945_v43 = vadd.f32 %v3787_v49, %v786_v46  ;;  %v1043_v61 = vmul.f32 %v3622_v18, %v3414_v62  ;;  %v1246_v33 = vld [vmem:[#allocation2 + $0x72] sm:$0xff]  ;;  %v4034_v6 = vld [vmem:[#allocation6 + $0x20] sm:$0xff] }
 0x108   : > { %v1377_v59 = vadd.f32 %v1369_v40, %v1360_v9  ;;  %v1009_v20 = vadd.f32 %v1001_v21, %v992_v36  ;;  %v1051_v30 = vmul.f32 %v3627_v17, %v5498_v24  ;;  %v1066_v32 = vmul.f32 %v4019_v51, %v5499_v37  ;;  %v4030_v48 = vld [vmem:[%s2968_s30 + $0xb0] sm:$0xff]  ;;  %v4042_v9 = vld [vmem:[%s2968_s30 + $0xb8] sm:$0xff] }
 0x109   : > { %1432 = vst [vmem:[#allocation2 + $0x1] sm:$0xff] %v1424_v35  ;;  %v793_v58 = vadd.f32 %v3752_v5, %v3396_v8  ;;  %v960_v49 = vmul.f32 %v3715_v52, %v3426_v42  ;;  %v968_v62 = vmul.f32 %v3720_v12, %v3432_v15  ;;  %v983_v24 = vmul.f32 %v4030_v48, %v3434_v23 }
 0x10a   : > { %v1385_v40 = vadd.f32 %v1377_v59, %v1334_v54  ;;  %v1026_v57 = vadd.f32 %v1018_v60, %v1009_v20  ;;  %v1058_v37 = vadd.f32 %v1051_v30, %v1043_v61  ;;  %v999_v8 = vmul.f32 %v4034_v6, %v3747_v10  ;;  %v4053_v61 = vld [vmem:[%s2968_s30 + $0x50] sm:$0xff] }
 0x10b   : > { %v952_v46 = vadd.f32 %v3818_v45, %v793_v58  ;;  %v975_v42 = vadd.f32 %v968_v62, %v960_v49  ;;  %v1008_v15 = vmul.f32 %v3752_v5, %v3404_v19  ;;  %v1025_v23 = vmul.f32 %v4042_v9, %v3406_v29  ;;  %v4060_v20 = vld [vmem:[%s2968_s30 + $0xd0] sm:$0xff] }
 0x10c   : > { %1439 = vst [vmem:[#allocation2 + $0x71] sm:$0xff] %v1385_v40  ;;  %v1073_v36 = vadd.f32 %v1066_v32, %v1058_v37  ;;  %v1298_v21 = vmul.f32 %v3917_v28, %v3964_v27  ;;  %v1306_v60 = vmul.f32 %v4009_v31, %v3972_v50  ;;  %v1321_v45 = vmul.f32 %v3937_v44, %v3974_v38 }
 0x10d   : > { %v990_v35 = vadd.f32 %v983_v24, %v975_v42  ;;  %v1016_v54 = vadd.f32 %v1008_v15, %v999_v8  ;;  %v1337_v19 = vmul.f32 %v3926_v53, %v3928_v47  ;;  %v1346_v29 = vmul.f32 %v4019_v51, %v3930_v22 }
 0x10e   : > { %v1080_v59 = vadd.f32 %v1073_v36, %v1026_v57  ;;  %v1313_v30 = vadd.f32 %v1306_v60, %v1298_v21  ;;  %v1363_v32 = vmul.f32 %v3948_v2, %v3939_v13  ;;  %v1388_v58 = vmul.f32 %v4053_v61, %v3941_v0 }
 0x10f   : > { %v1033_v49 = vadd.f32 %v1025_v23, %v1016_v54  ;;  %v1354_v62 = vadd.f32 %v1346_v29, %v1337_v19  ;;  %v1396_v24 = vmul.f32 %v3469_v34, %v3950_v56  ;;  %v1411_v40 = vmul.f32 %v4060_v20, %v3952_v7 }
 0x110   : > { %v1088_v37 = vadd.f32 %v1080_v59, %v945_v43  ;;  %v1328_v57 = vadd.f32 %v1321_v45, %v1313_v30  ;;  %v1299_v8 = vmul.f32 %v3926_v53, %v3964_v27  ;;  %v1307_v42 = vmul.f32 %v4019_v51, %v3972_v50  ;;  %v4081_v30 = vld [vmem:[%s2968_s30 + $0x58] sm:$0xff] }
 0x111   : > { %v1041_v15 = vadd.f32 %v1033_v49, %v990_v35  ;;  %v1371_v23 = vadd.f32 %v1363_v32, %v1354_v62  ;;  %v1403_v36 = vadd.f32 %v1396_v24, %v1388_v58  ;;  %v1322_v21 = vmul.f32 %v3948_v2, %v3974_v38  ;;  %5541 = vst [vmem:[#allocation25_spill] sm:$0xff] %v4081_v30  ;;  %v4086_v32 = vld [vmem:[#allocation2 + $0x12] sm:$0xff] }
 0x112   : > { %v1247_v60 = vadd.f32 %v1239_v55, %v1088_v37  ;;  %v1314_v54 = vadd.f32 %v1307_v42, %v1299_v8  ;;  %v1338_v43 = vmul.f32 %v4053_v61, %v3928_v47  ;;  %v1347_v45 = vmul.f32 %v3469_v34, %v3930_v22  ;;  %v4089_v55 = vld [vmem:[%s2968_s30 + $0xd8] sm:$0xff] }
 0x113   : > { %v1095_v19 = vadd.f32 %v1041_v15, %v952_v46  ;;  %v1379_v29 = vadd.f32 %v1371_v23, %v1328_v57  ;;  %v1418_v59 = vadd.f32 %v1411_v40, %v1403_v36  ;;  %v1364_v35 = vmul.f32 %v4060_v20, %v3939_v13  ;;  %v4100_v15 = vld [vmem:[%s2968_s30 + $0x60] sm:$0xff] }
 0x114   : > { %2412 = vst [vmem:[%s3493_s18 + $0x40] sm:$0xff] %v1247_v60  ;;  %v1329_v58 = vadd.f32 %v1322_v21, %v1314_v54  ;;  %v1355_v49 = vadd.f32 %v1347_v45, %v1338_v43  ;;  %v1389_v62 = vmul.f32 %v4081_v30, %v3941_v0  ;;  %v1397_v46 = vmul.f32 %v3499_v41, %v3950_v56  ;;  %v4116_v45 = vld [vmem:[%s2968_s30 + $0xe0] sm:$0xff] }
 0x115   : > { %v1254_v24 = vadd.f32 %v1246_v33, %v1095_v19  ;;  %v1425_v40 = vadd.f32 %v1418_v59, %v1379_v29  ;;  %v1412_v37 = vmul.f32 %v4089_v55, %v3952_v7  ;;  %v1300_v57 = vmul.f32 %v4053_v61, %v3964_v27  ;;  %5542 = vst [vmem:[#allocation26_spill] sm:$0xff] %v4100_v15  ;;  %v4120_v59 = vld [vmem:[#allocation2 + $0x22] sm:$0xff] }
 0x116   : > { %v1372_v8 = vadd.f32 %v1364_v35, %v1355_v49  ;;  %v1404_v42 = vadd.f32 %v1397_v46, %v1389_v62  ;;  %v1308_v23 = vmul.f32 %v3469_v34, %v3972_v50  ;;  %v1323_v36 = vmul.f32 %v4060_v20, %v3974_v38  ;;  %5543 = vst [vmem:[#allocation27_spill] sm:$0xff] %v4116_v45 }
 0x117   : > { %2419 = vst [vmem:[%s3493_s18 + $0x78] sm:$0xff] %v1254_v24  ;;  %1433 = vst [vmem:[#allocation2 + $0x11] sm:$0xff] %v1425_v40  ;;  %v1339_v33 = vmul.f32 %v4081_v30, %v3928_v47  ;;  %v1348_v21 = vmul.f32 %v3499_v41, %v3930_v22  ;;  %v1365_v60 = vmul.f32 %v4089_v55, %v3939_v13 }
 0x118   : > { %v1390_v54 = vmul.f32 %v4100_v15, %v3941_v0  ;;  %v1380_v43 = vadd.f32 %v1372_v8, %v1329_v58  ;;  %v1419_v34 = vadd.f32 %v1412_v37, %v1404_v42  ;;  %v1315_v19 = vadd.f32 %v1308_v23, %v1300_v57  ;;  %v4131_v8 = vld [vmem:[%s2968_s30 + $0x68] sm:$0xff] }
 0x119   : > { %v1398_v29 = vmul.f32 %v3523_v39, %v3950_v56  ;;  %v1356_v35 = vadd.f32 %v1348_v21, %v1339_v33  ;;  %v1413_v49 = vmul.f32 %v4116_v45, %v3952_v7  ;;  %v1301_v62 = vmul.f32 %v4081_v30, %v3964_v27  ;;  %5544 = vst [vmem:[#allocation28_spill] sm:$0xff] %v4131_v8  ;;  %v4138_v30 = vld [vmem:[%s2968_s30 + $0xe8] sm:$0xff] }
 0x11a   : > { %v1309_v58 = vmul.f32 %v3499_v41, %v3972_v50  ;;  %v1426_v46 = vadd.f32 %v1419_v34, %v1380_v43  ;;  %v1330_v24 = vadd.f32 %v1323_v36, %v1315_v19  ;;  %v1324_v37 = vmul.f32 %v4089_v55, %v3974_v38  ;;  %5545 = vst [vmem:[#allocation29_spill] sm:$0xff] %v4138_v30 }
 0x11b   : > { %v1405_v40 = vadd.f32 %v1398_v29, %v1390_v54  ;;  %v1373_v57 = vadd.f32 %v1365_v60, %v1356_v35  ;;  %v1340_v23 = vmul.f32 %v4100_v15, %v3928_v47  ;;  %v1349_v33 = vmul.f32 %v3523_v39, %v3930_v22  ;;  %v4148_v29 = vld [vmem:[#allocation2 + $0x32] sm:$0xff] }
 0x11c   : > { %v1316_v42 = vadd.f32 %v1309_v58, %v1301_v62  ;;  %1434 = vst [vmem:[#allocation2 + $0x21] sm:$0xff] %v1426_v46  ;;  %v1366_v41 = vmul.f32 %v4116_v45, %v3939_v13  ;;  %v1391_v36 = vmul.f32 %v4131_v8, %v3941_v0  ;;  %v1399_v60 = vmul.f32 %v3542_v4, %v3950_v56 }
 0x11d   : > { %v1420_v21 = vadd.f32 %v1413_v49, %v1405_v40  ;;  %v1381_v54 = vadd.f32 %v1373_v57, %v1330_v24  ;;  %v1357_v34 = vadd.f32 %v1349_v33, %v1340_v23  ;;  %v1414_v19 = vmul.f32 %v4138_v30, %v3952_v7 }
 0x11e   : > { %v1331_v43 = vadd.f32 %v1324_v37, %v1316_v42  ;;  %v1406_v35 = vadd.f32 %v1399_v60, %v1391_v36  ;;  %v1302_v49 = vmul.f32 %v4100_v15, %v3964_v27  ;;  %v1310_v62 = vmul.f32 %v3523_v39, %v3972_v50  ;;  %v4168_v60 = vld [vmem:[#allocation2 + $0x42] sm:$0xff] }
 0x11f   : > { %v1325_v58 = vmul.f32 %v4116_v45, %v3974_v38  ;;  %v1427_v46 = vadd.f32 %v1420_v21, %v1381_v54  ;;  %v1374_v40 = vadd.f32 %v1366_v41, %v1357_v34  ;;  %v1341_v24 = vmul.f32 %v4131_v8, %v3928_v47 }
 0x120   : > { %v1350_v37 = vmul.f32 %v3542_v4, %v3930_v22  ;;  %v1421_v57 = vadd.f32 %v1414_v19, %v1406_v35  ;;  %v1317_v42 = vadd.f32 %v1310_v62, %v1302_v49  ;;  %v1367_v23 = vmul.f32 %v4138_v30, %v3939_v13 }
 0x121   : > { %v1392_v33 = vmul.f32 %v3959_v25, %v3941_v0  ;;  %1435 = vst [vmem:[#allocation2 + $0x31] sm:$0xff] %v1427_v46  ;;  %v1382_v39 = vadd.f32 %v1374_v40, %v1331_v43  ;;  %v1400_v21 = vmul.f32 %v4030_v48, %v3950_v56  ;;  %v1415_v41 = vmul.f32 %v3962_v1, %v3952_v7 }
 0x122   : > { %v1358_v36 = vadd.f32 %v1350_v37, %v1341_v24  ;;  %v1332_v54 = vadd.f32 %v1325_v58, %v1317_v42  ;;  %v1303_v34 = vmul.f32 %v4131_v8, %v3964_v27  ;;  %v1311_v19 = vmul.f32 %v3542_v4, %v3972_v50  ;;  %v4221_v50 = vld [vmem:[#allocation6 + $0x80] sm:$0xff]  ;;  %v5546_v27 = vld [vmem:[#allocation32_spill] sm:$0xff] }
 0x123   : > { %v1326_v35 = vmul.f32 %v4138_v30, %v3974_v38  ;;  %v1428_v43 = vadd.f32 %v1421_v57, %v1382_v39  ;;  %v1407_v62 = vadd.f32 %v1400_v21, %v1392_v33  ;;  %v1342_v46 = vmul.f32 %v3959_v25, %v3928_v47  ;;  %v4188_v33 = vld [vmem:[#allocation2 + $0x52] sm:$0xff] }
 0x124   : > { %v1375_v49 = vadd.f32 %v1367_v23, %v1358_v36  ;;  %v1318_v40 = vadd.f32 %v1311_v19, %v1303_v34  ;;  %v1351_v24 = vmul.f32 %v4030_v48, %v3930_v22  ;;  %v1368_v58 = vmul.f32 %v3962_v1, %v3939_v13  ;;  %v4190_v21 = vld [vmem:[#allocation8] sm:$0xff]  ;;  %v4194_v19 = vld [vmem:[#allocation6 + $0x8] sm:$0xff]  ;;  %v5547_v22 = vld [vmem:[#allocation39_spill] sm:$0xff] }
 0x125   : > { %v1393_v37 = vmul.f32 %v3981_v26, %v3941_v0  ;;  %1436 = vst [vmem:[#allocation2 + $0x41] sm:$0xff] %v1428_v43  ;;  %v1422_v42 = vadd.f32 %v1415_v41, %v1407_v62  ;;  %v1401_v57 = vmul.f32 %v4042_v9, %v3950_v56  ;;  %v1416_v23 = vmul.f32 %v3984_v14, %v3952_v7  ;;  %v4202_v38 = vld [vmem:[#allocation6 + $0x98] sm:$0xff] }
 0x126   : > { %v1383_v4 = vadd.f32 %v1375_v49, %v1332_v54  ;;  %v1333_v39 = vadd.f32 %v1326_v35, %v1318_v40  ;;  %v1359_v36 = vadd.f32 %v1351_v24, %v1342_v46  ;;  %v787_v34 = vadd.f32 %v4190_v21, %v3627_v17  ;;  %v4198_v49 = vld [vmem:[#allocation6 + $0x50] sm:$0xff] }
 0x127   : > { %v954_v41 = vmul.f32 %v4194_v19, %v3758_v11  ;;  %v1408_v43 = vadd.f32 %v1401_v57, %v1393_v37  ;;  %v962_v62 = vmul.f32 %v4198_v49, %v3763_v63  ;;  %v977_v35 = vmul.f32 %v4202_v38, %v4009_v31  ;;  %v4209_v11 = vld [vmem:[#allocation6 + $0x68] sm:$0xff] }
 0x128   : > { %v1429_v54 = vadd.f32 %v1422_v42, %v1383_v4  ;;  %v1376_v46 = vadd.f32 %v1368_v58, %v1359_v36  ;;  %v946_v40 = vadd.f32 %v3856_v16, %v787_v34  ;;  %v993_v24 = vmul.f32 %v4034_v6, %v3622_v18  ;;  %v4213_v42 = vld [vmem:[#allocation6 + $0xb0] sm:$0xff]  ;;  %v4217_v58 = vld [vmem:[#allocation6 + $0x38] sm:$0xff] }
 0x129   : > { %v1002_v37 = vmul.f32 %v4209_v11, %v3627_v17  ;;  %v1423_v4 = vadd.f32 %v1416_v23, %v1408_v43  ;;  %v969_v63 = vadd.f32 %v962_v62, %v954_v41  ;;  %v1019_v57 = vmul.f32 %v4213_v42, %v4019_v51  ;;  %v4228_v23 = vld [vmem:[%s2968_s30 + $0x90] sm:$0xff]  ;;  %v4232_v43 = vld [vmem:[#allocation2 + $0x62] sm:$0xff] }
 0x12a   : > { %1437 = vst [vmem:[#allocation2 + $0x51] sm:$0xff] %v1429_v54  ;;  %v1044_v16 = vmul.f32 %v4217_v58, %v3809_v3  ;;  %v1384_v36 = vadd.f32 %v1376_v46, %v1333_v39  ;;  %v1052_v7 = vmul.f32 %v4221_v50, %v5546_v27  ;;  %v4225_v54 = vld [vmem:[#allocation6 + $0xc8] sm:$0xff]  ;;  %v788_v56 = vadd.f32 %v4190_v21, %v5546_v27 }
 0x12b   : > { %v1010_v34 = vadd.f32 %v1002_v37, %v993_v24  ;;  %v1067_v41 = vmul.f32 %v4228_v23, %v4225_v54  ;;  %v984_v62 = vadd.f32 %v977_v35, %v969_v63  ;;  %v955_v39 = vmul.f32 %v4194_v19, %v3622_v18 }
 0x12c   : > { %v963_v46 = vmul.f32 %v4198_v49, %v3627_v17  ;;  %v1430_v24 = vadd.f32 %v1423_v4, %v1384_v36  ;;  %v1059_v0 = vadd.f32 %v1052_v7, %v1044_v16  ;;  %v978_v13 = vmul.f32 %v4202_v38, %v4019_v51  ;;  %v5548_v4 = vld [vmem:[#allocation13_spill] sm:$0xff]  ;;  %v5549_v36 = vld [vmem:[#allocation18_spill] sm:$0xff] }
 0x12d   : > { %v1027_v37 = vadd.f32 %v1019_v57, %v1010_v34  ;;  %v947_v47 = vadd.f32 %v5547_v22, %v788_v56  ;;  %v994_v35 = vmul.f32 %v4034_v6, %v3809_v3  ;;  %v1003_v63 = vmul.f32 %v4209_v11, %v5546_v27  ;;  %v4254_v56 = vld [vmem:[%s2968_s30 + $0x98] sm:$0xff] }
 0x12e   : > { %v970_v30 = vadd.f32 %v963_v46, %v955_v39  ;;  %1438 = vst [vmem:[#allocation2 + $0x61] sm:$0xff] %v1430_v24  ;;  %v1074_v8 = vadd.f32 %v1067_v41, %v1059_v0  ;;  %v1020_v17 = vmul.f32 %v4228_v23, %v4213_v42  ;;  %v1045_v7 = vmul.f32 %v4217_v58, %v5548_v4 }
 0x12f   : > { %v1035_v18 = vadd.f32 %v1027_v37, %v984_v62  ;;  %v1011_v16 = vadd.f32 %v1003_v63, %v994_v35  ;;  %v1053_v22 = vmul.f32 %v4221_v50, %v5549_v36  ;;  %5550 = vst [vmem:[#allocation30_spill] sm:$0xff] %v4254_v56  ;;  %v1068_v34 = vmul.f32 %v4254_v56, %v4225_v54 }
 0x130   : > { %v985_v57 = vadd.f32 %v978_v13, %v970_v30  ;;  %v789_v0 = vadd.f32 %v4190_v21, %v5549_v36  ;;  %v956_v41 = vmul.f32 %v4194_v19, %v3809_v3  ;;  %v964_v62 = vmul.f32 %v4198_v49, %v5546_v27 }
 0x131   : > { %v1081_v39 = vadd.f32 %v1074_v8, %v1035_v18  ;;  %v1028_v13 = vadd.f32 %v1020_v17, %v1011_v16  ;;  %v1060_v30 = vadd.f32 %v1053_v22, %v1045_v7  ;;  %v979_v46 = vmul.f32 %v4228_v23, %v4202_v38  ;;  %v5551_v8 = vld [vmem:[#allocation19_spill] sm:$0xff] }
 0x132   : > { %v995_v24 = vmul.f32 %v4034_v6, %v5548_v4  ;;  %v948_v35 = vadd.f32 %v5551_v8, %v789_v0  ;;  %v971_v63 = vadd.f32 %v964_v62, %v956_v41  ;;  %v1004_v3 = vmul.f32 %v4209_v11, %v5549_v36  ;;  %v5552_v17 = vld [vmem:[#allocation31_spill] sm:$0xff]  ;;  %v4279_v41 = vld [vmem:[%s2968_s30 + $0xa0] sm:$0xff] }
 0x133   : > { %v1089_v37 = vadd.f32 %v1081_v39, %v946_v40  ;;  %v1036_v18 = vadd.f32 %v1028_v13, %v985_v57  ;;  %v1075_v45 = vadd.f32 %v1068_v34, %v1060_v30  ;;  %v1021_v27 = vmul.f32 %v4254_v56, %v4213_v42  ;;  %v5553_v40 = vld [vmem:[#allocation15_spill] sm:$0xff]  ;;  %5554 = vst [vmem:[#allocation32_spill] sm:$0xff] %v4279_v41 }
 0x134   : > { %v1046_v7 = vmul.f32 %v4217_v58, %v5552_v17  ;;  %v986_v22 = vadd.f32 %v979_v46, %v971_v63  ;;  %v1012_v15 = vadd.f32 %v1004_v3, %v995_v24  ;;  %v1054_v39 = vmul.f32 %v4221_v50, %v5553_v40  ;;  %v5555_v24 = vld [vmem:[#allocation34_spill] sm:$0xff] }
 0x135   : > { %v1248_v16 = vadd.f32 %v4086_v32, %v1089_v37  ;;  %v1082_v0 = vadd.f32 %v1075_v45, %v1036_v18  ;;  %v1069_v57 = vmul.f32 %v4279_v41, %v4225_v54  ;;  %v790_v34 = vadd.f32 %v4190_v21, %v5553_v40 }
 0x136   : > { %v957_v62 = vmul.f32 %v4194_v19, %v5548_v4  ;;  %v1029_v13 = vadd.f32 %v1021_v27, %v1012_v15  ;;  %v1061_v32 = vadd.f32 %v1054_v39, %v1046_v7  ;;  %v965_v30 = vmul.f32 %v4198_v49, %v5549_v36  ;;  %v5556_v7 = vld [vmem:[#allocation14_spill] sm:$0xff] }
 0x137   : > { %2413 = vst [vmem:[%s3493_s18 + $0x48] sm:$0xff] %v1248_v16  ;;  %v980_v45 = vmul.f32 %v4254_v56, %v4202_v38  ;;  %v1090_v46 = vadd.f32 %v1082_v0, %v947_v47  ;;  %v949_v37 = vadd.f32 %v5555_v24, %v790_v34  ;;  %v996_v8 = vmul.f32 %v4034_v6, %v5552_v17  ;;  %v5557_v16 = vld [vmem:[#allocation33_spill] sm:$0xff]  ;;  %v4305_v24 = vld [vmem:[%s2968_s30 + $0xa8] sm:$0xff] }
 0x138   : > { %v1005_v4 = vmul.f32 %v4209_v11, %v5553_v40  ;;  %v1037_v63 = vadd.f32 %v1029_v13, %v986_v22  ;;  %v1076_v15 = vadd.f32 %v1069_v57, %v1061_v32  ;;  %v972_v3 = vadd.f32 %v965_v30, %v957_v62  ;;  %5558 = vst [vmem:[#allocation39_spill] sm:$0xff] %v4305_v24 }
 0x139   : > { %v1022_v36 = vmul.f32 %v4279_v41, %v4213_v42  ;;  %v1249_v18 = vadd.f32 %v4120_v59, %v1090_v46  ;;  %v1047_v47 = vmul.f32 %v4217_v58, %v5556_v7  ;;  %v1055_v39 = vmul.f32 %v4221_v50, %v5557_v16  ;;  %v5559_v46 = vld [vmem:[#allocation22_spill] sm:$0xff] }
 0x13a   : > { %v1013_v27 = vadd.f32 %v1005_v4, %v996_v8  ;;  %v1083_v0 = vadd.f32 %v1076_v15, %v1037_v63  ;;  %v987_v34 = vadd.f32 %v980_v45, %v972_v3  ;;  %v1070_v22 = vmul.f32 %v4305_v24, %v4225_v54 }
 0x13b   : > { %v791_v57 = vadd.f32 %v4190_v21, %v5557_v16  ;;  %2414 = vst [vmem:[%s3493_s18 + $0x50] sm:$0xff] %v1249_v18  ;;  %v1062_v59 = vadd.f32 %v1055_v39, %v1047_v47  ;;  %v958_v13 = vmul.f32 %v4194_v19, %v5552_v17  ;;  %v966_v32 = vmul.f32 %v4198_v49, %v5553_v40 }
 0x13c   : > { %v1030_v62 = vadd.f32 %v1022_v36, %v1013_v27  ;;  %v1091_v30 = vadd.f32 %v1083_v0, %v948_v35  ;;  %v981_v8 = vmul.f32 %v4279_v41, %v4202_v38  ;;  %v997_v4 = vmul.f32 %v4034_v6, %v5556_v7 }
 0x13d   : > { %v950_v45 = vadd.f32 %v5559_v46, %v791_v57  ;;  %v1077_v15 = vadd.f32 %v1070_v22, %v1062_v59  ;;  %v973_v3 = vadd.f32 %v966_v32, %v958_v13  ;;  %v1006_v36 = vmul.f32 %v4209_v11, %v5557_v16  ;;  %v5560_v46 = vld [vmem:[#allocation36_spill] sm:$0xff] }
 0x13e   : > { %v1038_v63 = vadd.f32 %v1030_v62, %v987_v34  ;;  %v1250_v17 = vadd.f32 %v4148_v29, %v1091_v30  ;;  %v1023_v35 = vmul.f32 %v4305_v24, %v4213_v42  ;;  %v1048_v40 = vmul.f32 %v4217_v58, %v3715_v52 }
 0x13f   : > { %v1056_v18 = vmul.f32 %v4221_v50, %v3720_v12  ;;  %v988_v47 = vadd.f32 %v981_v8, %v973_v3  ;;  %v1014_v39 = vadd.f32 %v1006_v36, %v997_v4  ;;  %v1071_v0 = vmul.f32 %v4225_v54, %v4030_v48 }
 0x140   : > { %v1084_v27 = vadd.f32 %v1077_v15, %v1038_v63  ;;  %2415 = vst [vmem:[%s3493_s18 + $0x58] sm:$0xff] %v1250_v17  ;;  %v792_v29 = vadd.f32 %v4190_v21, %v3720_v12  ;;  %v959_v22 = vmul.f32 %v4194_v19, %v5556_v7  ;;  %v967_v57 = vmul.f32 %v4198_v49, %v5557_v16  ;;  %v4346_v19 = vld [vmem:[#allocation6 + $0x28] sm:$0xff]  ;;  %v4348_v7 = vld [vmem:[#allocation6 + $0x70] sm:$0xff]  ;;  %v4350_v49 = vld [vmem:[#allocation6 + $0xb8] sm:$0xff] }
 0x141   : > { %v1063_v34 = vadd.f32 %v1056_v18, %v1048_v40  ;;  %v1031_v59 = vadd.f32 %v1023_v35, %v1014_v39  ;;  %v982_v13 = vmul.f32 %v4305_v24, %v4202_v38  ;;  %v998_v32 = vmul.f32 %v4034_v6, %v3715_v52  ;;  %5561 = vst [vmem:[#allocation13_spill] sm:$0xff] %v4346_v19  ;;  %v4357_v16 = vld [vmem:[#allocation6 + $0x40] sm:$0xff]  ;;  %v4359_v15 = vld [vmem:[#allocation6 + $0x88] sm:$0xff]  ;;  %v4367_v17 = vld [vmem:[#allocation6 + $0x10] sm:$0xff] }
 0x142   : > { %v1092_v62 = vadd.f32 %v1084_v27, %v949_v37  ;;  %v951_v8 = vadd.f32 %v5560_v46, %v792_v29  ;;  %v974_v4 = vadd.f32 %v967_v57, %v959_v22  ;;  %v1007_v63 = vmul.f32 %v4209_v11, %v3720_v12  ;;  %5562 = vst [vmem:[#allocation18_spill] sm:$0xff] %v4348_v7  ;;  %v4376_v40 = vld [vmem:[#allocation6 + $0x58] sm:$0xff]  ;;  %v4382_v27 = vld [vmem:[#allocation6 + $0xa0] sm:$0xff] }
 0x143   : > { %v1078_v30 = vadd.f32 %v1071_v0, %v1063_v34  ;;  %5563 = vst [vmem:[#allocation19_spill] sm:$0xff] %v4350_v49  ;;  %v1039_v38 = vadd.f32 %v1031_v59, %v988_v47  ;;  %v1024_v52 = vmul.f32 %v4213_v42, %v4030_v48  ;;  %v1049_v6 = vmul.f32 %v4217_v58, %v3747_v10 }
 0x144   : > { %v1251_v37 = vadd.f32 %v4168_v60, %v1092_v62  ;;  %5564 = vst [vmem:[#allocation31_spill] sm:$0xff] %v4357_v16  ;;  %5565 = vst [vmem:[#allocation15_spill] sm:$0xff] %v4359_v15  ;;  %v989_v12 = vadd.f32 %v982_v13, %v974_v4  ;;  %v1015_v11 = vadd.f32 %v1007_v63, %v998_v32  ;;  %v4365_v60 = vld [vmem:[#allocation6 + $0xd0] sm:$0xff] }
 0x145   : > { %v1057_v3 = vmul.f32 %v4221_v50, %v3752_v5  ;;  %v1072_v36 = vmul.f32 %v4225_v54, %v4042_v9  ;;  %5566 = vst [vmem:[#allocation34_spill] sm:$0xff] %v4365_v60  ;;  %5567 = vst [vmem:[#allocation14_spill] sm:$0xff] %v4367_v17  ;;  %v1085_v42 = vadd.f32 %v1078_v30, %v1039_v38 }
 0x146   : > { %2416 = vst [vmem:[%s3493_s18 + $0x60] sm:$0xff] %v1251_v37  ;;  %v1638_v10 = vmul.f32 %v3917_v28, %v4346_v19  ;;  %v1647_v58 = vmul.f32 %v4009_v31, %v4348_v7  ;;  %v1664_v35 = vmul.f32 %v3937_v44, %v4350_v49  ;;  %5568 = vst [vmem:[#allocation33_spill] sm:$0xff] %v4376_v40  ;;  %v4398_v37 = vld [vmem:[#allocation2] sm:$0xff] }
 0x147   : > { %v1032_v5 = vadd.f32 %v1024_v52, %v1015_v11  ;;  %v1064_v50 = vadd.f32 %v1057_v3, %v1049_v6  ;;  %v1689_v54 = vmul.f32 %v3926_v53, %v4357_v16  ;;  %v1697_v18 = vmul.f32 %v4019_v51, %v4359_v15  ;;  %5569 = vst [vmem:[#allocation22_spill] sm:$0xff] %v4382_v27 }
 0x148   : > { %v1093_v47 = vadd.f32 %v1085_v42, %v950_v45  ;;  %v1655_v39 = vadd.f32 %v1647_v58, %v1638_v10  ;;  %v1712_v0 = vmul.f32 %v3948_v2, %v4365_v60  ;;  %v1606_v34 = vmul.f32 %v3959_v25, %v4367_v17 }
 0x149   : > { %v1040_v29 = vadd.f32 %v1032_v5, %v989_v12  ;;  %v1079_v22 = vadd.f32 %v1072_v36, %v1064_v50  ;;  %v1704_v57 = vadd.f32 %v1697_v18, %v1689_v54  ;;  %v1614_v62 = vmul.f32 %v4030_v48, %v4376_v40  ;;  %v4419_v54 = vld [vmem:[#allocation2 + $0x70] sm:$0xff] }
 0x14a   : > { %v1252_v59 = vadd.f32 %v4188_v33, %v1093_v47  ;;  %v1672_v13 = vadd.f32 %v1664_v35, %v1655_v39  ;;  %v1629_v45 = vmul.f32 %v3962_v1, %v4382_v27  ;;  %v1645_v32 = vmul.f32 %v3981_v26, %v4346_v19 }
 0x14b   : > { %v1086_v30 = vadd.f32 %v1079_v22, %v1040_v29  ;;  %v1719_v46 = vadd.f32 %v1712_v0, %v1704_v57  ;;  %v1621_v4 = vadd.f32 %v1614_v62, %v1606_v34  ;;  %v1654_v63 = vmul.f32 %v4042_v9, %v4348_v7 }
 0x14c   : > { %2417 = vst [vmem:[%s3493_s18 + $0x68] sm:$0xff] %v1252_v59  ;;  %v1671_v38 = vmul.f32 %v3984_v14, %v4350_v49  ;;  %v1600_v33 = vmul.f32 %v3917_v28, %v4367_v17  ;;  %v1608_v52 = vmul.f32 %v4009_v31, %v4376_v40  ;;  %v1623_v6 = vmul.f32 %v3937_v44, %v4382_v27 }
 0x14d   : > { %v1094_v12 = vadd.f32 %v1086_v30, %v951_v8  ;;  %v1726_v11 = vadd.f32 %v1719_v46, %v1672_v13  ;;  %v1636_v3 = vadd.f32 %v1629_v45, %v1621_v4  ;;  %v1662_v36 = vadd.f32 %v1654_v63, %v1645_v32  ;;  %v5570_v32 = vld [vmem:[#allocation25_spill] sm:$0xff] }
 0x14e   : > { %v1615_v42 = vadd.f32 %v1608_v52, %v1600_v33  ;;  %v1639_v10 = vmul.f32 %v3926_v53, %v4346_v19  ;;  %v1648_v58 = vmul.f32 %v4019_v51, %v4348_v7  ;;  %v1665_v28 = vmul.f32 %v3948_v2, %v4350_v49  ;;  %v4444_v52 = vld [vmem:[#allocation2 + $0x10] sm:$0xff] }
 0x14f   : > { %v1253_v35 = vadd.f32 %v4232_v43, %v1094_v12  ;;  %1734 = vst [vmem:[#allocation2 + $0x1] sm:$0xff] %v1726_v11  ;;  %v1679_v5 = vadd.f32 %v1671_v38, %v1662_v36  ;;  %v1690_v8 = vmul.f32 %v4053_v61, %v4357_v16  ;;  %v1698_v50 = vmul.f32 %v4228_v23, %v4359_v15 }
 0x150   : > { %v1630_v18 = vadd.f32 %v1623_v6, %v1615_v42  ;;  %v1656_v47 = vadd.f32 %v1648_v58, %v1639_v10  ;;  %v1713_v39 = vmul.f32 %v4060_v20, %v4365_v60  ;;  %v1601_v0 = vmul.f32 %v3926_v53, %v4367_v17 }
 0x151   : > { %2418 = vst [vmem:[%s3493_s18 + $0x70] sm:$0xff] %v1253_v35  ;;  %v1687_v43 = vadd.f32 %v1679_v5, %v1636_v3  ;;  %v1705_v34 = vadd.f32 %v1698_v50, %v1690_v8  ;;  %v1609_v29 = vmul.f32 %v4019_v51, %v4376_v40  ;;  %v1624_v22 = vmul.f32 %v3948_v2, %v4382_v27  ;;  %v5571_v5 = vld [vmem:[#allocation26_spill] sm:$0xff] }
 0x152   : > { %v1673_v57 = vadd.f32 %v1665_v28, %v1656_v47  ;;  %v1640_v62 = vmul.f32 %v4053_v61, %v4346_v19  ;;  %v1649_v59 = vmul.f32 %v4228_v23, %v4348_v7  ;;  %v1666_v13 = vmul.f32 %v4060_v20, %v4350_v49 }
 0x153   : > { %1741 = vst [vmem:[#allocation2 + $0x71] sm:$0xff] %v1687_v43  ;;  %v1720_v53 = vadd.f32 %v1713_v39, %v1705_v34  ;;  %v1616_v45 = vadd.f32 %v1609_v29, %v1601_v0  ;;  %v1691_v30 = vmul.f32 %v5570_v32, %v4357_v16  ;;  %v1699_v46 = vmul.f32 %v4254_v56, %v4359_v15  ;;  %v5572_v39 = vld [vmem:[#allocation27_spill] sm:$0xff]  ;;  %v4462_v43 = vld [vmem:[#allocation2 + $0x20] sm:$0xff] }
 0x154   : > { %v1681_v4 = vadd.f32 %v1673_v57, %v1630_v18  ;;  %v1657_v63 = vadd.f32 %v1649_v59, %v1640_v62  ;;  %v1714_v38 = vmul.f32 %v4089_v55, %v4365_v60  ;;  %v1602_v33 = vmul.f32 %v4053_v61, %v4367_v17  ;;  %5573 = vst [vmem:[#allocation36_spill] sm:$0xff] %v4462_v43 }
 0x155   : > { %v1631_v6 = vadd.f32 %v1624_v22, %v1616_v45  ;;  %v1706_v12 = vadd.f32 %v1699_v46, %v1691_v30  ;;  %v1610_v11 = vmul.f32 %v4228_v23, %v4376_v40  ;;  %v1625_v3 = vmul.f32 %v4060_v20, %v4382_v27 }
 0x156   : > { %v1727_v36 = vadd.f32 %v1720_v53, %v1681_v4  ;;  %v1674_v42 = vadd.f32 %v1666_v13, %v1657_v63  ;;  %v1641_v10 = vmul.f32 %v5570_v32, %v4346_v19  ;;  %v1650_v58 = vmul.f32 %v4254_v56, %v4348_v7 }
 0x157   : > { %v1721_v28 = vadd.f32 %v1714_v38, %v1706_v12  ;;  %v1617_v61 = vadd.f32 %v1610_v11, %v1602_v33  ;;  %v1667_v35 = vmul.f32 %v4089_v55, %v4350_v49  ;;  %v1692_v8 = vmul.f32 %v5571_v5, %v4357_v16  ;;  %v4482_v11 = vld [vmem:[#allocation2 + $0x30] sm:$0xff] }
 0x158   : > { %1735 = vst [vmem:[#allocation2 + $0x11] sm:$0xff] %v1727_v36  ;;  %v1682_v50 = vadd.f32 %v1674_v42, %v1631_v6  ;;  %v1658_v18 = vadd.f32 %v1650_v58, %v1641_v10  ;;  %v1700_v47 = vmul.f32 %v4279_v41, %v4359_v15  ;;  %v1715_v0 = vmul.f32 %v5572_v39, %v4365_v60  ;;  %v5575_v6 = vld [vmem:[#allocation29_spill] sm:$0xff] }
 0x159   : > { %v1632_v34 = vadd.f32 %v1625_v3, %v1617_v61  ;;  %v1603_v29 = vmul.f32 %v5570_v32, %v4367_v17  ;;  %v1611_v22 = vmul.f32 %v4254_v56, %v4376_v40  ;;  %v1626_v57 = vmul.f32 %v4089_v55, %v4382_v27  ;;  %v5574_v32 = vld [vmem:[#allocation28_spill] sm:$0xff]  ;;  %5576 = vst [vmem:[#allocation25_spill] sm:$0xff] %v4482_v11 }
 0x15a   : > { %v1728_v62 = vadd.f32 %v1721_v28, %v1682_v50  ;;  %v1675_v59 = vadd.f32 %v1667_v35, %v1658_v18  ;;  %v1707_v13 = vadd.f32 %v1700_v47, %v1692_v8  ;;  %v1642_v53 = vmul.f32 %v5571_v5, %v4346_v19 }
 0x15b   : > { %v1618_v45 = vadd.f32 %v1611_v22, %v1603_v29  ;;  %v1651_v30 = vmul.f32 %v4279_v41, %v4348_v7  ;;  %v1668_v46 = vmul.f32 %v5572_v39, %v4350_v49  ;;  %v1693_v4 = vmul.f32 %v5574_v32, %v4357_v16 }
 0x15c   : > { %1736 = vst [vmem:[#allocation2 + $0x21] sm:$0xff] %v1728_v62  ;;  %v1683_v63 = vadd.f32 %v1675_v59, %v1632_v34  ;;  %v1722_v38 = vadd.f32 %v1715_v0, %v1707_v13  ;;  %v1701_v33 = vmul.f32 %v4305_v24, %v4359_v15  ;;  %v1716_v12 = vmul.f32 %v5575_v6, %v4365_v60  ;;  %v4504_v13 = vld [vmem:[#allocation2 + $0x40] sm:$0xff] }
 0x15d   : > { %v1633_v3 = vadd.f32 %v1626_v57, %v1618_v45  ;;  %v1659_v36 = vadd.f32 %v1651_v30, %v1642_v53  ;;  %v1604_v42 = vmul.f32 %v5571_v5, %v4367_v17  ;;  %v1612_v10 = vmul.f32 %v4279_v41, %v4376_v40  ;;  %5577 = vst [vmem:[#allocation26_spill] sm:$0xff] %v4504_v13 }
 0x15e   : > { %v1729_v58 = vadd.f32 %v1722_v38, %v1683_v63  ;;  %v1708_v28 = vadd.f32 %v1701_v33, %v1693_v4  ;;  %v1627_v61 = vmul.f32 %v5572_v39, %v4382_v27  ;;  %v1643_v35 = vmul.f32 %v5574_v32, %v4346_v19  ;;  %v4517_v33 = vld [vmem:[%s2968_s30 + $0x80] sm:$0xff] }
 0x15f   : > { %v1676_v8 = vadd.f32 %v1668_v46, %v1659_v36  ;;  %v1619_v50 = vadd.f32 %v1612_v10, %v1604_v42  ;;  %v1652_v18 = vmul.f32 %v4305_v24, %v4348_v7  ;;  %v1669_v47 = vmul.f32 %v5575_v6, %v4350_v49  ;;  %5578 = vst [vmem:[#allocation27_spill] sm:$0xff] %v4517_v33 }
 0x160   : > { %1737 = vst [vmem:[#allocation2 + $0x31] sm:$0xff] %v1729_v58  ;;  %v1723_v5 = vadd.f32 %v1716_v12, %v1708_v28  ;;  %v1694_v0 = vmul.f32 %v3959_v25, %v4357_v16  ;;  %v1702_v34 = vmul.f32 %v4030_v48, %v4359_v15  ;;  %v1717_v29 = vmul.f32 %v3962_v1, %v4365_v60  ;;  %v4526_v28 = vld [vmem:[%s2968_s30 + $0x88] sm:$0xff] }
 0x161   : > { %v1684_v22 = vadd.f32 %v1676_v8, %v1633_v3  ;;  %v1634_v57 = vadd.f32 %v1627_v61, %v1619_v50  ;;  %v1660_v62 = vadd.f32 %v1652_v18, %v1643_v35  ;;  %v1605_v59 = vmul.f32 %v5574_v32, %v4367_v17  ;;  %v4531_v35 = vld [vmem:[#allocation2 + $0x50] sm:$0xff]  ;;  %v5581_v18 = vld [vmem:[#allocation20_spill] sm:$0xff]  ;;  %v4616_v17 = vld [vmem:[%s2968_s30 + $0x48] sm:$0xff] }
 0x162   : > { %v1709_v53 = vadd.f32 %v1702_v34, %v1694_v0  ;;  %v1613_v45 = vmul.f32 %v4305_v24, %v4376_v40  ;;  %v1628_v30 = vmul.f32 %v5575_v6, %v4382_v27  ;;  %v1644_v46 = vmul.f32 %v3959_v25, %v4346_v19  ;;  %5580 = vst [vmem:[#allocation29_spill] sm:$0xff] %v4531_v35  ;;  %v5582_v34 = vld [vmem:[#allocation35_spill] sm:$0xff] }
 0x163   : > { %v1730_v4 = vadd.f32 %v1723_v5, %v1684_v22  ;;  %v1677_v63 = vadd.f32 %v1669_v47, %v1660_v62  ;;  %v1653_v38 = vmul.f32 %v4030_v48, %v4348_v7  ;;  %v1670_v32 = vmul.f32 %v3962_v1, %v4350_v49  ;;  %v5583_v22 = vld [vmem:[#allocation21_spill] sm:$0xff]  ;;  %v4543_v62 = vld [vmem:[%s2968_s30 + $0xb0] sm:$0xff]  ;;  %v4623_v49 = vld [vmem:[%s2968_s30 + $0xc8] sm:$0xff] }
 0x164   : > { %v1724_v12 = vadd.f32 %v1717_v29, %v1709_v53  ;;  %v1620_v3 = vadd.f32 %v1613_v45, %v1605_v59  ;;  %v1695_v36 = vmul.f32 %v3981_v26, %v4357_v16  ;;  %v1703_v42 = vmul.f32 %v4042_v9, %v4359_v15  ;;  %v4546_v59 = vld [vmem:[%s2968_s30 + $0xb8] sm:$0xff]  ;;  %v5584_v45 = vld [vmem:[#allocation37_spill] sm:$0xff]  ;;  %v4610_v27 = vld [vmem:[#allocation6 + $0x50] sm:$0xff] }
 0x165   : > { %1738 = vst [vmem:[#allocation2 + $0x41] sm:$0xff] %v1730_v4  ;;  %v1685_v25 = vadd.f32 %v1677_v63, %v1634_v57  ;;  %v1661_v10 = vadd.f32 %v1653_v38, %v1644_v46  ;;  %v1718_v58 = vmul.f32 %v3984_v14, %v4365_v60  ;;  %v4529_v61 = vmul.f32 0.0, %v3937_v44  ;;  %v5585_v46 = vld [vmem:[#allocation16_spill] sm:$0xff]  ;;  %v5586_v63 = vld [vmem:[#allocation38_spill] sm:$0xff] }
 0x166   : > { %v1635_v8 = vadd.f32 %v1628_v30, %v1620_v3  ;;  %v1710_v26 = vadd.f32 %v1703_v42, %v1695_v36  ;;  %v4534_v50 = vmul.f32 0.0, %v3948_v2  ;;  %v1838_v47 = vmul.f32 %v4517_v33, %v5581_v18  ;;  %v4560_v36 = vld [vmem:[#allocation6 + $0x20] sm:$0xff]  ;;  %v4568_v18 = vld [vmem:[#allocation6 + $0x18] sm:$0xff] }
 0x167   : > { %5579 = vst [vmem:[#allocation28_spill] sm:$0xff] %v4529_v61  ;;  %v1731_v5 = vadd.f32 %v1724_v12, %v1685_v25  ;;  %v1678_v0 = vadd.f32 %v1670_v32, %v1661_v10  ;;  %v1847_v29 = vmul.f32 %v3937_v44, %v5582_v34  ;;  %v1864_v57 = vmul.f32 %v4529_v61, %v5583_v22  ;;  %v4562_v42 = vld [vmem:[#allocation2 + $0x60] sm:$0xff] }
 0x168   : > { %v1725_v53 = vadd.f32 %v1718_v58, %v1710_v26  ;;  %v1889_v30 = vmul.f32 %v4526_v28, %v5584_v45  ;;  %v1897_v4 = vmul.f32 %v3948_v2, %v5585_v46  ;;  %v1912_v38 = vmul.f32 %v4534_v50, %v5586_v63  ;;  %5587 = vst [vmem:[#allocation20_spill] sm:$0xff] %v4562_v42  ;;  %v5588_v10 = vld [vmem:[#allocation17_spill] sm:$0xff]  ;;  %v5589_v58 = vld [vmem:[#allocation23_spill] sm:$0xff]  ;;  %v4584_v63 = vld [vmem:[#allocation6 + $0xa8] sm:$0xff] }
 0x169   : > { %1739 = vst [vmem:[#allocation2 + $0x51] sm:$0xff] %v1731_v5  ;;  %v1686_v32 = vadd.f32 %v1678_v0, %v1635_v8  ;;  %v1855_v44 = vadd.f32 %v1847_v29, %v1838_v47  ;;  %v4555_v12 = vmul.f32 0.0, %v3962_v1  ;;  %v4558_v3 = vmul.f32 0.0, %v3984_v14  ;;  %v4572_v47 = vld [vmem:[#allocation6 + $0x68] sm:$0xff]  ;;  %v4574_v5 = vld [vmem:[#allocation6 + $0xb0] sm:$0xff]  ;;  %v5590_v29 = vld [vmem:[#allocation24_spill] sm:$0xff] }
 0x16a   : > { %v1904_v25 = vadd.f32 %v1897_v4, %v1889_v30  ;;  %v1806_v2 = vmul.f32 %v4543_v62, %v5588_v10  ;;  %v1814_v26 = vmul.f32 %v3962_v1, %v5589_v58  ;;  %v1845_v8 = vmul.f32 %v4568_v18, %v4546_v59  ;;  %v4578_v45 = vld [vmem:[#allocation6 + $0x60] sm:$0xff]  ;;  %v4582_v30 = vld [vmem:[#allocation6 + $0x38] sm:$0xff]  ;;  %v4594_v10 = vld [vmem:[#allocation6 + $0x8] sm:$0xff] }
 0x16b   : > { %v1732_v0 = vadd.f32 %v1725_v53, %v1686_v32  ;;  %v1872_v34 = vadd.f32 %v1864_v57, %v1855_v44  ;;  %v1829_v22 = vmul.f32 %v4555_v12, %v5590_v29  ;;  %v1854_v1 = vmul.f32 %v4578_v45, %v3984_v14  ;;  %v4590_v32 = vld [vmem:[#allocation6 + $0x80] sm:$0xff]  ;;  %v4592_v44 = vld [vmem:[#allocation6 + $0xc8] sm:$0xff] }
 0x16c   : > { %v1919_v46 = vadd.f32 %v1912_v38, %v1904_v25  ;;  %v1821_v4 = vadd.f32 %v1814_v26, %v1806_v2  ;;  %v1871_v53 = vmul.f32 %v4584_v63, %v4558_v3  ;;  %v1289_v57 = vadd.f32 %v4190_v21, %v4009_v31  ;;  %v4596_v14 = vld [vmem:[#allocation2 + $0x2] sm:$0xff] }
 0x16d   : > { %1740 = vst [vmem:[#allocation2 + $0x61] sm:$0xff] %v1732_v0  ;;  %v1862_v38 = vadd.f32 %v1854_v1, %v1845_v8  ;;  %v4599_v25 = vld [vmem:[%s2968_s30 + $0x40] sm:$0xff]  ;;  %v1504_v58 = vmul.f32 %v4009_v31, %v4572_v47  ;;  %v4612_v0 = vld [vmem:[#allocation6 + $0x98] sm:$0xff]  ;;  %v1546_v31 = vmul.f32 %v4616_v17, %v4582_v30  ;;  %v1554_v16 = vmul.f32 %v4019_v51, %v4590_v32 }
 0x16e   : > { %v1495_v2 = vmul.f32 %v4599_v25, %v4560_v36  ;;  %v4606_v26 = vld [vmem:[%s2968_s30 + $0xc0] sm:$0xff]  ;;  %v1926_v8 = vadd.f32 %v1919_v46, %v1872_v34  ;;  %v1836_v1 = vadd.f32 %v1829_v22, %v1821_v4  ;;  %v1448_v40 = vadd.f32 %v4398_v37, %v1289_v57  ;;  %v4627_v22 = vld [vmem:[#allocation2 + $0x72] sm:$0xff] }
 0x16f   : > { %v1521_v29 = vmul.f32 %v4606_v26, %v4574_v5  ;;  %v1879_v60 = vadd.f32 %v1871_v53, %v1862_v38  ;;  %v1569_v34 = vmul.f32 %v4623_v49, %v4592_v44  ;;  %v1296_v37 = vadd.f32 %v4190_v21, %v4042_v9  ;;  %v4632_v46 = vld [vmem:[%s2968_s30 + $0x70] sm:$0xff] }
 0x170   : > { %v1512_v15 = vadd.f32 %v1504_v58, %v1495_v2  ;;  %1934 = vst [vmem:[#allocation2 + $0x1] sm:$0xff] %v1926_v8  ;;  %5591 = vst [vmem:[#allocation35_spill] sm:$0xff] %v4632_v46  ;;  %v1463_v4 = vmul.f32 %v4632_v46, %v4594_v10  ;;  %v1471_v51 = vmul.f32 %v4030_v48, %v4610_v27  ;;  %v4639_v53 = vld [vmem:[%s2968_s30 + $0xf0] sm:$0xff]  ;;  %v4644_v8 = vld [vmem:[%s2968_s30 + $0x78] sm:$0xff] }
 0x171   : > { %v1486_v57 = vmul.f32 %v4639_v53, %v4612_v0  ;;  %v1887_v38 = vadd.f32 %v1879_v60, %v1836_v1  ;;  %v1561_v58 = vadd.f32 %v1554_v16, %v1546_v31  ;;  %5592 = vst [vmem:[#allocation21_spill] sm:$0xff] %v4644_v8  ;;  %v1502_v7 = vmul.f32 %v4644_v8, %v4560_v36  ;;  %v4652_v48 = vld [vmem:[%s2968_s30 + $0xf8] sm:$0xff]  ;;  %v4659_v60 = vld [vmem:[#allocation6] sm:$0xff] }
 0x172   : > { %v1529_v2 = vadd.f32 %v1521_v29, %v1512_v15  ;;  %v1455_v19 = vadd.f32 %v4419_v54, %v1296_v37  ;;  %v1478_v42 = vadd.f32 %v1471_v51, %v1463_v4  ;;  %v1511_v46 = vmul.f32 %v4042_v9, %v4572_v47  ;;  %v4663_v29 = vld [vmem:[#allocation6 + $0x48] sm:$0xff]  ;;  %v4667_v37 = vld [vmem:[#allocation6 + $0x90] sm:$0xff] }
 0x173   : > { %v1528_v35 = vmul.f32 %v4652_v48, %v4574_v5  ;;  %1941 = vst [vmem:[#allocation2 + $0x71] sm:$0xff] %v1887_v38  ;;  %v1576_v15 = vadd.f32 %v1569_v34, %v1561_v58  ;;  %v4657_v16 = vmul.f32 0.0, %v4060_v20  ;;  %v1800_v54 = vmul.f32 %v4659_v60, %v4517_v33  ;;  %v4674_v38 = vld [vmem:[%s2968_s30 + $0x90] sm:$0xff] }
 0x174   : > { %v1808_v9 = vmul.f32 %v4663_v29, %v4606_v26  ;;  %v1493_v1 = vadd.f32 %v1486_v57, %v1478_v42  ;;  %v1519_v31 = vadd.f32 %v1511_v46, %v1502_v7  ;;  %v1823_v34 = vmul.f32 %v4667_v37, %v4529_v61  ;;  %5594 = vst [vmem:[#allocation16_spill] sm:$0xff] %v4674_v38  ;;  %v4680_v7 = vld [vmem:[#allocation6 + $0x30] sm:$0xff]  ;;  %v4684_v57 = vld [vmem:[#allocation6 + $0x78] sm:$0xff] }
 0x175   : > { %5593 = vst [vmem:[#allocation37_spill] sm:$0xff] %v4657_v16  ;;  %v1839_v4 = vmul.f32 %v4568_v18, %v4526_v28  ;;  %v1583_v51 = vadd.f32 %v1576_v15, %v1529_v2  ;;  %v1848_v33 = vmul.f32 %v4623_v49, %v4578_v45  ;;  %v1865_v8 = vmul.f32 %v4584_v63, %v4534_v50  ;;  %v4688_v15 = vld [vmem:[#allocation6 + $0xc0] sm:$0xff] }
 0x176   : > { %v1815_v58 = vadd.f32 %v1808_v9, %v1800_v54  ;;  %v1536_v42 = vadd.f32 %v1528_v35, %v1519_v31  ;;  %v1890_v46 = vmul.f32 %v4680_v7, %v4674_v38  ;;  %v1898_v2 = vmul.f32 %v4684_v57, %v4060_v20 }
 0x177   : > { %v1913_v54 = vmul.f32 %v4688_v15, %v4657_v16  ;;  %v1591_v9 = vadd.f32 %v1583_v51, %v1448_v40  ;;  %v1856_v35 = vadd.f32 %v1848_v33, %v1839_v4  ;;  %v4693_v31 = vmul.f32 0.0, %v4089_v55  ;;  %v4705_v51 = vld [vmem:[%s2968_s30 + $0x98] sm:$0xff] }
 0x178   : > { %v1830_v61 = vadd.f32 %v1823_v34, %v1815_v58  ;;  %v1544_v24 = vadd.f32 %v1536_v42, %v1493_v1  ;;  %v1905_v13 = vadd.f32 %v1898_v2, %v1890_v46  ;;  %v1801_v41 = vmul.f32 %v4659_v60, %v4526_v28  ;;  %5595 = vst [vmem:[#allocation38_spill] sm:$0xff] %v4705_v51 }
 0x179   : > { %v1809_v11 = vmul.f32 %v4663_v29, %v4623_v49  ;;  %v1750_v56 = vadd.f32 %v4596_v14, %v1591_v9  ;;  %v1873_v43 = vadd.f32 %v1865_v8, %v1856_v35  ;;  %v1824_v40 = vmul.f32 %v4667_v37, %v4534_v50 }
 0x17a   : > { %v1840_v33 = vmul.f32 %v4568_v18, %v4674_v38  ;;  %v1598_v34 = vadd.f32 %v1544_v24, %v1455_v19  ;;  %v1920_v4 = vadd.f32 %v1913_v54, %v1905_v13  ;;  %v1849_v58 = vmul.f32 %v4578_v45, %v4060_v20  ;;  %v4728_v54 = vld [vmem:[%s2968_s30 + $0xa0] sm:$0xff] }
 0x17b   : > { %v1816_v1 = vadd.f32 %v1809_v11, %v1801_v41  ;;  %2444 = vst [vmem:[%s3493_s18 + $0x80] sm:$0xff] %v1750_v56  ;;  %v1881_v42 = vadd.f32 %v1873_v43, %v1830_v61  ;;  %v1866_v14 = vmul.f32 %v4584_v63, %v4657_v16  ;;  %v1891_v8 = vmul.f32 %v4680_v7, %v4705_v51  ;;  %v4717_v41 = vld [vmem:[#allocation2 + $0x12] sm:$0xff] }
 0x17c   : > { %v1899_v24 = vmul.f32 %v4684_v57, %v4089_v55  ;;  %v1757_v19 = vadd.f32 %v4627_v22, %v1598_v34  ;;  %v1857_v13 = vadd.f32 %v1849_v58, %v1840_v33  ;;  %v1914_v20 = vmul.f32 %v4688_v15, %v4693_v31  ;;  %v4731_v22 = vld [vmem:[%s2968_s30 + $0xd0] sm:$0xff] }
 0x17d   : > { %v1831_v11 = vadd.f32 %v1824_v40, %v1816_v1  ;;  %v1927_v56 = vadd.f32 %v1920_v4, %v1881_v42  ;;  %v4722_v61 = vmul.f32 0.0, %v5572_v39  ;;  %v1802_v46 = vmul.f32 %v4659_v60, %v4674_v38 }
 0x17e   : > { %v1906_v43 = vadd.f32 %v1899_v24, %v1891_v8  ;;  %2451 = vst [vmem:[%s3493_s18 + $0xb8] sm:$0xff] %v1757_v19  ;;  %v1874_v2 = vadd.f32 %v1866_v14, %v1857_v13  ;;  %v1810_v9 = vmul.f32 %v4731_v22, %v4663_v29  ;;  %v1825_v35 = vmul.f32 %v4667_v37, %v4657_v16  ;;  %v4749_v24 = vld [vmem:[#allocation2 + $0x22] sm:$0xff] }
 0x17f   : > { %5596 = vst [vmem:[#allocation17_spill] sm:$0xff] %v4722_v61  ;;  %v1841_v40 = vmul.f32 %v4568_v18, %v4705_v51  ;;  %1935 = vst [vmem:[#allocation2 + $0x11] sm:$0xff] %v1927_v56  ;;  %v1850_v34 = vmul.f32 %v4578_v45, %v4089_v55  ;;  %v1867_v4 = vmul.f32 %v4584_v63, %v4693_v31  ;;  %v4752_v13 = vmul.f32 0.0, %v5575_v6  ;;  %v4761_v16 = vld [vmem:[%s2968_s30 + $0xa8] sm:$0xff] }
 0x180   : > { %v1921_v33 = vadd.f32 %v1914_v20, %v1906_v43  ;;  %v1892_v1 = vmul.f32 %v4680_v7, %v4728_v54  ;;  %v1882_v58 = vadd.f32 %v1874_v2, %v1831_v11  ;;  %v1817_v42 = vadd.f32 %v1810_v9, %v1802_v46 }
 0x181   : > { %v1900_v14 = vmul.f32 %v4684_v57, %v5572_v39  ;;  %v1915_v8 = vmul.f32 %v4688_v15, %v4722_v61  ;;  %v1858_v19 = vadd.f32 %v1850_v34, %v1841_v40  ;;  %v1803_v20 = vmul.f32 %v4659_v60, %v4705_v51 }
 0x182   : > { %v1811_v56 = vmul.f32 %v4663_v29, %v4089_v55  ;;  %v1928_v11 = vadd.f32 %v1921_v33, %v1882_v58  ;;  %v1832_v43 = vadd.f32 %v1825_v35, %v1817_v42  ;;  %v1826_v2 = vmul.f32 %v4667_v37, %v4693_v31 }
 0x183   : > { %v1907_v46 = vadd.f32 %v1900_v14, %v1892_v1  ;;  %v1875_v9 = vadd.f32 %v1867_v4, %v1858_v19  ;;  %v1842_v40 = vmul.f32 %v4568_v18, %v4728_v54  ;;  %v1851_v34 = vmul.f32 %v4578_v45, %v5572_v39  ;;  %v4775_v14 = vld [vmem:[#allocation2 + $0x32] sm:$0xff] }
 0x184   : > { %v1818_v38 = vadd.f32 %v1811_v56, %v1803_v20  ;;  %1936 = vst [vmem:[#allocation2 + $0x21] sm:$0xff] %v1928_v11  ;;  %v1868_v55 = vmul.f32 %v4584_v63, %v4722_v61  ;;  %v1893_v35 = vmul.f32 %v4680_v7, %v4761_v16  ;;  %v1901_v33 = vmul.f32 %v4684_v57, %v5575_v6 }
 0x185   : > { %v1922_v51 = vadd.f32 %v1915_v8, %v1907_v46  ;;  %v1883_v4 = vadd.f32 %v1875_v9, %v1832_v43  ;;  %v1859_v58 = vadd.f32 %v1851_v34, %v1842_v40  ;;  %v1916_v42 = vmul.f32 %v4688_v15, %v4752_v13 }
 0x186   : > { %v1833_v1 = vadd.f32 %v1826_v2, %v1818_v38  ;;  %v1908_v19 = vadd.f32 %v1901_v33, %v1893_v35  ;;  %v1804_v8 = vmul.f32 %v4659_v60, %v4728_v54  ;;  %v1812_v20 = vmul.f32 %v4663_v29, %v5572_v39  ;;  %v4795_v33 = vld [vmem:[#allocation2 + $0x42] sm:$0xff] }
 0x187   : > { %v1827_v56 = vmul.f32 %v4667_v37, %v4722_v61  ;;  %v1929_v11 = vadd.f32 %v1922_v51, %v1883_v4  ;;  %v1876_v46 = vadd.f32 %v1868_v55, %v1859_v58  ;;  %v1843_v38 = vmul.f32 %v4568_v18, %v4761_v16 }
 0x188   : > { %v1852_v43 = vmul.f32 %v4578_v45, %v5575_v6  ;;  %v1923_v2 = vadd.f32 %v1916_v42, %v1908_v19  ;;  %v1819_v9 = vadd.f32 %v1812_v20, %v1804_v8  ;;  %v1869_v40 = vmul.f32 %v4584_v63, %v4752_v13 }
 0x189   : > { %v1894_v34 = vmul.f32 %v4680_v7, %v4543_v62  ;;  %1937 = vst [vmem:[#allocation2 + $0x31] sm:$0xff] %v1929_v11  ;;  %v1884_v39 = vadd.f32 %v1876_v46, %v1833_v1  ;;  %v1902_v51 = vmul.f32 %v4684_v57, %v4639_v53  ;;  %v1917_v55 = vmul.f32 %v4688_v15, %v4555_v12 }
 0x18a   : > { %v1860_v35 = vadd.f32 %v1852_v43, %v1843_v38  ;;  %v1834_v4 = vadd.f32 %v1827_v56, %v1819_v9  ;;  %v1805_v58 = vmul.f32 %v4659_v60, %v4761_v16  ;;  %v1813_v42 = vmul.f32 %v4663_v29, %v5575_v6  ;;  %v4815_v43 = vld [vmem:[#allocation2 + $0x52] sm:$0xff]  ;;  %v2616_v9 = vld [vmem:[%s2968_s30 + $0x88] sm:$0xff] }
 0x18b   : > { %v1828_v19 = vmul.f32 %v4667_v37, %v4752_v13  ;;  %v1930_v1 = vadd.f32 %v1923_v2, %v1884_v39  ;;  %v1909_v20 = vadd.f32 %v1902_v51, %v1894_v34  ;;  %v1844_v11 = vmul.f32 %v4568_v18, %v4543_v62  ;;  %v2617_v39 = vld [vmem:[%s2968_s30 + $0x80] sm:$0xff] }
 0x18c   : > { %v1877_v8 = vadd.f32 %v1869_v40, %v1860_v35  ;;  %v1820_v46 = vadd.f32 %v1813_v42, %v1805_v58  ;;  %v1853_v56 = vmul.f32 %v4639_v53, %v4578_v45  ;;  %v1870_v60 = vmul.f32 %v4584_v63, %v4555_v12 }
 0x18d   : > { %v1895_v6 = vmul.f32 %v4680_v7, %v4546_v59  ;;  %1938 = vst [vmem:[#allocation2 + $0x41] sm:$0xff] %v1930_v1  ;;  %v1924_v37 = vadd.f32 %v1917_v55, %v1909_v20  ;;  %v1903_v38 = vmul.f32 %v4684_v57, %v4652_v48  ;;  %v1918_v18 = vmul.f32 %v4688_v15, %v4558_v3 }
 0x18e   : > { %v1885_v29 = vadd.f32 %v1877_v8, %v1834_v4  ;;  %v1835_v2 = vadd.f32 %v1828_v19, %v1820_v46  ;;  %v1861_v45 = vadd.f32 %v1853_v56, %v1844_v11  ;;  %v1290_v63 = vadd.f32 %v2616_v9, %v4190_v21  ;;  %v2618_v19 = vld [vmem:[%s2968_s30 + $0x50] sm:$0xff]  ;;  %v4837_v46 = vld [vmem:[#allocation2 + $0x62] sm:$0xff] }
 0x18f   : > { %v1457_v7 = vmul.f32 %v4599_v25, %v4594_v10  ;;  %v1910_v34 = vadd.f32 %v1903_v38, %v1895_v6  ;;  %v1465_v35 = vmul.f32 %v2617_v39, %v4610_v27  ;;  %v1480_v57 = vmul.f32 %v4606_v26, %v4612_v0  ;;  %v2619_v39 = vld [vmem:[%s2968_s30 + $0x58] sm:$0xff] }
 0x190   : > { %v1931_v40 = vadd.f32 %v1924_v37, %v1885_v29  ;;  %v1878_v15 = vadd.f32 %v1870_v60, %v1861_v45  ;;  %v1449_v51 = vadd.f32 %v4444_v52, %v1290_v63  ;;  %v1496_v55 = vmul.f32 %v4616_v17, %v4560_v36  ;;  %v5597_v45 = vld [vmem:[#allocation36_spill] sm:$0xff] }
 0x191   : > { %v1505_v4 = vmul.f32 %v2616_v9, %v4572_v47  ;;  %v1925_v58 = vadd.f32 %v1918_v18, %v1910_v34  ;;  %v1472_v42 = vadd.f32 %v1465_v35, %v1457_v7  ;;  %v1522_v25 = vmul.f32 %v4623_v49, %v4574_v5 }
 0x192   : > { %1939 = vst [vmem:[#allocation2 + $0x51] sm:$0xff] %v1931_v40  ;;  %v1547_v1 = vmul.f32 %v2618_v19, %v4582_v30  ;;  %v1886_v8 = vadd.f32 %v1878_v15, %v1835_v2  ;;  %v1555_v11 = vmul.f32 %v4228_v23, %v4590_v32  ;;  %v1570_v52 = vmul.f32 %v4731_v22, %v4592_v44 }
 0x193   : > { %v1513_v20 = vadd.f32 %v1505_v4, %v1496_v55  ;;  %v1487_v56 = vadd.f32 %v1480_v57, %v1472_v42  ;;  %v1291_v60 = vadd.f32 %v4228_v23, %v4190_v21  ;;  %v1458_v6 = vmul.f32 %v4616_v17, %v4594_v10  ;;  %v5598_v55 = vld [vmem:[#allocation30_spill] sm:$0xff] }
 0x194   : > { %v1466_v29 = vmul.f32 %v2616_v9, %v4610_v27  ;;  %v1932_v37 = vadd.f32 %v1925_v58, %v1886_v8  ;;  %v1562_v18 = vadd.f32 %v1555_v11, %v1547_v1  ;;  %v1481_v2 = vmul.f32 %v4623_v49, %v4612_v0  ;;  %v4857_v58 = vld [vmem:[%s2968_s30 + $0xd8] sm:$0xff] }
 0x195   : > { %v1530_v38 = vadd.f32 %v1522_v25, %v1513_v20  ;;  %v1450_v63 = vadd.f32 %v5597_v45, %v1291_v60  ;;  %v1497_v40 = vmul.f32 %v2618_v19, %v4560_v36  ;;  %v1506_v21 = vmul.f32 %v4228_v23, %v4572_v47  ;;  %5599 = vst [vmem:[#allocation23_spill] sm:$0xff] %v4857_v58  ;;  %v4861_v1 = vld [vmem:[#allocation8] sm:$0xff] }
 0x196   : > { %v1473_v7 = vadd.f32 %v1466_v29, %v1458_v6  ;;  %1940 = vst [vmem:[#allocation2 + $0x61] sm:$0xff] %v1932_v37  ;;  %v1577_v17 = vadd.f32 %v1570_v52, %v1562_v18  ;;  %v1523_v9 = vmul.f32 %v4731_v22, %v4574_v5  ;;  %v1548_v35 = vmul.f32 %v2619_v39, %v4582_v30  ;;  %v5600_v37 = vld [vmem:[#allocation25_spill] sm:$0xff] }
 0x197   : > { %v1538_v34 = vadd.f32 %v1530_v38, %v1487_v56  ;;  %v1514_v15 = vadd.f32 %v1506_v21, %v1497_v40  ;;  %v1556_v4 = vmul.f32 %v5598_v55, %v4590_v32  ;;  %v1571_v42 = vmul.f32 %v4857_v58, %v4592_v44 }
 0x198   : > { %v1488_v57 = vadd.f32 %v1481_v2, %v1473_v7  ;;  %v1292_v8 = vadd.f32 %v4861_v1, %v5598_v55  ;;  %v1459_v20 = vmul.f32 %v2618_v19, %v4594_v10  ;;  %v1467_v11 = vmul.f32 %v4228_v23, %v4610_v27  ;;  %v2622_v7 = vld [vmem:[%s2968_s30 + $0x60] sm:$0xff] }
 0x199   : > { %v1584_v25 = vadd.f32 %v1577_v17, %v1538_v34  ;;  %v1531_v52 = vadd.f32 %v1523_v9, %v1514_v15  ;;  %v1563_v56 = vadd.f32 %v1556_v4, %v1548_v35  ;;  %v1482_v60 = vmul.f32 %v4731_v22, %v4612_v0  ;;  %v4882_v15 = vld [vmem:[%s2968_s30 + $0xe0] sm:$0xff] }
 0x19a   : > { %v1498_v6 = vmul.f32 %v2619_v39, %v4560_v36  ;;  %v1451_v38 = vadd.f32 %v5600_v37, %v1292_v8  ;;  %v1474_v18 = vadd.f32 %v1467_v11, %v1459_v20  ;;  %v1507_v2 = vmul.f32 %v5598_v55, %v4572_v47 }
 0x19b   : > { %v1592_v29 = vadd.f32 %v1584_v25, %v1449_v51  ;;  %v1539_v19 = vadd.f32 %v1531_v52, %v1488_v57  ;;  %v1578_v45 = vadd.f32 %v1571_v42, %v1563_v56  ;;  %v1524_v23 = vmul.f32 %v4857_v58, %v4574_v5  ;;  %v5601_v51 = vld [vmem:[#allocation32_spill] sm:$0xff]  ;;  %v5602_v52 = vld [vmem:[#allocation26_spill] sm:$0xff] }
 0x19c   : > { %v1549_v40 = vmul.f32 %v2622_v7, %v4582_v30  ;;  %v1489_v34 = vadd.f32 %v1482_v60, %v1474_v18  ;;  %v1515_v17 = vadd.f32 %v1507_v2, %v1498_v6  ;;  %v1557_v9 = vmul.f32 %v5601_v51, %v4590_v32 }
 0x19d   : > { %v1751_v21 = vadd.f32 %v4717_v41, %v1592_v29  ;;  %v1585_v35 = vadd.f32 %v1578_v45, %v1539_v19  ;;  %v1572_v57 = vmul.f32 %v4882_v15, %v4592_v44  ;;  %v1293_v4 = vadd.f32 %v4861_v1, %v5601_v51  ;;  %v2624_v19 = vld [vmem:[%s2968_s30 + $0x68] sm:$0xff]  ;;  %v5603_v45 = vld [vmem:[#allocation39_spill] sm:$0xff] }
 0x19e   : > { %v1460_v42 = vmul.f32 %v2619_v39, %v4594_v10  ;;  %v1532_v25 = vadd.f32 %v1524_v23, %v1515_v17  ;;  %v1564_v41 = vadd.f32 %v1557_v9, %v1549_v40  ;;  %v1468_v8 = vmul.f32 %v5598_v55, %v4610_v27  ;;  %v4906_v17 = vld [vmem:[%s2968_s30 + $0xe8] sm:$0xff] }
 0x19f   : > { %2445 = vst [vmem:[%s3493_s18 + $0x88] sm:$0xff] %v1751_v21  ;;  %v1483_v20 = vmul.f32 %v4857_v58, %v4612_v0  ;;  %v1593_v11 = vadd.f32 %v1585_v35, %v1450_v63  ;;  %v1452_v56 = vadd.f32 %v5602_v52, %v1293_v4  ;;  %v1499_v60 = vmul.f32 %v2622_v7, %v4560_v36 }
 0x1a0   : > { %v1508_v39 = vmul.f32 %v5601_v51, %v4572_v47  ;;  %v1540_v6 = vadd.f32 %v1532_v25, %v1489_v34  ;;  %v1579_v29 = vadd.f32 %v1572_v57, %v1564_v41  ;;  %v1475_v37 = vadd.f32 %v1468_v8, %v1460_v42  ;;  %v5604_v25 = vld [vmem:[#allocation29_spill] sm:$0xff] }
 0x1a1   : > { %v1525_v18 = vmul.f32 %v4882_v15, %v4574_v5  ;;  %v1752_v55 = vadd.f32 %v4749_v24, %v1593_v11  ;;  %v1550_v63 = vmul.f32 %v2624_v19, %v4582_v30  ;;  %v1558_v23 = vmul.f32 %v5603_v45, %v4590_v32 }
 0x1a2   : > { %v1516_v2 = vadd.f32 %v1508_v39, %v1499_v60  ;;  %v1586_v40 = vadd.f32 %v1579_v29, %v1540_v6  ;;  %v1490_v21 = vadd.f32 %v1483_v20, %v1475_v37  ;;  %v1573_v34 = vmul.f32 %v4906_v17, %v4592_v44  ;;  %v2626_v29 = vld [vmem:[%s2968_s30 + $0xb0] sm:$0xff] }
 0x1a3   : > { %v1294_v9 = vadd.f32 %v4861_v1, %v5603_v45  ;;  %2446 = vst [vmem:[%s3493_s18 + $0x90] sm:$0xff] %v1752_v55  ;;  %v1565_v35 = vadd.f32 %v1558_v23, %v1550_v63  ;;  %v1461_v57 = vmul.f32 %v2622_v7, %v4594_v10  ;;  %v1469_v4 = vmul.f32 %v5601_v51, %v4610_v27 }
 0x1a4   : > { %v1533_v24 = vadd.f32 %v1525_v18, %v1516_v2  ;;  %v1594_v42 = vadd.f32 %v1586_v40, %v1451_v38  ;;  %v1484_v8 = vmul.f32 %v4882_v15, %v4612_v0  ;;  %v1500_v20 = vmul.f32 %v2624_v19, %v4560_v36  ;;  %v5605_v38 = vld [vmem:[#allocation35_spill] sm:$0xff] }
 0x1a5   : > { %v1453_v41 = vadd.f32 %v5604_v25, %v1294_v9  ;;  %v1580_v52 = vadd.f32 %v1573_v34, %v1565_v35  ;;  %v1476_v60 = vadd.f32 %v1469_v4, %v1461_v57  ;;  %v1509_v39 = vmul.f32 %v5603_v45, %v4572_v47  ;;  %v5606_v4 = vld [vmem:[#allocation20_spill] sm:$0xff] }
 0x1a6   : > { %v1541_v11 = vadd.f32 %v1533_v24, %v1490_v21  ;;  %v1753_v7 = vadd.f32 %v4775_v14, %v1594_v42  ;;  %v1526_v51 = vmul.f32 %v4906_v17, %v4574_v5  ;;  %v1551_v6 = vmul.f32 %v5605_v38, %v4582_v30 }
 0x1a7   : > { %v1559_v37 = vmul.f32 %v2626_v29, %v4590_v32  ;;  %v1491_v55 = vadd.f32 %v1484_v8, %v1476_v60  ;;  %v1517_v2 = vadd.f32 %v1509_v39, %v1500_v20  ;;  %v1574_v63 = vmul.f32 %v4639_v53, %v4592_v44  ;;  %v2627_v39 = vld [vmem:[%s2968_s30 + $0xb8] sm:$0xff] }
 0x1a8   : > { %v1587_v18 = vadd.f32 %v1580_v52, %v1541_v11  ;;  %2447 = vst [vmem:[%s3493_s18 + $0x98] sm:$0xff] %v1753_v7  ;;  %v1295_v40 = vadd.f32 %v2626_v29, %v4861_v1  ;;  %v1462_v14 = vmul.f32 %v2624_v19, %v4594_v10  ;;  %v1470_v21 = vmul.f32 %v5603_v45, %v4610_v27  ;;  %v5607_v45 = vld [vmem:[#allocation21_spill] sm:$0xff] }
 0x1a9   : > { %v1566_v23 = vadd.f32 %v1559_v37, %v1551_v6  ;;  %v1534_v9 = vadd.f32 %v1526_v51, %v1517_v2  ;;  %v1485_v24 = vmul.f32 %v4906_v17, %v4612_v0  ;;  %v1501_v35 = vmul.f32 %v5605_v38, %v4560_v36  ;;  %v5608_v6 = vld [vmem:[#allocation13_spill] sm:$0xff]  ;;  %v5610_v37 = vld [vmem:[#allocation18_spill] sm:$0xff]  ;;  %v5612_v2 = vld [vmem:[#allocation28_spill] sm:$0xff] }
 0x1aa   : > { %v1595_v34 = vadd.f32 %v1587_v18, %v1452_v56  ;;  %v1454_v42 = vadd.f32 %v5606_v4, %v1295_v40  ;;  %v1477_v25 = vadd.f32 %v1470_v21, %v1462_v14  ;;  %v1510_v8 = vmul.f32 %v2626_v29, %v4572_v47  ;;  %v5609_v29 = vld [vmem:[#allocation27_spill] sm:$0xff] }
 0x1ab   : > { %v1581_v57 = vadd.f32 %v1574_v63, %v1566_v23  ;;  %v1542_v20 = vadd.f32 %v1534_v9, %v1491_v55  ;;  %v1527_v56 = vmul.f32 %v4639_v53, %v4574_v5  ;;  %v1552_v11 = vmul.f32 %v5607_v45, %v4582_v30  ;;  %v5611_v55 = vld [vmem:[#allocation19_spill] sm:$0xff] }
 0x1ac   : > { %v1754_v19 = vadd.f32 %v4795_v33, %v1595_v34  ;;  %v1492_v52 = vadd.f32 %v1485_v24, %v1477_v25  ;;  %v1518_v60 = vadd.f32 %v1510_v8, %v1501_v35  ;;  %v1560_v7 = vmul.f32 %v2627_v39, %v4590_v32  ;;  %v5613_v14 = vld [vmem:[#allocation31_spill] sm:$0xff]  ;;  %v5616_v25 = vld [vmem:[#allocation14_spill] sm:$0xff] }
 0x1ad   : > { %v1575_v51 = vmul.f32 %v4652_v48, %v4592_v44  ;;  %v1588_v38 = vadd.f32 %v1581_v57, %v1542_v20  ;;  %v2140_v33 = vmul.f32 %v5609_v29, %v5608_v6  ;;  %v2149_v18 = vmul.f32 %v4606_v26, %v5610_v37  ;;  %v5614_v34 = vld [vmem:[#allocation15_spill] sm:$0xff]  ;;  %v5615_v57 = vld [vmem:[#allocation34_spill] sm:$0xff] }
 0x1ae   : > { %2448 = vst [vmem:[%s3493_s18 + $0xa0] sm:$0xff] %v1754_v19  ;;  %v2166_v63 = vmul.f32 %v5612_v2, %v5611_v55  ;;  %v1535_v23 = vadd.f32 %v1527_v56, %v1518_v60  ;;  %v1567_v40 = vadd.f32 %v1560_v7, %v1552_v11  ;;  %v2191_v21 = vmul.f32 %v4526_v28, %v5613_v14  ;;  %v5617_v56 = vld [vmem:[#allocation33_spill] sm:$0xff]  ;;  %v5618_v7 = vld [vmem:[#allocation22_spill] sm:$0xff] }
 0x1af   : > { %v2199_v9 = vmul.f32 %v4623_v49, %v5614_v34  ;;  %v1596_v24 = vadd.f32 %v1588_v38, %v1453_v41  ;;  %v2157_v35 = vadd.f32 %v2149_v18, %v2140_v33  ;;  %v2214_v4 = vmul.f32 %v4534_v50, %v5615_v57 }
 0x1b0   : > { %v2108_v8 = vmul.f32 %v4543_v62, %v5616_v25  ;;  %v1543_v19 = vadd.f32 %v1535_v23, %v1492_v52  ;;  %v1582_v20 = vadd.f32 %v1575_v51, %v1567_v40  ;;  %v2116_v11 = vmul.f32 %v4639_v53, %v5617_v56  ;;  %v4976_v51 = vld [vmem:[#allocation2] sm:$0xff] }
 0x1b1   : > { %v2206_v45 = vadd.f32 %v2199_v9, %v2191_v21  ;;  %v1755_v60 = vadd.f32 %v4815_v43, %v1596_v24  ;;  %v2174_v39 = vadd.f32 %v2166_v63, %v2157_v35  ;;  %v2131_v41 = vmul.f32 %v4555_v12, %v5618_v7  ;;  %5619 = vst [vmem:[#allocation24_spill] sm:$0xff] %v4976_v51  ;;  %v4986_v24 = vld [vmem:[#allocation6 + $0x28] sm:$0xff] }
 0x1b2   : > { %v2147_v38 = vmul.f32 %v4546_v59, %v5608_v6  ;;  %v1589_v33 = vadd.f32 %v1582_v20, %v1543_v19  ;;  %v2123_v14 = vadd.f32 %v2116_v11, %v2108_v8  ;;  %v2156_v52 = vmul.f32 %v4652_v48, %v5610_v37  ;;  %v4999_v19 = vld [vmem:[#allocation6 + $0x40] sm:$0xff]  ;;  %v5620_v20 = vld [vmem:[#allocation16_spill] sm:$0xff] }
 0x1b3   : > { %v2221_v18 = vadd.f32 %v2214_v4, %v2206_v45  ;;  %2449 = vst [vmem:[%s3493_s18 + $0xa8] sm:$0xff] %v1755_v60  ;;  %v2173_v23 = vmul.f32 %v4558_v3, %v5611_v55  ;;  %v2102_v43 = vmul.f32 %v5609_v29, %v5616_v25  ;;  %v2110_v63 = vmul.f32 %v4606_v26, %v5617_v56  ;;  %v4990_v55 = vld [vmem:[#allocation6 + $0x70] sm:$0xff]  ;;  %v4994_v4 = vld [vmem:[#allocation6 + $0xb8] sm:$0xff]  ;;  %v5003_v56 = vld [vmem:[#allocation6 + $0x88] sm:$0xff] }
 0x1b4   : > { %v2125_v6 = vmul.f32 %v5612_v2, %v5618_v7  ;;  %v1597_v40 = vadd.f32 %v1589_v33, %v1454_v42  ;;  %v2138_v34 = vadd.f32 %v2131_v41, %v2123_v14  ;;  %v2164_v9 = vadd.f32 %v2156_v52, %v2147_v38  ;;  %v5007_v60 = vld [vmem:[#allocation2 + $0x70] sm:$0xff]  ;;  %v5622_v38 = vld [vmem:[#allocation37_spill] sm:$0xff] }
 0x1b5   : > { %v2228_v21 = vadd.f32 %v2221_v18, %v2174_v39  ;;  %v2117_v37 = vadd.f32 %v2110_v63, %v2102_v43  ;;  %v2141_v35 = vmul.f32 %v4986_v24, %v4526_v28  ;;  %v2150_v57 = vmul.f32 %v4990_v55, %v4623_v49  ;;  %5621 = vst [vmem:[#allocation36_spill] sm:$0xff] %v5007_v60  ;;  %v5009_v41 = vld [vmem:[#allocation6 + $0xd0] sm:$0xff]  ;;  %v5022_v63 = vld [vmem:[#allocation6 + $0xa0] sm:$0xff] }
 0x1b6   : > { %v2167_v42 = vmul.f32 %v4994_v4, %v4534_v50  ;;  %v1756_v25 = vadd.f32 %v4837_v46, %v1597_v40  ;;  %v2181_v8 = vadd.f32 %v2173_v23, %v2164_v9  ;;  %v2192_v45 = vmul.f32 %v4999_v19, %v5620_v20  ;;  %v5013_v33 = vld [vmem:[#allocation6 + $0x10] sm:$0xff]  ;;  %v5018_v23 = vld [vmem:[#allocation6 + $0x58] sm:$0xff] }
 0x1b7   : > { %2236 = vst [vmem:[#allocation2 + $0x1] sm:$0xff] %v2228_v21  ;;  %v2200_v11 = vmul.f32 %v5003_v56, %v4731_v22  ;;  %v2132_v39 = vadd.f32 %v2125_v6, %v2117_v37  ;;  %v2158_v7 = vadd.f32 %v2150_v57, %v2141_v35  ;;  %v2215_v46 = vmul.f32 %v5009_v41, %v5622_v38  ;;  %v5623_v57 = vld [vmem:[#allocation38_spill] sm:$0xff]  ;;  %v5040_v60 = vld [vmem:[#allocation2 + $0x10] sm:$0xff] }
 0x1b8   : > { %v2103_v18 = vmul.f32 %v5013_v33, %v4526_v28  ;;  %2450 = vst [vmem:[%s3493_s18 + $0xb0] sm:$0xff] %v1756_v25  ;;  %v2189_v14 = vadd.f32 %v2181_v8, %v2138_v34  ;;  %v2111_v43 = vmul.f32 %v5018_v23, %v4623_v49  ;;  %v2126_v6 = vmul.f32 %v5022_v63, %v4534_v50 }
 0x1b9   : > { %v2207_v52 = vadd.f32 %v2200_v11, %v2192_v45  ;;  %v2175_v40 = vadd.f32 %v2167_v42, %v2158_v7  ;;  %v2142_v21 = vmul.f32 %v4986_v24, %v5620_v20  ;;  %v2151_v9 = vmul.f32 %v4990_v55, %v4731_v22 }
 0x1ba   : > { %v2168_v34 = vmul.f32 %v4994_v4, %v5622_v38  ;;  %2243 = vst [vmem:[#allocation2 + $0x71] sm:$0xff] %v2189_v14  ;;  %v2118_v35 = vadd.f32 %v2111_v43, %v2103_v18  ;;  %v2193_v25 = vmul.f32 %v4999_v19, %v5623_v57  ;;  %v2201_v8 = vmul.f32 %v5003_v56, %v4857_v58 }
 0x1bb   : > { %v2222_v37 = vadd.f32 %v2215_v46, %v2207_v52  ;;  %v2183_v45 = vadd.f32 %v2175_v40, %v2132_v39  ;;  %v2159_v42 = vadd.f32 %v2151_v9, %v2142_v21  ;;  %v2216_v11 = vmul.f32 %v5009_v41, %v4693_v31 }
 0x1bc   : > { %v2104_v7 = vmul.f32 %v5013_v33, %v5620_v20  ;;  %v2133_v51 = vadd.f32 %v2126_v6, %v2118_v35  ;;  %v2208_v14 = vadd.f32 %v2201_v8, %v2193_v25  ;;  %v2112_v46 = vmul.f32 %v5018_v23, %v4731_v22 }
 0x1bd   : > { %v2127_v18 = vmul.f32 %v5022_v63, %v5622_v38  ;;  %v2229_v52 = vadd.f32 %v2222_v37, %v2183_v45  ;;  %v2176_v43 = vadd.f32 %v2168_v34, %v2159_v42  ;;  %v2143_v39 = vmul.f32 %v4986_v24, %v5623_v57  ;;  %v5058_v45 = vld [vmem:[#allocation2 + $0x20] sm:$0xff] }
 0x1be   : > { %v2152_v40 = vmul.f32 %v4990_v55, %v4857_v58  ;;  %v2223_v21 = vadd.f32 %v2216_v11, %v2208_v14  ;;  %v2119_v9 = vadd.f32 %v2112_v46, %v2104_v7  ;;  %v2169_v6 = vmul.f32 %v4994_v4, %v4693_v31  ;;  %5624 = vst [vmem:[#allocation30_spill] sm:$0xff] %v5058_v45 }
 0x1bf   : > { %v2194_v35 = vmul.f32 %v4999_v19, %v4728_v54  ;;  %2237 = vst [vmem:[#allocation2 + $0x11] sm:$0xff] %v2229_v52  ;;  %v2184_v25 = vadd.f32 %v2176_v43, %v2133_v51  ;;  %v2202_v34 = vmul.f32 %v5003_v56, %v4882_v15  ;;  %v2217_v37 = vmul.f32 %v5009_v41, %v4722_v61 }
 0x1c0   : > { %v2160_v8 = vadd.f32 %v2152_v40, %v2143_v39  ;;  %v2134_v42 = vadd.f32 %v2127_v18, %v2119_v9  ;;  %v2105_v11 = vmul.f32 %v5013_v33, %v5623_v57  ;;  %v2113_v7 = vmul.f32 %v5018_v23, %v4857_v58 }
 0x1c1   : > { %v2128_v14 = vmul.f32 %v5022_v63, %v4693_v31  ;;  %v2230_v51 = vadd.f32 %v2223_v21, %v2184_v25  ;;  %v2209_v52 = vadd.f32 %v2202_v34, %v2194_v35  ;;  %v2144_v43 = vmul.f32 %v4986_v24, %v4728_v54  ;;  %v5078_v35 = vld [vmem:[#allocation2 + $0x30] sm:$0xff] }
 0x1c2   : > { %v2177_v46 = vadd.f32 %v2169_v6, %v2160_v8  ;;  %v2120_v39 = vadd.f32 %v2113_v7, %v2105_v11  ;;  %v2153_v40 = vmul.f32 %v4990_v55, %v4882_v15  ;;  %v2170_v18 = vmul.f32 %v4994_v4, %v4722_v61  ;;  %5625 = vst [vmem:[#allocation25_spill] sm:$0xff] %v5078_v35 }
 0x1c3   : > { %v2195_v9 = vmul.f32 %v4999_v19, %v4761_v16  ;;  %2238 = vst [vmem:[#allocation2 + $0x21] sm:$0xff] %v2230_v51  ;;  %v2224_v58 = vadd.f32 %v2217_v37, %v2209_v52  ;;  %v2203_v21 = vmul.f32 %v5003_v56, %v4906_v17  ;;  %v2218_v6 = vmul.f32 %v5009_v41, %v4752_v13 }
 0x1c4   : > { %v2185_v45 = vadd.f32 %v2177_v46, %v2134_v42  ;;  %v2135_v25 = vadd.f32 %v2128_v14, %v2120_v39  ;;  %v2161_v8 = vadd.f32 %v2153_v40, %v2144_v43  ;;  %v2106_v34 = vmul.f32 %v5013_v33, %v4728_v54 }
 0x1c5   : > { %v2114_v11 = vmul.f32 %v5018_v23, %v4882_v15  ;;  %v2210_v51 = vadd.f32 %v2203_v21, %v2195_v9  ;;  %v2129_v37 = vmul.f32 %v5022_v63, %v4722_v61  ;;  %v2145_v42 = vmul.f32 %v4986_v24, %v4761_v16 }
 0x1c6   : > { %v2231_v7 = vadd.f32 %v2224_v58, %v2185_v45  ;;  %v2178_v46 = vadd.f32 %v2170_v18, %v2161_v8  ;;  %v2154_v14 = vmul.f32 %v4990_v55, %v4906_v17  ;;  %v2171_v43 = vmul.f32 %v4994_v4, %v4752_v13 }
 0x1c7   : > { %v2121_v52 = vadd.f32 %v2114_v11, %v2106_v34  ;;  %v2225_v39 = vadd.f32 %v2218_v6, %v2210_v51  ;;  %v2196_v58 = vmul.f32 %v4999_v19, %v4543_v62  ;;  %v2204_v45 = vmul.f32 %v5003_v56, %v4639_v53  ;;  %v5100_v34 = vld [vmem:[#allocation2 + $0x40] sm:$0xff] }
 0x1c8   : > { %2239 = vst [vmem:[#allocation2 + $0x31] sm:$0xff] %v2231_v7  ;;  %v2219_v40 = vmul.f32 %v5009_v41, %v4555_v12  ;;  %v2186_v9 = vadd.f32 %v2178_v46, %v2135_v25  ;;  %v2162_v21 = vadd.f32 %v2154_v14, %v2145_v42  ;;  %v2107_v8 = vmul.f32 %v5013_v33, %v4761_v16  ;;  %v5118_v14 = vld [vmem:[#allocation2 + $0x50] sm:$0xff] }
 0x1c9   : > { %v2136_v18 = vadd.f32 %v2129_v37, %v2121_v52  ;;  %v2211_v11 = vadd.f32 %v2204_v45, %v2196_v58  ;;  %v2115_v6 = vmul.f32 %v5018_v23, %v4906_v17  ;;  %v2130_v7 = vmul.f32 %v5022_v63, %v4752_v13 }
 0x1ca   : > { %v2146_v51 = vmul.f32 %v4986_v24, %v4543_v62  ;;  %v2232_v35 = vadd.f32 %v2225_v39, %v2186_v9  ;;  %v2179_v61 = vadd.f32 %v2171_v43, %v2162_v21  ;;  %v2155_v25 = vmul.f32 %v4990_v55, %v4639_v53 }
 0x1cb   : > { %v2172_v33 = vmul.f32 %v4994_v4, %v4555_v12  ;;  %v2226_v37 = vadd.f32 %v2219_v40, %v2211_v11  ;;  %v2122_v42 = vadd.f32 %v2115_v6, %v2107_v8  ;;  %v2197_v46 = vmul.f32 %v4999_v19, %v4546_v59  ;;  %v5138_v11 = vld [vmem:[#allocation2 + $0x60] sm:$0xff] }
 0x1cc   : > { %v2205_v23 = vmul.f32 %v5003_v56, %v4652_v48  ;;  %2240 = vst [vmem:[#allocation2 + $0x41] sm:$0xff] %v2232_v35  ;;  %v2187_v63 = vadd.f32 %v2179_v61, %v2136_v18  ;;  %v2163_v52 = vadd.f32 %v2155_v25, %v2146_v51  ;;  %v2220_v24 = vmul.f32 %v5009_v41, %v4558_v3 }
 0x1cd   : > { %v2137_v55 = vadd.f32 %v2130_v7, %v2122_v42  ;;  %v1997_v4 = vmul.f32 %v5609_v29, %v4560_v36  ;;  %v2006_v39 = vmul.f32 %v4606_v26, %v4572_v47  ;;  %v1791_v56 = vadd.f32 %v4861_v1, %v4606_v26 }
 0x1ce   : > { %v2212_v43 = vadd.f32 %v2205_v23, %v2197_v46  ;;  %v2233_v19 = vadd.f32 %v2226_v37, %v2187_v63  ;;  %v2180_v58 = vadd.f32 %v2172_v33, %v2163_v52  ;;  %v2023_v61 = vmul.f32 %v5612_v2, %v4574_v5  ;;  %v5626_v37 = vld [vmem:[#allocation24_spill] sm:$0xff] }
 0x1cf   : > { %v2014_v41 = vadd.f32 %v2006_v39, %v1997_v4  ;;  %v2048_v45 = vmul.f32 %v4526_v28, %v4582_v30  ;;  %v2056_v40 = vmul.f32 %v4623_v49, %v4590_v32  ;;  %v2071_v18 = vmul.f32 %v4534_v50, %v4592_v44  ;;  %v5627_v4 = vld [vmem:[#allocation36_spill] sm:$0xff] }
 0x1d0   : > { %v2227_v35 = vadd.f32 %v2220_v24, %v2212_v43  ;;  %2241 = vst [vmem:[#allocation2 + $0x51] sm:$0xff] %v2233_v19  ;;  %v2188_v9 = vadd.f32 %v2180_v58, %v2137_v55  ;;  %v1798_v21 = vadd.f32 %v4861_v1, %v4652_v48  ;;  %v1965_v8 = vmul.f32 %v4543_v62, %v4594_v10 }
 0x1d1   : > { %v2031_v6 = vadd.f32 %v2023_v61, %v2014_v41  ;;  %v2063_v7 = vadd.f32 %v2056_v40, %v2048_v45  ;;  %v1973_v51 = vmul.f32 %v4639_v53, %v4610_v27  ;;  %v1988_v25 = vmul.f32 %v4555_v12, %v4612_v0 }
 0x1d2   : > { %v2234_v33 = vadd.f32 %v2227_v35, %v2188_v9  ;;  %v1950_v42 = vadd.f32 %v5626_v37, %v1791_v56  ;;  %v2004_v46 = vmul.f32 %v4546_v59, %v4560_v36  ;;  %v2013_v23 = vmul.f32 %v4652_v48, %v4572_v47  ;;  %v2244_v56 = vld [vmem:[#allocation2 + $0x2] sm:$0xff] }
 0x1d3   : > { %v2078_v62 = vadd.f32 %v2071_v18, %v2063_v7  ;;  %v1980_v63 = vadd.f32 %v1973_v51, %v1965_v8  ;;  %v2030_v52 = vmul.f32 %v4558_v3, %v4574_v5  ;;  %v1792_v53 = vadd.f32 %v4861_v1, %v4623_v49  ;;  %v2637_v51 = vld [vmem:[%s2968_s30 + $0x88] sm:$0xff] }
 0x1d4   : > { %2242 = vst [vmem:[#allocation2 + $0x61] sm:$0xff] %v2234_v33  ;;  %v2021_v24 = vadd.f32 %v2013_v23, %v2004_v46  ;;  %v1959_v55 = vmul.f32 %v5609_v29, %v4594_v10  ;;  %v1967_v43 = vmul.f32 %v4606_v26, %v4610_v27  ;;  %v1982_v59 = vmul.f32 %v5612_v2, %v4612_v0 }
 0x1d5   : > { %v2085_v48 = vadd.f32 %v2078_v62, %v2031_v6  ;;  %v1957_v39 = vadd.f32 %v5627_v4, %v1798_v21  ;;  %v1995_v19 = vadd.f32 %v1988_v25, %v1980_v63  ;;  %v1998_v58 = vmul.f32 %v4526_v28, %v4560_v36  ;;  %v2251_v6 = vld [vmem:[#allocation2 + $0x72] sm:$0xff] }
 0x1d6   : > { %v2038_v61 = vadd.f32 %v2030_v52, %v2021_v24  ;;  %v1974_v35 = vadd.f32 %v1967_v43, %v1959_v55  ;;  %v2007_v29 = vmul.f32 %v4623_v49, %v4572_v47  ;;  %v2024_v26 = vmul.f32 %v4534_v50, %v4574_v5 }
 0x1d7   : > { %v2093_v41 = vadd.f32 %v2085_v48, %v1950_v42  ;;  %v2049_v2 = vmul.f32 %v5620_v20, %v4582_v30  ;;  %v2057_v45 = vmul.f32 %v4731_v22, %v4590_v32  ;;  %v2072_v28 = vmul.f32 %v5622_v38, %v4592_v44 }
 0x1d8   : > { %v2046_v40 = vadd.f32 %v2038_v61, %v1995_v19  ;;  %v1951_v9 = vadd.f32 %v5040_v60, %v1792_v53  ;;  %v1989_v18 = vadd.f32 %v1982_v59, %v1974_v35  ;;  %v2015_v21 = vadd.f32 %v2007_v29, %v1998_v58  ;;  %v2245_v58 = vld [vmem:[#allocation2 + $0x12] sm:$0xff] }
 0x1d9   : > { %v2252_v8 = vadd.f32 %v2244_v56, %v2093_v41  ;;  %v2064_v7 = vadd.f32 %v2057_v45, %v2049_v2  ;;  %v1960_v25 = vmul.f32 %v2637_v51, %v4594_v10  ;;  %v1968_v33 = vmul.f32 %v4623_v49, %v4610_v27  ;;  %v5212_v41 = vld [vmem:[#allocation6 + $0xb0] sm:$0xff] }
 0x1da   : > { %v2100_v37 = vadd.f32 %v2046_v40, %v1957_v39  ;;  %v2032_v42 = vadd.f32 %v2024_v26, %v2015_v21  ;;  %v1793_v46 = vadd.f32 %v4861_v1, %v4731_v22  ;;  %v1983_v60 = vmul.f32 %v4534_v50, %v4612_v0  ;;  %v5628_v50 = vld [vmem:[#allocation23_spill] sm:$0xff]  ;;  %v5629_v39 = vld [vmem:[#allocation30_spill] sm:$0xff] }
 0x1db   : > { %2468 = vst [vmem:[%s3493_s18 + $0xc0] sm:$0xff] %v2252_v8  ;;  %v2079_v23 = vadd.f32 %v2072_v28, %v2064_v7  ;;  %v1975_v62 = vadd.f32 %v1968_v33, %v1960_v25  ;;  %v1999_v63 = vmul.f32 %v5620_v20, %v4560_v36  ;;  %v2008_v52 = vmul.f32 %v4731_v22, %v4572_v47  ;;  %v5224_v8 = vld [vmem:[#allocation6 + $0xc8] sm:$0xff] }
 0x1dc   : > { %v2259_v53 = vadd.f32 %v2251_v6, %v2100_v37  ;;  %v2040_v49 = vadd.f32 %v2032_v42, %v1989_v18  ;;  %v2025_v24 = vmul.f32 %v5622_v38, %v4574_v5  ;;  %v2050_v55 = vmul.f32 %v5623_v57, %v4582_v30  ;;  %v5630_v6 = vld [vmem:[#allocation17_spill] sm:$0xff]  ;;  %v2644_v25 = vld [vmem:[#allocation6 + $0x8] sm:$0xff] }
 0x1dd   : > { %v1990_v43 = vadd.f32 %v1983_v60, %v1975_v62  ;;  %v2016_v59 = vadd.f32 %v2008_v52, %v1999_v63  ;;  %v2058_v48 = vmul.f32 %v5628_v50, %v4590_v32  ;;  %v2073_v4 = vmul.f32 %v4693_v31, %v4592_v44  ;;  %v5202_v32 = vld [vmem:[#allocation6 + $0x20] sm:$0xff]  ;;  %v2645_v60 = vld [vmem:[#allocation6 + $0x50] sm:$0xff]  ;;  %v2646_v62 = vld [vmem:[#allocation6 + $0x98] sm:$0xff] }
 0x1de   : > { %2475 = vst [vmem:[%s3493_s18 + $0xf8] sm:$0xff] %v2259_v53  ;;  %v2086_v36 = vadd.f32 %v2079_v23, %v2040_v49  ;;  %v1952_v47 = vadd.f32 %v5629_v39, %v1793_v46  ;;  %v1961_v19 = vmul.f32 %v5620_v20, %v4594_v10  ;;  %v1969_v5 = vmul.f32 %v4731_v22, %v4610_v27  ;;  %v5208_v10 = vld [vmem:[#allocation6 + $0x68] sm:$0xff]  ;;  %v5631_v53 = vld [vmem:[#allocation25_spill] sm:$0xff] }
 0x1df   : > { %v2033_v30 = vadd.f32 %v2025_v24, %v2016_v59  ;;  %v2065_v56 = vadd.f32 %v2058_v48, %v2050_v55  ;;  %v1984_v61 = vmul.f32 %v5622_v38, %v4612_v0  ;;  %v2000_v44 = vmul.f32 %v5202_v32, %v5623_v57  ;;  %v5216_v38 = vld [vmem:[#allocation6 + $0x38] sm:$0xff]  ;;  %v2246_v37 = vld [vmem:[#allocation2 + $0x22] sm:$0xff] }
 0x1e0   : > { %v2094_v35 = vadd.f32 %v2086_v36, %v1951_v9  ;;  %v1794_v29 = vadd.f32 %v4861_v1, %v5628_v50  ;;  %v1976_v26 = vadd.f32 %v1969_v5, %v1961_v19  ;;  %v2009_v27 = vmul.f32 %v5208_v10, %v5628_v50  ;;  %v5220_v9 = vld [vmem:[#allocation6 + $0x80] sm:$0xff] }
 0x1e1   : > { %v2041_v22 = vadd.f32 %v2033_v30, %v1990_v43  ;;  %v2080_v20 = vadd.f32 %v2073_v4, %v2065_v56  ;;  %v2026_v0 = vmul.f32 %v5212_v41, %v4693_v31  ;;  %v2051_v2 = vmul.f32 %v5216_v38, %v4728_v54 }
 0x1e2   : > { %v2253_v45 = vadd.f32 %v2245_v58, %v2094_v35  ;;  %v1991_v28 = vadd.f32 %v1984_v61, %v1976_v26  ;;  %v2017_v40 = vadd.f32 %v2009_v27, %v2000_v44  ;;  %v2059_v18 = vmul.f32 %v5220_v9, %v4882_v15  ;;  %v2247_v58 = vld [vmem:[#allocation2 + $0x32] sm:$0xff] }
 0x1e3   : > { %v2087_v21 = vadd.f32 %v2080_v20, %v2041_v22  ;;  %v2074_v7 = vmul.f32 %v5224_v8, %v5630_v6  ;;  %v1795_v51 = vadd.f32 %v4882_v15, %v4861_v1  ;;  %v1962_v33 = vmul.f32 %v2644_v25, %v5623_v57 }
 0x1e4   : > { %2469 = vst [vmem:[%s3493_s18 + $0xc8] sm:$0xff] %v2253_v45  ;;  %v2034_v42 = vadd.f32 %v2026_v0, %v2017_v40  ;;  %v2066_v46 = vadd.f32 %v2059_v18, %v2051_v2  ;;  %v1970_v23 = vmul.f32 %v2645_v60, %v5628_v50  ;;  %v1985_v63 = vmul.f32 %v2646_v62, %v4693_v31 }
 0x1e5   : > { %v2095_v52 = vadd.f32 %v2087_v21, %v1952_v47  ;;  %v1953_v49 = vadd.f32 %v5631_v53, %v1794_v29  ;;  %v2001_v24 = vmul.f32 %v5202_v32, %v4728_v54  ;;  %v2010_v57 = vmul.f32 %v5208_v10, %v4882_v15 }
 0x1e6   : > { %v2042_v55 = vadd.f32 %v2034_v42, %v1991_v28  ;;  %v2081_v43 = vadd.f32 %v2074_v7, %v2066_v46  ;;  %v1977_v59 = vadd.f32 %v1970_v23, %v1962_v33  ;;  %v2027_v48 = vmul.f32 %v5212_v41, %v5630_v6  ;;  %v2648_v28 = vld [vmem:[%s2968_s30 + $0xf0] sm:$0xff] }
 0x1e7   : > { %v2254_v50 = vadd.f32 %v2246_v37, %v2095_v52  ;;  %v2018_v4 = vadd.f32 %v2010_v57, %v2001_v24  ;;  %v2052_v31 = vmul.f32 %v5216_v38, %v4761_v16  ;;  %v2060_v36 = vmul.f32 %v5220_v9, %v4906_v17 }
 0x1e8   : > { %v2088_v39 = vadd.f32 %v2081_v43, %v2042_v55  ;;  %v1954_v47 = vadd.f32 %v5100_v34, %v1795_v51  ;;  %v1992_v19 = vadd.f32 %v1985_v63, %v1977_v59  ;;  %v2075_v5 = vmul.f32 %v5224_v8, %v4752_v13  ;;  %v2248_v51 = vld [vmem:[#allocation2 + $0x42] sm:$0xff]  ;;  %v2249_v59 = vld [vmem:[#allocation2 + $0x52] sm:$0xff] }
 0x1e9   : > { %2470 = vst [vmem:[%s3493_s18 + $0xd0] sm:$0xff] %v2254_v50  ;;  %v2035_v30 = vadd.f32 %v2027_v48, %v2018_v4  ;;  %v2067_v56 = vadd.f32 %v2060_v36, %v2052_v31  ;;  %v1963_v61 = vmul.f32 %v2644_v25, %v4728_v54  ;;  %v1971_v44 = vmul.f32 %v2645_v60, %v4882_v15  ;;  %v2647_v15 = vld [vmem:[%s2968_s30 + $0xb0] sm:$0xff] }
 0x1ea   : > { %v2096_v35 = vadd.f32 %v2088_v39, %v1953_v49  ;;  %v1796_v29 = vadd.f32 %v4906_v17, %v4861_v1  ;;  %v1986_v34 = vmul.f32 %v2646_v62, %v5630_v6  ;;  %v2002_v26 = vmul.f32 %v5202_v32, %v4761_v16 }
 0x1eb   : > { %v2043_v27 = vadd.f32 %v2035_v30, %v1992_v19  ;;  %v2082_v22 = vadd.f32 %v2075_v5, %v2067_v56  ;;  %v1978_v20 = vadd.f32 %v1971_v44, %v1963_v61  ;;  %v2011_v0 = vmul.f32 %v5208_v10, %v4906_v17 }
 0x1ec   : > { %v2255_v2 = vadd.f32 %v2247_v58, %v2096_v35  ;;  %v2028_v54 = vmul.f32 %v5212_v41, %v4752_v13  ;;  %v2053_v45 = vmul.f32 %v2647_v15, %v5216_v38  ;;  %v2061_v40 = vmul.f32 %v2648_v28, %v5220_v9 }
 0x1ed   : > { %v2089_v18 = vadd.f32 %v2082_v22, %v2043_v27  ;;  %v1993_v21 = vadd.f32 %v1986_v34, %v1978_v20  ;;  %v2019_v6 = vadd.f32 %v2011_v0, %v2002_v26  ;;  %v2076_v7 = vmul.f32 %v5224_v8, %v4555_v12 }
 0x1ee   : > { %2471 = vst [vmem:[%s3493_s18 + $0xd8] sm:$0xff] %v2255_v2  ;;  %v1955_v33 = vadd.f32 %v5118_v14, %v1796_v29  ;;  %v2068_v37 = vadd.f32 %v2061_v40, %v2053_v45  ;;  %v1964_v42 = vmul.f32 %v2644_v25, %v4761_v16  ;;  %v1972_v46 = vmul.f32 %v2645_v60, %v4906_v17  ;;  %v2649_v17 = vld [vmem:[%s2968_s30 + $0xb8] sm:$0xff] }
 0x1ef   : > { %v2097_v23 = vadd.f32 %v2089_v18, %v1954_v47  ;;  %v2036_v63 = vadd.f32 %v2028_v54, %v2019_v6  ;;  %v1987_v52 = vmul.f32 %v2646_v62, %v4752_v13  ;;  %v2003_v53 = vmul.f32 %v2647_v15, %v5202_v32  ;;  %v2650_v62 = vld [vmem:[%s2968_s30 + $0xf8] sm:$0xff] }
 0x1f0   : > { %v2083_v49 = vadd.f32 %v2076_v7, %v2068_v37  ;;  %v1797_v24 = vadd.f32 %v2648_v28, %v4861_v1  ;;  %v1979_v57 = vadd.f32 %v1972_v46, %v1964_v42  ;;  %v2012_v55 = vmul.f32 %v2648_v28, %v5208_v10 }
 0x1f1   : > { %v2256_v14 = vadd.f32 %v2248_v51, %v2097_v23  ;;  %v2044_v43 = vadd.f32 %v2036_v63, %v1993_v21  ;;  %v2029_v16 = vmul.f32 %v5212_v41, %v4555_v12  ;;  %v2054_v25 = vmul.f32 %v2649_v17, %v5216_v38 }
 0x1f2   : > { %v1994_v60 = vadd.f32 %v1987_v52, %v1979_v57  ;;  %v2020_v13 = vadd.f32 %v2012_v55, %v2003_v53  ;;  %v2062_v32 = vmul.f32 %v2650_v62, %v5220_v9  ;;  %v2077_v1 = vmul.f32 %v5224_v8, %v4558_v3  ;;  %v2250_v9 = vld [vmem:[#allocation2 + $0x62] sm:$0xff] }
 0x1f3   : > { %2472 = vst [vmem:[%s3493_s18 + $0xe0] sm:$0xff] %v2256_v14  ;;  %v2090_v10 = vadd.f32 %v2083_v49, %v2044_v43  ;;  %v1956_v38 = vadd.f32 %v5138_v11, %v1797_v24 }
 0x1f4   : > { %v2037_v48 = vadd.f32 %v2029_v16, %v2020_v13  ;;  %v2069_v12 = vadd.f32 %v2062_v32, %v2054_v25 }
 0x1f5   : > { %v2098_v41 = vadd.f32 %v2090_v10, %v1955_v33 }
 0x1f6   : > { %v2045_v50 = vadd.f32 %v2037_v48, %v1994_v60  ;;  %v2084_v4 = vadd.f32 %v2077_v1, %v2069_v12 }
 0x1f7   : > { %v2257_v31 = vadd.f32 %v2249_v59, %v2098_v41 }
 0x1f8   : > { %v2091_v36 = vadd.f32 %v2084_v4, %v2045_v50 }
 0x1f9   : > { %2473 = vst [vmem:[%s3493_s18 + $0xe8] sm:$0xff] %v2257_v31 }
 0x1fa   : > { %v2099_v3 = vadd.f32 %v2091_v36, %v1956_v38 }
 0x1fc   : > { %v2258_v11 = vadd.f32 %v2250_v9, %v2099_v3 }
 0x1fe   : > { %2474 = vst [vmem:[%s3493_s18 + $0xf0] sm:$0xff] %v2258_v11 }
 0x1ff   : > { %2744 = shalt.err (!%p2741_p5)
}
 0x200   : > { %s2745_s17 = scalar_lea.hbm %s5290_s29, 4096  ;;  %s2749_s26 = scalar_lea.hbm %s5338_s3, 16384 }
 0x201   : > { %p2746_p10 = scmp.ne.s32.totalorder %s5290_s29, %s2745_s17  ;;  %p2750_p4 = scmp.lt.s32.totalorder %s5290_s29, %s5338_s3 }
 0x202   : > { %p2751_p6 = scmp.lt.s32.totalorder %s2749_s26, %s2745_s17 }
 0x203   : > { %p2747_p9 = pnand %p2746_p10, %p5632_p2 }
 0x204   : > { %p2752_p8 = por %p2751_p6, %p2750_p4 }
 0x205   : > { %p2748_p1 = pneg %p2747_p9 }
 0x207   : > { %p2753_p3 = pnand %p2752_p8, %p2748_p1 }
 0x209   : > { %2756 = shalt.err (!%p2753_p3)
}
 0x20a   : > { %s2808_s30 = smov 128   ;;  %s2809_s18 = smov 8  }
 0x20b   : > { %2493 = dma.vmem_to_hbm [thread:$0]  (%p5632_p2), %s5292_s27, 4096, %s5290_s29, %s2270_s4, %s2808_s30, %s2808_s30, %s2809_s18  }
 0x20c PF: > { %p2515_p7 = scmp.ge.s32.totalorder %s2799_s15, 2  ;;  %s2298_s20 = sand.u32 1, %s2787_s12  }
 0x20d   : > { %p5633_p11 = scmp.ne.s32.totalorder %s5455_s19, 0  ;;  %s2299_s28 = scalar_lea.sflag [#allocation5], %s2298_s20 }
 0x20f   : > { %p2507_p12 = pnand %p2515_p7, %p5633_p11 }
 0x211   : > { %p2508_p13 = pneg %p2507_p12 }
 0x213   : > { %2782 = dma.done.wait (%p2508_p13), %s2299_s28, 4096  }
 0x214   : > { %2784 = vsyncadd (%p2508_p13), %s2299_s28, 4294963200  ;;  %p17_p0 = scmp.ge.s32.totalorder %s2904_s7, 6   ;;  %s5634_s12 = smov %s2791_s13 }
 0x215   : > { %s5635_s13 = smov %s2795_s14  ;;  %s5636_s14 = smov %s2920_s11 }
 0x216   : > { %s5637_s15 = smov %s2904_s7  ;;  %19 = sbr.rel (!%p17_p0) target bundleno = 6 (0x6), region = 117 }
 0x21b   :  { %2304 = vsyncpa [#allocation4], 1 }
 0x21c   :  { %2306 = vsyncpa [#allocation4 + $0x1], 1 }
 0x21d   :  { %2307 = vsyncpa [#allocation7], 1 }
 0x21e   :  { %2308 = vsyncpa [#allocation5], 1 }
 0x21f   :  { %2310 = vsyncpa [#allocation5 + $0x1], 1 }

</bundles_post_ra>
